<compile_context>
chip_gen: v7x
topology: tpu7x:2x2x1
jax: 0.10.0
libtpu: 0.0.40
codegen_flags: <defaults>
</compile_context>

<pallas_src>
import functools

import jax
import jax.numpy as jnp
import numpy as np
from jax.experimental import pallas as pl
from jax.experimental.pallas import tpu as pltpu


def _time_mixing_kernel(
    # ---- inputs
    x_ref,                              # (Tt, Bt, D) f32  pipelined time chunk
    xprev_ref,                          # (Bt, D) f32      previous-token state
    num_last_ref,                       # (Bt, D) f32      numerator_last
    den_last_ref,                       # (Bt, D) f32      denominator_last
    mu_k_ref, mu_v_ref, mu_r_ref,       # (1, D) f32
    w_ref, u_ref,                       # (1, D) f32
    wk_ref, wv_ref, wr_ref, wout_ref,   # (D, D) bf16, resident in VMEM
    # ---- outputs
    out_ref,                            # (Tt, Bt, D) f32
    xlast_out_ref,                      # (Bt, D) f32  carried previous-token state
    num_out_ref,                        # (Bt, D) f32  carried numerator state
    den_out_ref,                        # (Bt, D) f32  carried denominator state
):
    Tt, B, D = x_ref.shape

    # The state outputs have a time-constant block index, so they stay resident
    # in VMEM across the inner ("arbitrary") time axis and double as the
    # carried recurrence state — no scratch buffers needed.
    @pl.when(pl.program_id(1) == 0)
    def _init():
        xlast_out_ref[...] = xprev_ref[...]
        num_out_ref[...] = num_last_ref[...]
        den_out_ref[...] = den_last_ref[...]

    x = x_ref[...]                                       # (Tt, B, D) f32

    # Token shift (previous token per position), carried across chunks/calls.
    # TODO(synk): PreviousMixing assumed to be the standard RWKV token shift.
    x_prev_row = xlast_out_ref[...].reshape(1, B, D)
    if Tt > 1:
        xs = jnp.concatenate([x_prev_row, x[: Tt - 1]], axis=0)
    else:
        xs = x_prev_row
    xlast_out_ref[...] = x[Tt - 1]

    # Projections: f32 mixing, bf16 operands on the MXU, f32 accumulation.
    def project(mu_ref, weight_ref):
        mu = mu_ref[...]                                 # (1, D) broadcasts
        mixed = x * mu + xs * (1.0 - mu)
        mixed = mixed.reshape(Tt * B, D).astype(jnp.bfloat16)
        return jnp.dot(mixed, weight_ref[...],
                       preferred_element_type=jnp.float32).reshape(Tt, B, D)

    k = project(mu_k_ref, wk_ref)
    v = project(mu_v_ref, wv_ref)
    r = project(mu_r_ref, wr_ref)

    decay = jnp.exp(w_ref[...])                          # (1, D)  exp(w) > 0
    eu = jnp.exp(u_ref[...])                             # (1, D)

    # Carry-independent elementwise work, vectorized over the whole chunk.
    # TODO(synk): for production-scale logits use a running-max / log-space
    # recurrence — raw exp(k) can overflow f32.
    ek = jnp.exp(k)                                      # (Tt, B, D)
    ekv = ek * v
    sr = jax.nn.sigmoid(r)

    # Log-depth (Hillis–Steele) inclusive scan of the linear recurrence
    #     a[t] = exp_w * a[t-1] + z[t],   exp_w = exp(-exp(w)) per channel.
    # An element currently covering c positions carries coefficient exp_w^c;
    # before the level with offset d the coverage is min(d, t+1), which
    # depends only on t, so both scans (den / num) share each level's coefs.
    t_idx = jax.lax.broadcasted_iota(jnp.int32, (Tt, 1, D), 0).astype(jnp.float32)
    vd = ek
    vn = ekv
    d = 1
    while d < Tt:
        cov = jnp.minimum(float(d), t_idx + 1.0)         # (Tt, 1, D)
        coef = jnp.exp(-cov * decay)                     # exp_w ** cov
        zpad = jnp.zeros((d, B, D), jnp.float32)
        vd = jnp.concatenate([zpad, vd[: Tt - d]], axis=0) * coef + vd
        vn = jnp.concatenate([zpad, vn[: Tt - d]], axis=0) * coef + vn
        d *= 2

    # Add the previous-call / previous-chunk carry:
    #   den[t] = exp_w^(t+1) * den_carry + sum_{s<=t} exp_w^(t-s) * exp(k[s])
    ew_pow = jnp.exp(-(t_idx + 1.0) * decay)             # (Tt, 1, D)
    den_carry = den_out_ref[...]
    num_carry = num_out_ref[...]
    den = vd + ew_pow * den_carry                        # (Tt, B, D)
    num = vn + ew_pow * num_carry

    # Per-step output uses den[t-1]:
    #   (den[t] - exp_k)/exp_w + exp_k*exp_u  ==  den[t-1] + exp_k*exp_u
    dc = den_carry.reshape(1, B, D)
    nc = num_carry.reshape(1, B, D)
    if Tt > 1:
        den_prev = jnp.concatenate([dc, den[: Tt - 1]], axis=0)
        num_prev = jnp.concatenate([nc, num[: Tt - 1]], axis=0)
    else:
        den_prev, num_prev = dc, nc
    den_o = den_prev + ek * eu
    num_o = num_prev + ekv * eu

    # Gated output + output projection (bf16 MXU, f32 accumulation).
    g = sr * num_o * pl.reciprocal(den_o, approx=True)
    g = g.reshape(Tt * B, D).astype(jnp.bfloat16)
    out = jnp.dot(g, wout_ref[...], preferred_element_type=jnp.float32)
    out_ref[...] = out.reshape(Tt, B, D)

    # Updated carried state = last row of the inclusive prefixes.
    den_out_ref[...] = den[Tt - 1]
    num_out_ref[...] = num[Tt - 1]


@functools.partial(jax.jit, static_argnames=("time_chunk", "batch_block"))
def time_mixing_pallas(x, params, state, *, time_chunk=32, batch_block=None):
    T, B, D = x.shape
    Tt = int(time_chunk)
    Bt = int(batch_block) if batch_block is not None else B
    if T % Tt != 0:
        raise ValueError("T must be a multiple of time_chunk")
    if B % Bt != 0:
        raise ValueError("B must be a multiple of batch_block")
    if D % 128 != 0:
        raise ValueError("D must be a multiple of 128 (TPU lane axis)")
    if Bt % 8 != 0:
        raise ValueError("batch_block must be a multiple of 8 (f32 sublane tile)")
    nb = B // Bt
    nt = T // Tt

    x_map = lambda b, t: (t, b, 0)
    state_map = lambda b, t: (b, 0)
    const_map = lambda b, t: (0, 0)

    in_specs = [
        pl.BlockSpec((Tt, Bt, D), x_map),   # x (pipelined over time chunks)
        pl.BlockSpec((Bt, D), state_map),   # x_prev
        pl.BlockSpec((Bt, D), state_map),   # num_last
        pl.BlockSpec((Bt, D), state_map),   # den_last
        pl.BlockSpec((1, D), const_map),    # mu_k
        pl.BlockSpec((1, D), const_map),    # mu_v
        pl.BlockSpec((1, D), const_map),    # mu_r
        pl.BlockSpec((1, D), const_map),    # w
        pl.BlockSpec((1, D), const_map),    # u
        pl.BlockSpec((D, D), const_map),    # Wk  (bf16, resident)
        pl.BlockSpec((D, D), const_map),    # Wv
        pl.BlockSpec((D, D), const_map),    # Wr
        pl.BlockSpec((D, D), const_map),    # Wout
    ]
    out_specs = [
        pl.BlockSpec((Tt, Bt, D), x_map),   # y
        pl.BlockSpec((Bt, D), state_map),   # new x_prev
        pl.BlockSpec((Bt, D), state_map),   # new num_last
        pl.BlockSpec((Bt, D), state_map),   # new den_last
    ]
    out_shape = [
        jax.ShapeDtypeStruct((T, B, D), jnp.float32),
        jax.ShapeDtypeStruct((B, D), jnp.float32),
        jax.ShapeDtypeStruct((B, D), jnp.float32),
        jax.ShapeDtypeStruct((B, D), jnp.float32),
    ]

    # VMEM budget: bf16 weights (assume double-buffered) + small params +
    # pipelined x/y chunk blocks + state blocks + chunk-sized value temps,
    # 2x headroom, clamped to the chip's capacity.
    chunk = Tt * Bt * D * 4
    est = (4 * D * D * 2 * 2
           + 5 * D * 4 * 2
           + 6 * Bt * D * 4 * 2
           + 2 * 2 * chunk
           + 16 * chunk)
    try:
        cap = int(pltpu.get_tpu_info().vmem_capacity_bytes)
    except Exception:
        cap = 64 * 2 ** 20
    vmem_limit = int(min(max(2 * est, 32 * 2 ** 20), cap))

    y, x_prev, num_last, den_last = pl.pallas_call(
        _time_mixing_kernel,
        grid=(nb, nt),
        in_specs=in_specs,
        out_specs=out_specs,
        out_shape=out_shape,
        compiler_params=pltpu.CompilerParams(
            dimension_semantics=("parallel", "arbitrary"),  # batch ∥, time = recurrence
            vmem_limit_bytes=vmem_limit),
    )(x, state["x_prev"], state["num_last"], state["den_last"],
      params["mu_k"], params["mu_v"], params["mu_r"],
      params["w"], params["u"],
      params["Wk_t"], params["Wv_t"], params["Wr_t"], params["Wout_t"])

    new_state = {"x_prev": x_prev, "num_last": num_last, "den_last": den_last}
    return y, new_state


def time_mixing_reference(x, params, state):
    """Pure-JAX replica of the PyTorch forward.

    The module computes the causal exp-decay convolution with an FFT; that
    convolution is exactly the first-order recurrence
        den[t] = exp_w * den[t-1] + exp(k[t]),  den[-1] = denominator_last
    which lax.scan implements here.  The per-step output formula is kept
    verbatim from the module.  Matmul operands are cast to bf16 to mirror the
    kernel's MXU precision choice.
    """
    T, B, D = x.shape
    xs = jnp.concatenate([state["x_prev"][None], x[:-1]], axis=0)

    def proj(mu, W):
        mixed = (x * mu + xs * (1.0 - mu)).astype(jnp.bfloat16)
        return jnp.dot(mixed.reshape(T * B, D), W,
                       preferred_element_type=jnp.float32).reshape(T, B, D)

    k = proj(params["mu_k"], params["Wk_t"])
    v = proj(params["mu_v"], params["Wv_t"])
    r = proj(params["mu_r"], params["Wr_t"])

    exp_w = jnp.exp(-jnp.exp(params["w"]))      # (1, D)
    exp_u = jnp.exp(params["u"])                # (1, D)
    exp_k = jnp.exp(k)                          # (T, B, D)
    exp_k_v = exp_k * v

    def scan_step(carry, inp):
        den_prev, num_prev = carry              # (B, D)
        ek_t, ekv_t = inp
        den_t = exp_w * den_prev + ek_t         # == denominator[t]
        num_t = exp_w * num_prev + ekv_t        # == numerator[t]
        den_out = (den_t - ek_t) / exp_w + ek_t * exp_u   # verbatim module math
        num_out = (num_t - ekv_t) / exp_w + ekv_t * exp_u
        return (den_t, num_t), (den_out, num_out)

    (den_last, num_last), (den_out, num_out) = jax.lax.scan(
        scan_step, (state["den_last"], state["num_last"]), (exp_k, exp_k_v))

    gated = (jax.nn.sigmoid(r) * num_out / den_out).astype(jnp.bfloat16)
    y = jnp.dot(gated.reshape(T * B, D), params["Wout_t"],
                preferred_element_type=jnp.float32).reshape(T, B, D)
    new_state = {"x_prev": x[-1], "num_last": num_last, "den_last": den_last}
    return y, new_state


def make_params(key, D):
    ks = jax.random.split(key, 9)
    scale = 1.0 / np.sqrt(D)

    def linear(k):
        return (jax.random.normal(k, (D, D), jnp.float32) * scale
                ).astype(jnp.bfloat16)

    return {
        "mu_k": jax.random.uniform(ks[0], (1, D), jnp.float32),
        "mu_v": jax.random.uniform(ks[1], (1, D), jnp.float32),
        "mu_r": jax.random.uniform(ks[2], (1, D), jnp.float32),
        # Pre-transposed (in, out), bf16 for the MXU.
        "Wk_t": linear(ks[3]),
        "Wv_t": linear(ks[4]),
        "Wr_t": linear(ks[5]),
        "Wout_t": linear(ks[6]),
        # Scaled randn so exp(-exp(w)) stays far from f32 underflow (keeps the
        # reference's verbatim (den - ek)/exp(w) formula well conditioned).
        "w": jax.random.normal(ks[7], (1, D), jnp.float32) * 0.5,
        "u": jax.random.normal(ks[8], (1, D), jnp.float32) * 0.5,
    }


def make_initial_state(B, D):
    # First-call semantics: all hidden buffers are zero.
    z = jnp.zeros((B, D), jnp.float32)
    return {"x_prev": z, "num_last": z, "den_last": z}


if __name__ == "__main__":
    # (seq_len, batch, dim): Tt*Bt = 32*8 = 256 rows per MXU matmul,
    # D = 128 lane-dense, two batch blocks to exercise the parallel axis.
    T, B, D = 64, 16, 128
    key = jax.random.PRNGKey(0)
    k_x1, k_x2, k_p = jax.random.split(key, 3)

    x1 = jax.random.normal(k_x1, (T, B, D), jnp.float32)
    x2 = jax.random.normal(k_x2, (T, B, D), jnp.float32)
    params = make_params(k_p, D)
    state0 = make_initial_state(B, D)

    # First call (zero hidden state), second call chained on the returned
    # hidden state (mirrors the module's registered buffers).
    y1, state1 = time_mixing_pallas(x1, params, state0,
                                    time_chunk=32, batch_block=8)
    y2, state2 = time_mixing_pallas(x2, params, state1,
                                    time_chunk=32, batch_block=8)
    jax.block_until_ready((y1, y2, state2))

    ry1, rstate1 = time_mixing_reference(x1, params, state0)
    ry2, rstate2 = time_mixing_reference(x2, params, rstate1)

    tol = dict(rtol=2e-2, atol=2e-2)   # bf16 MXU operands on both sides
    np.testing.assert_allclose(np.asarray(y1), np.asarray(ry1), **tol)
    np.testing.assert_allclose(np.asarray(y2), np.asarray(ry2), **tol)
    for name in ("x_prev", "num_last", "den_last"):
        np.testing.assert_allclose(np.asarray(state2[name]),
                                   np.asarray(rstate2[name]), **tol)

    print("KERNEL_OK")
</pallas_src>

<mosaic_0001>
module attributes {stable_mosaic.version = 11 : i64} {
  func.func @_time_mixing_kernel(%arg0: i32, %arg1: i32, %arg2: memref<32x8x128xf32, #tpu.memory_space<vmem>>, %arg3: memref<8x128xf32, #tpu.memory_space<vmem>>, %arg4: memref<8x128xf32, #tpu.memory_space<vmem>>, %arg5: memref<8x128xf32, #tpu.memory_space<vmem>>, %arg6: memref<1x128xf32, #tpu.memory_space<vmem>>, %arg7: memref<1x128xf32, #tpu.memory_space<vmem>>, %arg8: memref<1x128xf32, #tpu.memory_space<vmem>>, %arg9: memref<1x128xf32, #tpu.memory_space<vmem>>, %arg10: memref<1x128xf32, #tpu.memory_space<vmem>>, %arg11: memref<128x128xbf16, #tpu.memory_space<vmem>>, %arg12: memref<128x128xbf16, #tpu.memory_space<vmem>>, %arg13: memref<128x128xbf16, #tpu.memory_space<vmem>>, %arg14: memref<128x128xbf16, #tpu.memory_space<vmem>>, %arg15: memref<32x8x128xf32, #tpu.memory_space<vmem>>, %arg16: memref<8x128xf32, #tpu.memory_space<vmem>>, %arg17: memref<8x128xf32, #tpu.memory_space<vmem>>, %arg18: memref<8x128xf32, #tpu.memory_space<vmem>>) attributes {dimension_semantics = [#tpu.dimension_semantics<parallel>, #tpu.dimension_semantics<arbitrary>], iteration_bounds = array<i64: 2, 2>, scalar_prefetch = 0 : i64, scratch_operands = 0 : i64, tpu.core_type = #tpu.core_type<tc>, window_params = [{transform_indices = @transform_0, window_bounds = array<i64: 32, 8, 128>}, {transform_indices = @transform_1, window_bounds = array<i64: 8, 128>}, {transform_indices = @transform_2, window_bounds = array<i64: 8, 128>}, {transform_indices = @transform_3, window_bounds = array<i64: 8, 128>}, {pipeline_mode = #tpu.pipeline_mode<synchronous>, transform_indices = @transform_4, window_bounds = array<i64: 1, 128>}, {pipeline_mode = #tpu.pipeline_mode<synchronous>, transform_indices = @transform_5, window_bounds = array<i64: 1, 128>}, {pipeline_mode = #tpu.pipeline_mode<synchronous>, transform_indices = @transform_6, window_bounds = array<i64: 1, 128>}, {pipeline_mode = #tpu.pipeline_mode<synchronous>, transform_indices = @transform_7, window_bounds = array<i64: 1, 128>}, {pipeline_mode = #tpu.pipeline_mode<synchronous>, transform_indices = @transform_8, window_bounds = array<i64: 1, 128>}, {pipeline_mode = #tpu.pipeline_mode<synchronous>, transform_indices = @transform_9, window_bounds = array<i64: 128, 128>}, {pipeline_mode = #tpu.pipeline_mode<synchronous>, transform_indices = @transform_10, window_bounds = array<i64: 128, 128>}, {pipeline_mode = #tpu.pipeline_mode<synchronous>, transform_indices = @transform_11, window_bounds = array<i64: 128, 128>}, {pipeline_mode = #tpu.pipeline_mode<synchronous>, transform_indices = @transform_12, window_bounds = array<i64: 128, 128>}, {transform_indices = @transform_13, window_bounds = array<i64: 32, 8, 128>}, {transform_indices = @transform_14, window_bounds = array<i64: 8, 128>}, {transform_indices = @transform_15, window_bounds = array<i64: 8, 128>}, {transform_indices = @transform_16, window_bounds = array<i64: 8, 128>}]} {
    %c0_i32 = arith.constant 0 : i32
    %0 = arith.cmpi eq, %arg1, %c0_i32 : i32
    %1 = arith.extui %0 : i1 to i32
    %c0_i32_0 = arith.constant 0 : i32
    %2 = arith.cmpi ne, %1, %c0_i32_0 : i32
    scf.if %2 {
      %c0_65 = arith.constant 0 : index
      %c0_66 = arith.constant 0 : index
      %223 = vector.load %arg3[%c0_65, %c0_66] : memref<8x128xf32, #tpu.memory_space<vmem>>, vector<8x128xf32>
      %c0_67 = arith.constant 0 : index
      %c0_68 = arith.constant 0 : index
      %224 = vector.load %arg16[%c0_67, %c0_68] : memref<8x128xf32, #tpu.memory_space<vmem>>, vector<8x128xf32>
      tpu.vector_store %arg16[%c0_67, %c0_68], %223 {strides = array<i32>} : memref<8x128xf32, #tpu.memory_space<vmem>>, vector<8x128xf32>,
      %c0_69 = arith.constant 0 : index
      %c0_70 = arith.constant 0 : index
      %225 = vector.load %arg4[%c0_69, %c0_70] : memref<8x128xf32, #tpu.memory_space<vmem>>, vector<8x128xf32>
      %c0_71 = arith.constant 0 : index
      %c0_72 = arith.constant 0 : index
      %226 = vector.load %arg17[%c0_71, %c0_72] : memref<8x128xf32, #tpu.memory_space<vmem>>, vector<8x128xf32>
      tpu.vector_store %arg17[%c0_71, %c0_72], %225 {strides = array<i32>} : memref<8x128xf32, #tpu.memory_space<vmem>>, vector<8x128xf32>,
      %c0_73 = arith.constant 0 : index
      %c0_74 = arith.constant 0 : index
      %227 = vector.load %arg5[%c0_73, %c0_74] : memref<8x128xf32, #tpu.memory_space<vmem>>, vector<8x128xf32>
      %c0_75 = arith.constant 0 : index
      %c0_76 = arith.constant 0 : index
      %228 = vector.load %arg18[%c0_75, %c0_76] : memref<8x128xf32, #tpu.memory_space<vmem>>, vector<8x128xf32>
      tpu.vector_store %arg18[%c0_75, %c0_76], %227 {strides = array<i32>} : memref<8x128xf32, #tpu.memory_space<vmem>>, vector<8x128xf32>,
    } else {
    }
    %c0 = arith.constant 0 : index
    %c0_1 = arith.constant 0 : index
    %c0_2 = arith.constant 0 : index
    %3 = vector.load %arg2[%c0, %c0_1, %c0_2] : memref<32x8x128xf32, #tpu.memory_space<vmem>>, vector<32x8x128xf32>
    %c0_3 = arith.constant 0 : index
    %c0_4 = arith.constant 0 : index
    %4 = vector.load %arg16[%c0_3, %c0_4] : memref<8x128xf32, #tpu.memory_space<vmem>>, vector<8x128xf32>
    %5 = vector.shape_cast %4 : vector<8x128xf32> to vector<1x8x128xf32>
    %6 = vector.extract_strided_slice %3 {offsets = [0, 0, 0], sizes = [31, 8, 128], strides = [1, 1, 1]} : vector<32x8x128xf32> to vector<31x8x128xf32>
    %7 = tpu.concatenate %5, %6 in 0 : vector<1x8x128xf32>, vector<31x8x128xf32> -> vector<32x8x128xf32>
    %8 = vector.extract_strided_slice %3 {offsets = [31, 0, 0], sizes = [1, 8, 128], strides = [1, 1, 1]} : vector<32x8x128xf32> to vector<1x8x128xf32>
    %9 = vector.shape_cast %8 : vector<1x8x128xf32> to vector<8x128xf32>
    %c0_5 = arith.constant 0 : index
    %c0_6 = arith.constant 0 : index
    %10 = vector.load %arg16[%c0_5, %c0_6] : memref<8x128xf32, #tpu.memory_space<vmem>>, vector<8x128xf32>
    tpu.vector_store %arg16[%c0_5, %c0_6], %9 {strides = array<i32>} : memref<8x128xf32, #tpu.memory_space<vmem>>, vector<8x128xf32>,
    %c0_7 = arith.constant 0 : index
    %c0_8 = arith.constant 0 : index
    %11 = vector.load %arg6[%c0_7, %c0_8] : memref<1x128xf32, #tpu.memory_space<vmem>>, vector<1x128xf32>
    %12 = vector.shape_cast %11 : vector<1x128xf32> to vector<1x1x128xf32>
    %13 = vector.broadcast %12 : vector<1x1x128xf32> to vector<32x8x128xf32>
    %14 = arith.mulf %3, %13 : vector<32x8x128xf32>
    %cst = arith.constant 1.000000e+00 : f32
    %15 = vector.broadcast %cst : f32 to vector<1x128xf32>
    %16 = arith.subf %15, %11 : vector<1x128xf32>
    %17 = vector.shape_cast %16 : vector<1x128xf32> to vector<1x1x128xf32>
    %18 = vector.broadcast %17 : vector<1x1x128xf32> to vector<32x8x128xf32>
    %19 = arith.mulf %7, %18 : vector<32x8x128xf32>
    %20 = arith.addf %14, %19 : vector<32x8x128xf32>
    %21 = vector.shape_cast %20 : vector<32x8x128xf32> to vector<256x128xf32>
    %22 = arith.truncf %21 : vector<256x128xf32> to vector<256x128xbf16>
    %c0_9 = arith.constant 0 : index
    %c0_10 = arith.constant 0 : index
    %23 = vector.load %arg11[%c0_9, %c0_10] : memref<128x128xbf16, #tpu.memory_space<vmem>>, vector<128x128xbf16>
    %cst_11 = arith.constant dense<0.000000e+00> : vector<256x128xf32>
    %24 = tpu.matmul %22, %23, %cst_11 {dimension_numbers = #tpu.dot_dimension_numbers<[1], [0], [0], [1], [0, 0, 1, 1], [], []>} : vector<256x128xbf16>, vector<128x128xbf16>, vector<256x128xf32> -> vector<256x128xf32>
    %25 = vector.shape_cast %24 : vector<256x128xf32> to vector<32x8x128xf32>
    %c0_12 = arith.constant 0 : index
    %c0_13 = arith.constant 0 : index
    %26 = vector.load %arg7[%c0_12, %c0_13] : memref<1x128xf32, #tpu.memory_space<vmem>>, vector<1x128xf32>
    %27 = vector.shape_cast %26 : vector<1x128xf32> to vector<1x1x128xf32>
    %28 = vector.broadcast %27 : vector<1x1x128xf32> to vector<32x8x128xf32>
    %29 = arith.mulf %3, %28 : vector<32x8x128xf32>
    %cst_14 = arith.constant 1.000000e+00 : f32
    %30 = vector.broadcast %cst_14 : f32 to vector<1x128xf32>
    %31 = arith.subf %30, %26 : vector<1x128xf32>
    %32 = vector.shape_cast %31 : vector<1x128xf32> to vector<1x1x128xf32>
    %33 = vector.broadcast %32 : vector<1x1x128xf32> to vector<32x8x128xf32>
    %34 = arith.mulf %7, %33 : vector<32x8x128xf32>
    %35 = arith.addf %29, %34 : vector<32x8x128xf32>
    %36 = vector.shape_cast %35 : vector<32x8x128xf32> to vector<256x128xf32>
    %37 = arith.truncf %36 : vector<256x128xf32> to vector<256x128xbf16>
    %c0_15 = arith.constant 0 : index
    %c0_16 = arith.constant 0 : index
    %38 = vector.load %arg12[%c0_15, %c0_16] : memref<128x128xbf16, #tpu.memory_space<vmem>>, vector<128x128xbf16>
    %cst_17 = arith.constant dense<0.000000e+00> : vector<256x128xf32>
    %39 = tpu.matmul %37, %38, %cst_17 {dimension_numbers = #tpu.dot_dimension_numbers<[1], [0], [0], [1], [0, 0, 1, 1], [], []>} : vector<256x128xbf16>, vector<128x128xbf16>, vector<256x128xf32> -> vector<256x128xf32>
    %40 = vector.shape_cast %39 : vector<256x128xf32> to vector<32x8x128xf32>
    %c0_18 = arith.constant 0 : index
    %c0_19 = arith.constant 0 : index
    %41 = vector.load %arg8[%c0_18, %c0_19] : memref<1x128xf32, #tpu.memory_space<vmem>>, vector<1x128xf32>
    %42 = vector.shape_cast %41 : vector<1x128xf32> to vector<1x1x128xf32>
    %43 = vector.broadcast %42 : vector<1x1x128xf32> to vector<32x8x128xf32>
    %44 = arith.mulf %3, %43 : vector<32x8x128xf32>
    %cst_20 = arith.constant 1.000000e+00 : f32
    %45 = vector.broadcast %cst_20 : f32 to vector<1x128xf32>
    %46 = arith.subf %45, %41 : vector<1x128xf32>
    %47 = vector.shape_cast %46 : vector<1x128xf32> to vector<1x1x128xf32>
    %48 = vector.broadcast %47 : vector<1x1x128xf32> to vector<32x8x128xf32>
    %49 = arith.mulf %7, %48 : vector<32x8x128xf32>
    %50 = arith.addf %44, %49 : vector<32x8x128xf32>
    %51 = vector.shape_cast %50 : vector<32x8x128xf32> to vector<256x128xf32>
    %52 = arith.truncf %51 : vector<256x128xf32> to vector<256x128xbf16>
    %c0_21 = arith.constant 0 : index
    %c0_22 = arith.constant 0 : index
    %53 = vector.load %arg13[%c0_21, %c0_22] : memref<128x128xbf16, #tpu.memory_space<vmem>>, vector<128x128xbf16>
    %cst_23 = arith.constant dense<0.000000e+00> : vector<256x128xf32>
    %54 = tpu.matmul %52, %53, %cst_23 {dimension_numbers = #tpu.dot_dimension_numbers<[1], [0], [0], [1], [0, 0, 1, 1], [], []>} : vector<256x128xbf16>, vector<128x128xbf16>, vector<256x128xf32> -> vector<256x128xf32>
    %55 = vector.shape_cast %54 : vector<256x128xf32> to vector<32x8x128xf32>
    %c0_24 = arith.constant 0 : index
    %c0_25 = arith.constant 0 : index
    %56 = vector.load %arg9[%c0_24, %c0_25] : memref<1x128xf32, #tpu.memory_space<vmem>>, vector<1x128xf32>
    %57 = math.exp %56 : vector<1x128xf32>
    %c0_26 = arith.constant 0 : index
    %c0_27 = arith.constant 0 : index
    %58 = vector.load %arg10[%c0_26, %c0_27] : memref<1x128xf32, #tpu.memory_space<vmem>>, vector<1x128xf32>
    %59 = math.exp %58 : vector<1x128xf32>
    %60 = math.exp %25 : vector<32x8x128xf32>
    %61 = arith.mulf %60, %40 : vector<32x8x128xf32>
    %62 = arith.negf %55 : vector<32x8x128xf32>
    %63 = math.exp %62 : vector<32x8x128xf32>
    %cst_28 = arith.constant 1.000000e+00 : f32
    %64 = vector.broadcast %cst_28 : f32 to vector<32x8x128xf32>
    %65 = arith.addf %64, %63 : vector<32x8x128xf32>
    %66 = arith.divf %64, %65 : vector<32x8x128xf32>
    %67 = tpu.iota {dimensions = array<i32: 0>} : vector<32x1x128xi32>
    %68 = arith.sitofp %67 : vector<32x1x128xi32> to vector<32x1x128xf32>
    %cst_29 = arith.constant 1.000000e+00 : f32
    %69 = vector.broadcast %cst_29 : f32 to vector<32x1x128xf32>
    %70 = arith.addf %68, %69 : vector<32x1x128xf32>
    %cst_30 = arith.constant 1.000000e+00 : f32
    %71 = vector.broadcast %cst_30 : f32 to vector<32x1x128xf32>
    %72 = arith.minimumf %71, %70 : vector<32x1x128xf32>
    %cst_31 = arith.constant 0.000000e+00 : f32
    %73 = vector.broadcast %cst_31 : f32 to vector<32x1x128xf32>
    %74 = arith.subf %73, %72 : vector<32x1x128xf32>
    %75 = vector.shape_cast %57 : vector<1x128xf32> to vector<1x1x128xf32>
    %76 = vector.broadcast %75 : vector<1x1x128xf32> to vector<32x1x128xf32>
    %77 = arith.mulf %74, %76 : vector<32x1x128xf32>
    %78 = math.exp %77 : vector<32x1x128xf32>
    %cst_32 = arith.constant 0.000000e+00 : f32
    %79 = vector.broadcast %cst_32 : f32 to vector<1x8x128xf32>
    %80 = vector.extract_strided_slice %60 {offsets = [0, 0, 0], sizes = [31, 8, 128], strides = [1, 1, 1]} : vector<32x8x128xf32> to vector<31x8x128xf32>
    %81 = tpu.concatenate %79, %80 in 0 : vector<1x8x128xf32>, vector<31x8x128xf32> -> vector<32x8x128xf32>
    %82 = vector.broadcast %78 : vector<32x1x128xf32> to vector<32x8x128xf32>
    %83 = arith.mulf %81, %82 : vector<32x8x128xf32>
    %84 = arith.addf %83, %60 : vector<32x8x128xf32>
    %85 = vector.extract_strided_slice %61 {offsets = [0, 0, 0], sizes = [31, 8, 128], strides = [1, 1, 1]} : vector<32x8x128xf32> to vector<31x8x128xf32>
    %86 = tpu.concatenate %79, %85 in 0 : vector<1x8x128xf32>, vector<31x8x128xf32> -> vector<32x8x128xf32>
    %87 = vector.broadcast %78 : vector<32x1x128xf32> to vector<32x8x128xf32>
    %88 = arith.mulf %86, %87 : vector<32x8x128xf32>
    %89 = arith.addf %88, %61 : vector<32x8x128xf32>
    %cst_33 = arith.constant 1.000000e+00 : f32
    %90 = vector.broadcast %cst_33 : f32 to vector<32x1x128xf32>
    %91 = arith.addf %68, %90 : vector<32x1x128xf32>
    %cst_34 = arith.constant 2.000000e+00 : f32
    %92 = vector.broadcast %cst_34 : f32 to vector<32x1x128xf32>
    %93 = arith.minimumf %92, %91 : vector<32x1x128xf32>
    %cst_35 = arith.constant 0.000000e+00 : f32
    %94 = vector.broadcast %cst_35 : f32 to vector<32x1x128xf32>
    %95 = arith.subf %94, %93 : vector<32x1x128xf32>
    %96 = vector.shape_cast %57 : vector<1x128xf32> to vector<1x1x128xf32>
    %97 = vector.broadcast %96 : vector<1x1x128xf32> to vector<32x1x128xf32>
    %98 = arith.mulf %95, %97 : vector<32x1x128xf32>
    %99 = math.exp %98 : vector<32x1x128xf32>
    %cst_36 = arith.constant 0.000000e+00 : f32
    %100 = vector.broadcast %cst_36 : f32 to vector<2x8x128xf32>
    %101 = vector.extract_strided_slice %84 {offsets = [0, 0, 0], sizes = [30, 8, 128], strides = [1, 1, 1]} : vector<32x8x128xf32> to vector<30x8x128xf32>
    %102 = tpu.concatenate %100, %101 in 0 : vector<2x8x128xf32>, vector<30x8x128xf32> -> vector<32x8x128xf32>
    %103 = vector.broadcast %99 : vector<32x1x128xf32> to vector<32x8x128xf32>
    %104 = arith.mulf %102, %103 : vector<32x8x128xf32>
    %105 = arith.addf %104, %84 : vector<32x8x128xf32>
    %106 = vector.extract_strided_slice %89 {offsets = [0, 0, 0], sizes = [30, 8, 128], strides = [1, 1, 1]} : vector<32x8x128xf32> to vector<30x8x128xf32>
    %107 = tpu.concatenate %100, %106 in 0 : vector<2x8x128xf32>, vector<30x8x128xf32> -> vector<32x8x128xf32>
    %108 = vector.broadcast %99 : vector<32x1x128xf32> to vector<32x8x128xf32>
    %109 = arith.mulf %107, %108 : vector<32x8x128xf32>
    %110 = arith.addf %109, %89 : vector<32x8x128xf32>
    %cst_37 = arith.constant 1.000000e+00 : f32
    %111 = vector.broadcast %cst_37 : f32 to vector<32x1x128xf32>
    %112 = arith.addf %68, %111 : vector<32x1x128xf32>
    %cst_38 = arith.constant 4.000000e+00 : f32
    %113 = vector.broadcast %cst_38 : f32 to vector<32x1x128xf32>
    %114 = arith.minimumf %113, %112 : vector<32x1x128xf32>
    %cst_39 = arith.constant 0.000000e+00 : f32
    %115 = vector.broadcast %cst_39 : f32 to vector<32x1x128xf32>
    %116 = arith.subf %115, %114 : vector<32x1x128xf32>
    %117 = vector.shape_cast %57 : vector<1x128xf32> to vector<1x1x128xf32>
    %118 = vector.broadcast %117 : vector<1x1x128xf32> to vector<32x1x128xf32>
    %119 = arith.mulf %116, %118 : vector<32x1x128xf32>
    %120 = math.exp %119 : vector<32x1x128xf32>
    %cst_40 = arith.constant 0.000000e+00 : f32
    %121 = vector.broadcast %cst_40 : f32 to vector<4x8x128xf32>
    %122 = vector.extract_strided_slice %105 {offsets = [0, 0, 0], sizes = [28, 8, 128], strides = [1, 1, 1]} : vector<32x8x128xf32> to vector<28x8x128xf32>
    %123 = tpu.concatenate %121, %122 in 0 : vector<4x8x128xf32>, vector<28x8x128xf32> -> vector<32x8x128xf32>
    %124 = vector.broadcast %120 : vector<32x1x128xf32> to vector<32x8x128xf32>
    %125 = arith.mulf %123, %124 : vector<32x8x128xf32>
    %126 = arith.addf %125, %105 : vector<32x8x128xf32>
    %127 = vector.extract_strided_slice %110 {offsets = [0, 0, 0], sizes = [28, 8, 128], strides = [1, 1, 1]} : vector<32x8x128xf32> to vector<28x8x128xf32>
    %128 = tpu.concatenate %121, %127 in 0 : vector<4x8x128xf32>, vector<28x8x128xf32> -> vector<32x8x128xf32>
    %129 = vector.broadcast %120 : vector<32x1x128xf32> to vector<32x8x128xf32>
    %130 = arith.mulf %128, %129 : vector<32x8x128xf32>
    %131 = arith.addf %130, %110 : vector<32x8x128xf32>
    %cst_41 = arith.constant 1.000000e+00 : f32
    %132 = vector.broadcast %cst_41 : f32 to vector<32x1x128xf32>
    %133 = arith.addf %68, %132 : vector<32x1x128xf32>
    %cst_42 = arith.constant 8.000000e+00 : f32
    %134 = vector.broadcast %cst_42 : f32 to vector<32x1x128xf32>
    %135 = arith.minimumf %134, %133 : vector<32x1x128xf32>
    %cst_43 = arith.constant 0.000000e+00 : f32
    %136 = vector.broadcast %cst_43 : f32 to vector<32x1x128xf32>
    %137 = arith.subf %136, %135 : vector<32x1x128xf32>
    %138 = vector.shape_cast %57 : vector<1x128xf32> to vector<1x1x128xf32>
    %139 = vector.broadcast %138 : vector<1x1x128xf32> to vector<32x1x128xf32>
    %140 = arith.mulf %137, %139 : vector<32x1x128xf32>
    %141 = math.exp %140 : vector<32x1x128xf32>
    %cst_44 = arith.constant 0.000000e+00 : f32
    %142 = vector.broadcast %cst_44 : f32 to vector<8x8x128xf32>
    %143 = vector.extract_strided_slice %126 {offsets = [0, 0, 0], sizes = [24, 8, 128], strides = [1, 1, 1]} : vector<32x8x128xf32> to vector<24x8x128xf32>
    %144 = tpu.concatenate %142, %143 in 0 : vector<8x8x128xf32>, vector<24x8x128xf32> -> vector<32x8x128xf32>
    %145 = vector.broadcast %141 : vector<32x1x128xf32> to vector<32x8x128xf32>
    %146 = arith.mulf %144, %145 : vector<32x8x128xf32>
    %147 = arith.addf %146, %126 : vector<32x8x128xf32>
    %148 = vector.extract_strided_slice %131 {offsets = [0, 0, 0], sizes = [24, 8, 128], strides = [1, 1, 1]} : vector<32x8x128xf32> to vector<24x8x128xf32>
    %149 = tpu.concatenate %142, %148 in 0 : vector<8x8x128xf32>, vector<24x8x128xf32> -> vector<32x8x128xf32>
    %150 = vector.broadcast %141 : vector<32x1x128xf32> to vector<32x8x128xf32>
    %151 = arith.mulf %149, %150 : vector<32x8x128xf32>
    %152 = arith.addf %151, %131 : vector<32x8x128xf32>
    %cst_45 = arith.constant 1.000000e+00 : f32
    %153 = vector.broadcast %cst_45 : f32 to vector<32x1x128xf32>
    %154 = arith.addf %68, %153 : vector<32x1x128xf32>
    %cst_46 = arith.constant 1.600000e+01 : f32
    %155 = vector.broadcast %cst_46 : f32 to vector<32x1x128xf32>
    %156 = arith.minimumf %155, %154 : vector<32x1x128xf32>
    %cst_47 = arith.constant 0.000000e+00 : f32
    %157 = vector.broadcast %cst_47 : f32 to vector<32x1x128xf32>
    %158 = arith.subf %157, %156 : vector<32x1x128xf32>
    %159 = vector.shape_cast %57 : vector<1x128xf32> to vector<1x1x128xf32>
    %160 = vector.broadcast %159 : vector<1x1x128xf32> to vector<32x1x128xf32>
    %161 = arith.mulf %158, %160 : vector<32x1x128xf32>
    %162 = math.exp %161 : vector<32x1x128xf32>
    %cst_48 = arith.constant 0.000000e+00 : f32
    %163 = vector.broadcast %cst_48 : f32 to vector<16x8x128xf32>
    %164 = vector.extract_strided_slice %147 {offsets = [0, 0, 0], sizes = [16, 8, 128], strides = [1, 1, 1]} : vector<32x8x128xf32> to vector<16x8x128xf32>
    %165 = tpu.concatenate %163, %164 in 0 : vector<16x8x128xf32>, vector<16x8x128xf32> -> vector<32x8x128xf32>
    %166 = vector.broadcast %162 : vector<32x1x128xf32> to vector<32x8x128xf32>
    %167 = arith.mulf %165, %166 : vector<32x8x128xf32>
    %168 = arith.addf %167, %147 : vector<32x8x128xf32>
    %169 = vector.extract_strided_slice %152 {offsets = [0, 0, 0], sizes = [16, 8, 128], strides = [1, 1, 1]} : vector<32x8x128xf32> to vector<16x8x128xf32>
    %170 = tpu.concatenate %163, %169 in 0 : vector<16x8x128xf32>, vector<16x8x128xf32> -> vector<32x8x128xf32>
    %171 = vector.broadcast %162 : vector<32x1x128xf32> to vector<32x8x128xf32>
    %172 = arith.mulf %170, %171 : vector<32x8x128xf32>
    %173 = arith.addf %172, %152 : vector<32x8x128xf32>
    %cst_49 = arith.constant 1.000000e+00 : f32
    %174 = vector.broadcast %cst_49 : f32 to vector<32x1x128xf32>
    %175 = arith.addf %68, %174 : vector<32x1x128xf32>
    %cst_50 = arith.constant 0.000000e+00 : f32
    %176 = vector.broadcast %cst_50 : f32 to vector<32x1x128xf32>
    %177 = arith.subf %176, %175 : vector<32x1x128xf32>
    %178 = vector.shape_cast %57 : vector<1x128xf32> to vector<1x1x128xf32>
    %179 = vector.broadcast %178 : vector<1x1x128xf32> to vector<32x1x128xf32>
    %180 = arith.mulf %177, %179 : vector<32x1x128xf32>
    %181 = math.exp %180 : vector<32x1x128xf32>
    %c0_51 = arith.constant 0 : index
    %c0_52 = arith.constant 0 : index
    %182 = vector.load %arg18[%c0_51, %c0_52] : memref<8x128xf32, #tpu.memory_space<vmem>>, vector<8x128xf32>
    %c0_53 = arith.constant 0 : index
    %c0_54 = arith.constant 0 : index
    %183 = vector.load %arg17[%c0_53, %c0_54] : memref<8x128xf32, #tpu.memory_space<vmem>>, vector<8x128xf32>
    %184 = vector.shape_cast %182 : vector<8x128xf32> to vector<1x8x128xf32>
    %185 = vector.broadcast %181 : vector<32x1x128xf32> to vector<32x8x128xf32>
    %186 = vector.broadcast %184 : vector<1x8x128xf32> to vector<32x8x128xf32>
    %187 = arith.mulf %185, %186 : vector<32x8x128xf32>
    %188 = arith.addf %168, %187 : vector<32x8x128xf32>
    %189 = vector.shape_cast %183 : vector<8x128xf32> to vector<1x8x128xf32>
    %190 = vector.broadcast %181 : vector<32x1x128xf32> to vector<32x8x128xf32>
    %191 = vector.broadcast %189 : vector<1x8x128xf32> to vector<32x8x128xf32>
    %192 = arith.mulf %190, %191 : vector<32x8x128xf32>
    %193 = arith.addf %173, %192 : vector<32x8x128xf32>
    %194 = vector.shape_cast %182 : vector<8x128xf32> to vector<1x8x128xf32>
    %195 = vector.shape_cast %183 : vector<8x128xf32> to vector<1x8x128xf32>
    %196 = vector.extract_strided_slice %188 {offsets = [0, 0, 0], sizes = [31, 8, 128], strides = [1, 1, 1]} : vector<32x8x128xf32> to vector<31x8x128xf32>
    %197 = tpu.concatenate %194, %196 in 0 : vector<1x8x128xf32>, vector<31x8x128xf32> -> vector<32x8x128xf32>
    %198 = vector.extract_strided_slice %193 {offsets = [0, 0, 0], sizes = [31, 8, 128], strides = [1, 1, 1]} : vector<32x8x128xf32> to vector<31x8x128xf32>
    %199 = tpu.concatenate %195, %198 in 0 : vector<1x8x128xf32>, vector<31x8x128xf32> -> vector<32x8x128xf32>
    %200 = vector.shape_cast %59 : vector<1x128xf32> to vector<1x1x128xf32>
    %201 = vector.broadcast %200 : vector<1x1x128xf32> to vector<32x8x128xf32>
    %202 = arith.mulf %60, %201 : vector<32x8x128xf32>
    %203 = arith.addf %197, %202 : vector<32x8x128xf32>
    %204 = vector.shape_cast %59 : vector<1x128xf32> to vector<1x1x128xf32>
    %205 = vector.broadcast %204 : vector<1x1x128xf32> to vector<32x8x128xf32>
    %206 = arith.mulf %61, %205 : vector<32x8x128xf32>
    %207 = arith.addf %199, %206 : vector<32x8x128xf32>
    %208 = arith.mulf %66, %207 : vector<32x8x128xf32>
    %209 = tpu.reciprocal %203 {approx = true} : vector<32x8x128xf32> -> vector<32x8x128xf32>
    %210 = arith.mulf %208, %209 : vector<32x8x128xf32>
    %211 = vector.shape_cast %210 : vector<32x8x128xf32> to vector<256x128xf32>
    %212 = arith.truncf %211 : vector<256x128xf32> to vector<256x128xbf16>
    %c0_55 = arith.constant 0 : index
    %c0_56 = arith.constant 0 : index
    %213 = vector.load %arg14[%c0_55, %c0_56] : memref<128x128xbf16, #tpu.memory_space<vmem>>, vector<128x128xbf16>
    %cst_57 = arith.constant dense<0.000000e+00> : vector<256x128xf32>
    %214 = tpu.matmul %212, %213, %cst_57 {dimension_numbers = #tpu.dot_dimension_numbers<[1], [0], [0], [1], [0, 0, 1, 1], [], []>} : vector<256x128xbf16>, vector<128x128xbf16>, vector<256x128xf32> -> vector<256x128xf32>
    %215 = vector.shape_cast %214 : vector<256x128xf32> to vector<32x8x128xf32>
    %c0_58 = arith.constant 0 : index
    %c0_59 = arith.constant 0 : index
    %c0_60 = arith.constant 0 : index
    %216 = vector.load %arg15[%c0_58, %c0_59, %c0_60] : memref<32x8x128xf32, #tpu.memory_space<vmem>>, vector<32x8x128xf32>
    tpu.vector_store %arg15[%c0_58, %c0_59, %c0_60], %215 {strides = array<i32>} : memref<32x8x128xf32, #tpu.memory_space<vmem>>, vector<32x8x128xf32>,
    %217 = vector.extract_strided_slice %188 {offsets = [31, 0, 0], sizes = [1, 8, 128], strides = [1, 1, 1]} : vector<32x8x128xf32> to vector<1x8x128xf32>
    %218 = vector.shape_cast %217 : vector<1x8x128xf32> to vector<8x128xf32>
    %c0_61 = arith.constant 0 : index
    %c0_62 = arith.constant 0 : index
    %219 = vector.load %arg18[%c0_61, %c0_62] : memref<8x128xf32, #tpu.memory_space<vmem>>, vector<8x128xf32>
    tpu.vector_store %arg18[%c0_61, %c0_62], %218 {strides = array<i32>} : memref<8x128xf32, #tpu.memory_space<vmem>>, vector<8x128xf32>,
    %220 = vector.extract_strided_slice %193 {offsets = [31, 0, 0], sizes = [1, 8, 128], strides = [1, 1, 1]} : vector<32x8x128xf32> to vector<1x8x128xf32>
    %221 = vector.shape_cast %220 : vector<1x8x128xf32> to vector<8x128xf32>
    %c0_63 = arith.constant 0 : index
    %c0_64 = arith.constant 0 : index
    %222 = vector.load %arg17[%c0_63, %c0_64] : memref<8x128xf32, #tpu.memory_space<vmem>>, vector<8x128xf32>
    tpu.vector_store %arg17[%c0_63, %c0_64], %221 {strides = array<i32>} : memref<8x128xf32, #tpu.memory_space<vmem>>, vector<8x128xf32>,
    return
  }
  func.func @transform_0(%arg0: i32, %arg1: i32) -> (i32, i32, i32) {
    %c0_i32 = arith.constant 0 : i32
    %c0_i32_0 = arith.constant 0 : i32
    return %arg1, %arg0, %c0_i32 : i32, i32, i32
  }
  func.func @transform_1(%arg0: i32, %arg1: i32) -> (i32, i32) {
    %c0_i32 = arith.constant 0 : i32
    %c0_i32_0 = arith.constant 0 : i32
    return %arg0, %c0_i32 : i32, i32
  }
  func.func @transform_2(%arg0: i32, %arg1: i32) -> (i32, i32) {
    %c0_i32 = arith.constant 0 : i32
    %c0_i32_0 = arith.constant 0 : i32
    return %arg0, %c0_i32 : i32, i32
  }
  func.func @transform_3(%arg0: i32, %arg1: i32) -> (i32, i32) {
    %c0_i32 = arith.constant 0 : i32
    %c0_i32_0 = arith.constant 0 : i32
    return %arg0, %c0_i32 : i32, i32
  }
  func.func @transform_4(%arg0: i32, %arg1: i32) -> (i32, i32) {
    %c0_i32 = arith.constant 0 : i32
    %c0_i32_0 = arith.constant 0 : i32
    %c0_i32_1 = arith.constant 0 : i32
    return %c0_i32, %c0_i32_0 : i32, i32
  }
  func.func @transform_5(%arg0: i32, %arg1: i32) -> (i32, i32) {
    %c0_i32 = arith.constant 0 : i32
    %c0_i32_0 = arith.constant 0 : i32
    %c0_i32_1 = arith.constant 0 : i32
    return %c0_i32, %c0_i32_0 : i32, i32
  }
  func.func @transform_6(%arg0: i32, %arg1: i32) -> (i32, i32) {
    %c0_i32 = arith.constant 0 : i32
    %c0_i32_0 = arith.constant 0 : i32
    %c0_i32_1 = arith.constant 0 : i32
    return %c0_i32, %c0_i32_0 : i32, i32
  }
  func.func @transform_7(%arg0: i32, %arg1: i32) -> (i32, i32) {
    %c0_i32 = arith.constant 0 : i32
    %c0_i32_0 = arith.constant 0 : i32
    %c0_i32_1 = arith.constant 0 : i32
    return %c0_i32, %c0_i32_0 : i32, i32
  }
  func.func @transform_8(%arg0: i32, %arg1: i32) -> (i32, i32) {
    %c0_i32 = arith.constant 0 : i32
    %c0_i32_0 = arith.constant 0 : i32
    %c0_i32_1 = arith.constant 0 : i32
    return %c0_i32, %c0_i32_0 : i32, i32
  }
  func.func @transform_9(%arg0: i32, %arg1: i32) -> (i32, i32) {
    %c0_i32 = arith.constant 0 : i32
    %c0_i32_0 = arith.constant 0 : i32
    %c0_i32_1 = arith.constant 0 : i32
    return %c0_i32, %c0_i32_0 : i32, i32
  }
  func.func @transform_10(%arg0: i32, %arg1: i32) -> (i32, i32) {
    %c0_i32 = arith.constant 0 : i32
    %c0_i32_0 = arith.constant 0 : i32
    %c0_i32_1 = arith.constant 0 : i32
    return %c0_i32, %c0_i32_0 : i32, i32
  }
  func.func @transform_11(%arg0: i32, %arg1: i32) -> (i32, i32) {
    %c0_i32 = arith.constant 0 : i32
    %c0_i32_0 = arith.constant 0 : i32
    %c0_i32_1 = arith.constant 0 : i32
    return %c0_i32, %c0_i32_0 : i32, i32
  }
  func.func @transform_12(%arg0: i32, %arg1: i32) -> (i32, i32) {
    %c0_i32 = arith.constant 0 : i32
    %c0_i32_0 = arith.constant 0 : i32
    %c0_i32_1 = arith.constant 0 : i32
    return %c0_i32, %c0_i32_0 : i32, i32
  }
  func.func @transform_13(%arg0: i32, %arg1: i32) -> (i32, i32, i32) {
    %c0_i32 = arith.constant 0 : i32
    %c0_i32_0 = arith.constant 0 : i32
    return %arg1, %arg0, %c0_i32 : i32, i32, i32
  }
  func.func @transform_14(%arg0: i32, %arg1: i32) -> (i32, i32) {
    %c0_i32 = arith.constant 0 : i32
    %c0_i32_0 = arith.constant 0 : i32
    return %arg0, %c0_i32 : i32, i32
  }
  func.func @transform_15(%arg0: i32, %arg1: i32) -> (i32, i32) {
    %c0_i32 = arith.constant 0 : i32
    %c0_i32_0 = arith.constant 0 : i32
    return %arg0, %c0_i32 : i32, i32
  }
  func.func @transform_16(%arg0: i32, %arg1: i32) -> (i32, i32) {
    %c0_i32 = arith.constant 0 : i32
    %c0_i32_0 = arith.constant 0 : i32
    return %arg0, %c0_i32 : i32, i32
  }
}

</mosaic_0001>

<bundles_post_ra>
// kernel: time_mixing_pallas.1
= control target key start
LH: loop header
LB: loop body
LE: loop exit
PB: predicated region body
PF: predicated region fallthrough
CT: control target
= control target key end

     0   :  { %s11014_s0 = inlined_call_operand.hbm [shape: f32[64,16,128], index: 0, kind: input, shape index: {}]   ;;  %s11015_s1 = inlined_call_operand.vmem [shape: f32[16,128], index: 1, kind: input, shape index: {}]   ;;  %s11016_s2 = inlined_call_operand.vmem [shape: f32[16,128], index: 2, kind: input, shape index: {}]   ;;  %s11017_s3 = inlined_call_operand.hbm [shape: f32[16,128], index: 3, kind: input, shape index: {}]   ;;  %s11018_s4 = inlined_call_operand.vmem [shape: f32[1,128], index: 4, kind: input, shape index: {}]   ;;  %s11019_s5 = inlined_call_operand.vmem [shape: f32[1,128], index: 5, kind: input, shape index: {}]   ;;  %s11020_s6 = inlined_call_operand.hbm [shape: f32[1,128], index: 6, kind: input, shape index: {}]   ;;  %s11021_s7 = inlined_call_operand.hbm [shape: f32[1,128], index: 7, kind: input, shape index: {}]   ;;  %s11022_s8 = inlined_call_operand.hbm [shape: f32[1,128], index: 8, kind: input, shape index: {}]   ;;  %s11023_s9 = inlined_call_operand.hbm [shape: bf16[128,128], index: 9, kind: input, shape index: {}]   ;;  %s11024_s10 = inlined_call_operand.hbm [shape: bf16[128,128], index: 10, kind: input, shape index: {}]   ;;  %s11025_s11 = inlined_call_operand.hbm [shape: bf16[128,128], index: 11, kind: input, shape index: {}]   ;;  %s11026_s12 = inlined_call_operand.hbm [shape: bf16[128,128], index: 12, kind: input, shape index: {}]   ;;  %s11027_s13 = inlined_call_operand.hbm [shape: f32[64,16,128], index: 13, kind: output, shape index: {0}]   ;;  %s11028_s14 = inlined_call_operand.hbm [shape: f32[16,128], index: 14, kind: output, shape index: {1}]   ;;  %s11029_s15 = inlined_call_operand.hbm [shape: f32[16,128], index: 15, kind: output, shape index: {2}]   ;;  %s11030_s16 = inlined_call_operand.hbm [shape: f32[16,128], index: 16, kind: output, shape index: {3}]  }
   0x1   :  { %11163 = sst [smem:[#allocation207_spill]] %s11014_s0 }
   0x2   :  { %11164 = sst [smem:[#allocation208_spill]] %s11015_s1 }
   0x3   :  { %11165 = sst [smem:[#allocation209_spill]] %s11016_s2 }
   0x4   :  { %11166 = sst [smem:[#allocation210_spill]] %s11017_s3 }
   0x5   :  { %11167 = sst [smem:[#allocation211_spill]] %s11018_s4 }
   0x6   :  { %11168 = sst [smem:[#allocation212_spill]] %s11019_s5 }
   0x7   :  { %11169 = sst [smem:[#allocation213_spill]] %s11020_s6 }
   0x8   :  { %11170 = sst [smem:[#allocation214_spill]] %s11021_s7 }
   0x9   :  { %11171 = sst [smem:[#allocation215_spill]] %s11022_s8 }
   0xa   :  { %11172 = sst [smem:[#allocation216_spill]] %s11023_s9 }
   0xb   :  { %11173 = sst [smem:[#allocation217_spill]] %s11024_s10 }
   0xc   :  { %11174 = sst [smem:[#allocation218_spill]] %s11025_s11 }
   0xd   :  { %11175 = sst [smem:[#allocation219_spill]] %s11026_s12 }
   0xe   :  { %11176 = sst [smem:[#allocation220_spill]] %s11027_s13 }
   0xf   :  { %11177 = sst [smem:[#allocation221_spill]] %s11028_s14 }
  0x10   :  { %11178 = sst [smem:[#allocation222_spill]] %s11029_s15 }
  0x11   :  { %11179 = sst [smem:[#allocation223_spill]] %s11030_s16 }
  0x12   :  { %22 = vsyncpa [#allocation3], 0 }
  0x13   :  { %24 = vsyncpa [#allocation3 + $0x1], 0 }
  0x14   :  { %25 = vsyncpa [#allocation6], 0 }
  0x15   :  { %27 = vsyncpa [#allocation6 + $0x1], 0 }
  0x16   :  { %28 = vsyncpa [#allocation9], 0 }
  0x17   :  { %29 = vsyncpa [#allocation12], 0 }
  0x18   :  { %30 = vsyncpa [#allocation15], 0 }
  0x19   :  { %31 = vsyncpa [#allocation4], 0 }
  0x1a   :  { %33 = vsyncpa [#allocation4 + $0x1], 0 }
  0x1b   :  { %34 = vsyncpa [#allocation19], 0 }
  0x1c   :  { %36 = vsyncpa [#allocation19 + $0x1], 0 }
  0x1d   :  { %37 = vsyncpa [#allocation22], 0 }
  0x1e   :  { %39 = vsyncpa [#allocation22 + $0x1], 0  ;;  %s7457_s21 = smov 0   ;;  %s7459_s22 = smov 0  }
  0x1f   :  { %s7461_s23 = smov 0   ;;  %s7463_s24 = smov 0  }
  0x20   :  { %s7465_s25 = smov 0   ;;  %s7467_s26 = smov 0  }
  0x21   :  { %s7469_s27 = smov 0   ;;  %s7471_s28 = smov 0  }
  0x22   :  { %s7473_s29 = smov 0   ;;  %s7475_s30 = smov 0  }
  0x23   :  { %s7477_s0 = smov 0  }
  0x24 LB: > { %11180 = sst [smem:[#allocation32_spill]] %s7309_s21  ;;  %s7513_s17 = sadd.s32 4294967295, %s7349_s0   ;;  %s7349_s0 = sphi %s7477_s0, %s45_s0   ;;  %s7345_s30 = sphi %s7475_s30, %s11776_s30   ;;  %s7341_s29 = sphi %s7473_s29, %s11775_s29   ;;  %s7337_s28 = sphi %s7471_s28, %s11774_s28   ;;  %s7333_s27 = sphi %s7469_s27, %s11773_s27   ;;  %s7329_s26 = sphi %s7467_s26, %s11781_s26   ;;  %s7325_s25 = sphi %s7465_s25, %s11780_s25   ;;  %s7321_s24 = sphi %s7463_s24, %s11779_s24   ;;  %s7317_s23 = sphi %s7461_s23, %s11778_s23   ;;  %s7313_s22 = sphi %s7459_s22, %s11777_s22   ;;  %s7309_s21 = sphi %s7457_s21, %s11771_s21  }
  0x25   : > { %11181 = sst [smem:[#allocation33_spill]] %s7313_s22  ;;  %p5900_p0 = scmp.ge.s32.totalorder %s7349_s0, 1 }
  0x26   : > { %11182 = sst [smem:[#allocation34_spill]] %s7333_s27  ;;  %p11038_p1 = scmp.eq.s32.totalorder %s7513_s17, 0 }
  0x27   : > { %11183 = sst [smem:[#allocation35_spill]] %s7337_s28  ;;  %p463_p2 = scmp.lt.s32.totalorder %s7349_s0, 5 }
  0x28   : > { %11184 = sst [smem:[#allocation36_spill]] %s7341_s29  ;;  %s7351_s19 = smov [#allocation7]  }
  0x29   : > { %11185 = sst [smem:[#allocation37_spill]] %s7345_s30  ;;  %p7518_p3 = pnand %p5900_p0, %p463_p2 }
  0x2a   : > { %s482_s20 = sshll.u32 %s7351_s19, 4  ;;  %s7352_s13 = smov [#allocation8]   ;;  %s483_s20 = int_to_ptr.vmem [resolvable:$true] %s482_s20 }
  0x2b   : > { %s11186_s18 = scalar_select %p7518_p3, 1, 0 }
  0x2c   : > { %p6338_p4 = pneg %p7518_p3  ;;  %s493_s16 = sshll.u32 %s7352_s13, 4  ;;  %s7530_s16 = int_to_ptr.vmem [resolvable:$true] %s493_s16 }
  0x2d   : > { %11187 = sst [smem:[#allocation38_spill]] %s11186_s18  ;;  %s7353_s14 = smov [#allocation11]  }
  0x2e   : > { %p7526_p5 = pnand %p6338_p4, %p11038_p1  ;;  %s514_s5 = sshll.u32 %s7353_s14, 4  ;;  %s7532_s5 = int_to_ptr.vmem [resolvable:$true] %s514_s5 }
  0x2f   : > { %s11189_s6 = sld [smem:[#allocation213_spill]] }
  0x30   : > { %p7542_p7 = pneg %p7526_p5 }
  0x35   : > { %s6859_s19 = scalar_lea.hbm %s11189_s6, 16 }
  0x36   : > { %p6860_p6 = scmp.ne.s32.totalorder %s11189_s6, %s6859_s19  ;;  %p6866_p10 = scmp.lt.u32.totalorder %s6859_s19, %s11189_s6 }
  0x38   : > { %p6862_p8 = pnand %p7542_p7, %p6860_p6 }
  0x3a   : > { %p6863_p9 = pneg %p6862_p8 }
  0x3c   : > { %p6868_p11 = pnand %p6866_p10, %p6863_p9 }
  0x3e   : > { %6871 = shalt.err (!%p6868_p11)
}
  0x3f   : > { %s6872_s4 = scalar_lea.vmem %s483_s20, 16  ;;  %s6879_s1 = scalar_lea.vmem %s483_s20, 32 }
  0x40   : > { %p6873_p12 = scmp.ne.s32.totalorder %s483_s20, %s6872_s4  ;;  %p6880_p2 = scmp.lt.s32.totalorder %s483_s20, %s483_s20 }
  0x41   : > { %p6881_p4 = scmp.lt.s32.totalorder %s6879_s1, %s6872_s4 }
  0x42   : > { %p6875_p13 = pnand %p6873_p12, %p7542_p7 }
  0x43   : > { %p6882_p1 = por %p6881_p4, %p6880_p2 }
  0x44   : > { %p6876_p0 = pneg %p6875_p13 }
  0x46   : > { %p6883_p3 = pnand %p6882_p1, %p6876_p0 }
  0x48   : > { %6886 = shalt.err (!%p6883_p3)
}
  0x49   : > { %6341 = dma.hbm_to_vmem [thread:$0]  (!%p7526_p5), %s11189_s6, 16, %s483_s20, [#allocation6]  }
  0x4a   : > { %s11191_s7 = sld [smem:[#allocation214_spill]] }
  0x50   : > { %s6887_s14 = scalar_lea.hbm %s11191_s7, 16 }
  0x51   : > { %p6888_p6 = scmp.ne.s32.totalorder %s11191_s7, %s6887_s14  ;;  %p6894_p1 = scmp.lt.u32.totalorder %s6887_s14, %s11191_s7 }
  0x53   : > { %p6890_p8 = pnand %p6888_p6, %p7542_p7 }
  0x55   : > { %p6891_p9 = pneg %p6890_p8 }
  0x57   : > { %p6896_p3 = pnand %p6894_p1, %p6891_p9 }
  0x59   : > { %6899 = shalt.err (!%p6896_p3)
}
  0x5a   : > { %s6900_s20 = scalar_lea.vmem %s7530_s16, 16  ;;  %s6907_s3 = scalar_lea.vmem %s7530_s16, 32 }
  0x5b   : > { %p6901_p10 = scmp.ne.s32.totalorder %s7530_s16, %s6900_s20  ;;  %p6908_p13 = scmp.lt.s32.totalorder %s7530_s16, %s7530_s16 }
  0x5c   : > { %p6909_p0 = scmp.lt.s32.totalorder %s6907_s3, %s6900_s20 }
  0x5d   : > { %p6903_p11 = pnand %p6901_p10, %p7542_p7 }
  0x5e   : > { %p6910_p2 = por %p6909_p0, %p6908_p13 }
  0x5f   : > { %p6904_p12 = pneg %p6903_p11 }
  0x61   : > { %p6911_p4 = pnand %p6910_p2, %p6904_p12 }
  0x63   : > { %6914 = shalt.err (!%p6911_p4)
}
  0x64   : > { %6344 = dma.hbm_to_vmem [thread:$0]  (!%p7526_p5), %s11191_s7, 16, %s7530_s16, [#allocation9]  }
  0x65   : > { %s11192_s9 = sld [smem:[#allocation216_spill]] }
  0x6b   : > { %s6915_s19 = scalar_lea.hbm %s11192_s9, 1024 }
  0x6c   : > { %p6916_p6 = scmp.ne.s32.totalorder %s11192_s9, %s6915_s19  ;;  %p6922_p1 = scmp.lt.u32.totalorder %s6915_s19, %s11192_s9 }
  0x6e   : > { %p6918_p8 = pnand %p6916_p6, %p7542_p7 }
  0x70   : > { %p6919_p9 = pneg %p6918_p8 }
  0x72   : > { %p6924_p3 = pnand %p6922_p1, %p6919_p9 }
  0x74   : > { %6927 = shalt.err (!%p6924_p3)
}
  0x75   : > { %s6928_s16 = scalar_lea.vmem %s7532_s5, 1024  ;;  %p6936_p13 = scmp.lt.s32.totalorder %s7532_s5, %s7532_s5 }
  0x76   : > { %p6929_p10 = scmp.ne.s32.totalorder %s7532_s5, %s6928_s16  ;;  %p6937_p0 = scmp.lt.s32.totalorder %s6928_s16, %s6928_s16 }
  0x78   : > { %p6931_p11 = pnand %p6929_p10, %p7542_p7  ;;  %p6938_p2 = por %p6937_p0, %p6936_p13 }
  0x7a   : > { %p6932_p12 = pneg %p6931_p11 }
  0x7c   : > { %p6939_p4 = pnand %p6938_p2, %p6932_p12 }
  0x7e   : > { %6942 = shalt.err (!%p6939_p4)
}
  0x7f   : > { %s7354_s3 = smov 64   ;;  %s7355_s18 = smov 4  }
  0x80   : > { %6350 = dma.hbm_to_vmem [thread:$0]  (!%p7526_p5), %s11192_s9, 1024, %s7532_s5, [#allocation12], %s7354_s3, %s7354_s3, %s7355_s18  }
  0x81   : > { %s7356_s28 = smov [#allocation14]   ;;  %s7357_s14 = smov [#allocation10]  }
  0x82   : > { %s540_s19 = sshll.u32 %s7356_s28, 4  ;;  %s504_s4 = sshll.u32 %s7357_s14, 4  ;;  %s541_s19 = int_to_ptr.vmem [resolvable:$true] %s540_s19  ;;  %s505_s4 = int_to_ptr.vmem [resolvable:$true] %s504_s4 }
  0x83   : > { %s11193_s11 = sld [smem:[#allocation218_spill]] }
  0x89   : > { %s6943_s16 = scalar_lea.hbm %s11193_s11, 1024 }
  0x8a   : > { %p6944_p6 = scmp.ne.s32.totalorder %s11193_s11, %s6943_s16  ;;  %p6950_p1 = scmp.lt.u32.totalorder %s6943_s16, %s11193_s11 }
  0x8c   : > { %p6946_p8 = pnand %p6944_p6, %p7542_p7 }
  0x8e   : > { %p6947_p9 = pneg %p6946_p8 }
  0x90   : > { %p6952_p3 = pnand %p6950_p1, %p6947_p9 }
  0x92   : > { %6955 = shalt.err (!%p6952_p3)
}
  0x93   : > { %s6956_s5 = scalar_lea.vmem %s541_s19, 1024  ;;  %p6964_p13 = scmp.lt.s32.totalorder %s541_s19, %s541_s19 }
  0x94   : > { %p6957_p10 = scmp.ne.s32.totalorder %s541_s19, %s6956_s5  ;;  %p6965_p0 = scmp.lt.s32.totalorder %s6956_s5, %s6956_s5 }
  0x96   : > { %p6959_p11 = pnand %p6957_p10, %p7542_p7  ;;  %p6966_p2 = por %p6965_p0, %p6964_p13 }
  0x98   : > { %p6960_p12 = pneg %p6959_p11 }
  0x9a   : > { %p6967_p4 = pnand %p6966_p2, %p6960_p12 }
  0x9c   : > { %6970 = shalt.err (!%p6967_p4)
}
  0x9d   : > { %6356 = dma.hbm_to_vmem [thread:$0]  (!%p7526_p5), %s11193_s11, 1024, %s541_s19, [#allocation15], %s7354_s3, %s7354_s3, %s7355_s18  }
  0x9e   : > { %s11194_s8 = sld [smem:[#allocation215_spill]] }
  0xa4   : > { %s6971_s2 = scalar_lea.hbm %s11194_s8, 16 }
  0xa5   : > { %p6972_p6 = scmp.ne.s32.totalorder %s11194_s8, %s6971_s2  ;;  %p6978_p1 = scmp.lt.u32.totalorder %s6971_s2, %s11194_s8 }
  0xa7   : > { %p6974_p8 = pnand %p6972_p6, %p7542_p7 }
  0xa9   : > { %p6975_p9 = pneg %p6974_p8 }
  0xab   : > { %p6980_p3 = pnand %p6978_p1, %p6975_p9 }
  0xad   : > { %6983 = shalt.err (!%p6980_p3)
}
  0xae   : > { %s6984_s20 = scalar_lea.vmem %s505_s4, 16  ;;  %s6991_s19 = scalar_lea.vmem %s505_s4, 32 }
  0xaf   : > { %p6985_p10 = scmp.ne.s32.totalorder %s505_s4, %s6984_s20  ;;  %p6992_p13 = scmp.lt.s32.totalorder %s505_s4, %s505_s4 }
  0xb0   : > { %p6993_p0 = scmp.lt.s32.totalorder %s6991_s19, %s6984_s20 }
  0xb1   : > { %p6987_p11 = pnand %p6985_p10, %p7542_p7 }
  0xb2   : > { %p6994_p2 = por %p6993_p0, %p6992_p13 }
  0xb3   : > { %p6988_p12 = pneg %p6987_p11 }
  0xb5   : > { %p6995_p4 = pnand %p6994_p2, %p6988_p12 }
  0xb7   : > { %6998 = shalt.err (!%p6995_p4)
}
  0xb8   : > { %6347 = dma.hbm_to_vmem [thread:$0]  (!%p7526_p5), %s11194_s8, 16, %s505_s4, [#allocation9]  }
  0xb9   : > { %s7358_s6 = smov [#allocation13]   ;;  %s7359_s21 = smov [#allocation16]  }
  0xba   : > { %s527_s7 = sshll.u32 %s7358_s6, 4  ;;  %s553_s22 = sshll.u32 %s7359_s21, 4  ;;  %s528_s7 = int_to_ptr.vmem [resolvable:$true] %s527_s7  ;;  %s554_s22 = int_to_ptr.vmem [resolvable:$true] %s553_s22 }
  0xbb   : > { %s11195_s10 = sld [smem:[#allocation217_spill]] }
  0xc1   : > { %s6999_s28 = scalar_lea.hbm %s11195_s10, 1024 }
  0xc2   : > { %p7000_p6 = scmp.ne.s32.totalorder %s11195_s10, %s6999_s28  ;;  %p7006_p1 = scmp.lt.u32.totalorder %s6999_s28, %s11195_s10 }
  0xc4   : > { %p7002_p8 = pnand %p7000_p6, %p7542_p7 }
  0xc6   : > { %p7003_p9 = pneg %p7002_p8 }
  0xc8   : > { %p7008_p3 = pnand %p7006_p1, %p7003_p9 }
  0xca   : > { %7011 = shalt.err (!%p7008_p3)
}
  0xcb   : > { %s7012_s4 = scalar_lea.vmem %s528_s7, 1024  ;;  %p7020_p13 = scmp.lt.s32.totalorder %s528_s7, %s528_s7 }
  0xcc   : > { %p7013_p10 = scmp.ne.s32.totalorder %s528_s7, %s7012_s4  ;;  %p7021_p0 = scmp.lt.s32.totalorder %s7012_s4, %s7012_s4 }
  0xce   : > { %p7015_p11 = pnand %p7013_p10, %p7542_p7  ;;  %p7022_p2 = por %p7021_p0, %p7020_p13 }
  0xd0   : > { %p7016_p12 = pneg %p7015_p11 }
  0xd2   : > { %p7023_p4 = pnand %p7022_p2, %p7016_p12 }
  0xd4   : > { %7026 = shalt.err (!%p7023_p4)
}
  0xd5   : > { %6353 = dma.hbm_to_vmem [thread:$0]  (!%p7526_p5), %s11195_s10, 1024, %s528_s7, [#allocation12], %s7354_s3, %s7354_s3, %s7355_s18  }
  0xd6   : > { %s11196_s12 = sld [smem:[#allocation219_spill]] }
  0xdc   : > { %s7027_s2 = scalar_lea.hbm %s11196_s12, 1024 }
  0xdd   : > { %p7028_p6 = scmp.ne.s32.totalorder %s11196_s12, %s7027_s2  ;;  %p7034_p1 = scmp.lt.u32.totalorder %s7027_s2, %s11196_s12 }
  0xdf   : > { %p7030_p8 = pnand %p7028_p6, %p7542_p7 }
  0xe1   : > { %p7031_p9 = pneg %p7030_p8 }
  0xe3   : > { %p7036_p3 = pnand %p7034_p1, %p7031_p9 }
  0xe5   : > { %7039 = shalt.err (!%p7036_p3)
}
  0xe6   : > { %s7040_s20 = scalar_lea.vmem %s554_s22, 1024  ;;  %p7048_p13 = scmp.lt.s32.totalorder %s554_s22, %s554_s22 }
  0xe7   : > { %p7041_p10 = scmp.ne.s32.totalorder %s554_s22, %s7040_s20  ;;  %p7049_p0 = scmp.lt.s32.totalorder %s7040_s20, %s7040_s20 }
  0xe9   : > { %p7043_p11 = pnand %p7041_p10, %p7542_p7  ;;  %p7050_p2 = por %p7049_p0, %p7048_p13 }
  0xeb   : > { %p7044_p12 = pneg %p7043_p11 }
  0xed   : > { %p7051_p4 = pnand %p7050_p2, %p7044_p12 }
  0xef   : > { %7054 = shalt.err (!%p7051_p4)
}
  0xf0   : > { %6359 = dma.hbm_to_vmem [thread:$0]  (!%p7526_p5), %s11196_s12, 1024, %s554_s22, [#allocation15], %s7354_s3, %s7354_s3, %s7355_s18  }
  0xf1   : > { %s54_s15 = sadd.s32 1, %s7341_s29  ;;  %s57_s13 = sadd.s32 1, %s7345_s30 }
  0xf2   : > { %p55_p7 = scmp.ge.s32.totalorder %s54_s15, 2  ;;  %s66_s4 = sadd.s32 1, %s7329_s26 }
  0xf3   : > { %p11046_p6 = scmp.ne.s32.totalorder %s7329_s26, %s7325_s25  ;;  %p11047_p8 = scmp.eq.s32.totalorder %s7349_s0, 0 }
  0xf4   : > { %s11783_s15 = smov (%p55_p7, %s54_s15), 0  ;;  %s11785_s13 = smov (!%p55_p7, %s57_s13), %s7345_s30 }
  0xf5   : > { %11197 = sst [smem:[#allocation39_spill]] %s11783_s15  ;;  %s61_s16 = ssub.s32 %s7341_s29, %s11783_s15 }
  0xf6   : > { %p59_p9 = scmp.ge.s32.totalorder %s11785_s13, 2  ;;  %p11045_p1 = scmp.ne.s32.totalorder %s7325_s25, %s7321_s24 }
  0xf7   : > { %p7707_p5 = por %p11047_p8, %p11046_p6  ;;  %p11044_p3 = scmp.lt.s32.totalorder %s7349_s0, 4 }
  0xf8   : > { %s11787_s13 = smov (%p59_p9, %s11785_s13), 0  ;;  %p11200_p10 = scmp.eq.s32.totalorder %s7513_s17, 0 }
  0xf9   : > { %11199 = sst [smem:[#allocation40_spill]] %s11787_s13  ;;  %s567_s22 = sand.u32 1, %s7329_s26  }
  0xfa   : > { %p7719_p11 = por %p11200_p10, %p11045_p1  ;;  %s7726_s5 = ssub.s32 %s7345_s30, %s11787_s13 }
  0xfb   : > { %s63_s6 = sor.u32 %s7726_s5, %s61_s16  ;;  %s5909_s21 = sshll.u32 %s567_s22, 8 }
  0xfc   : > { %p64_p12 = scmp.eq.s32.totalorder %s63_s6, 0  ;;  %s6008_s2 = sshll.u32 %s7341_s29, 6 }
  0xfd   : > { %s571_s27 = scalar_lea.vmem [#allocation2], %s5909_s21  ;;  %s577_s1 = sadd.s32 %s7345_s30, %s6008_s2 }
  0xfe   : > { %s580_s28 = sshll.u32 %s571_s27, 4  ;;  %s5912_s20 = sshll.u32 %s577_s1, 7  ;;  %s7734_s28 = int_to_ptr.vmem [resolvable:$true] %s580_s28 }
  0xff   : > { %s7731_s14 = scalar_select %p64_p12, %s7329_s26, %s66_s4  }
 0x100   : > { %p7740_p13 = pnand %p11044_p3, %p7707_p5  ;;  %s11204_s16 = sld [smem:[#allocation207_spill]] }
 0x101   : > { %11202 = sst [smem:[#allocation41_spill]] %s7731_s14  ;;  %s7749_s4 = scalar_lea.sflag [#allocation3], %s567_s22 }
 0x102   : > { %p7057_p2 = pneg %p7740_p13 }
 0x106   : > { %s7747_s6 = scalar_lea.hbm %s11204_s16, %s5912_s20  ;;  %s7060_s2 = scalar_lea.hbm %s11204_s16, 16384 }
 0x107   : > { %s7055_s21 = scalar_lea.hbm %s7747_s6, 4096  ;;  %p7061_p9 = scmp.lt.u32.totalorder %s7747_s6, %s11204_s16 }
 0x108   : > { %p7056_p0 = scmp.ne.s32.totalorder %s7747_s6, %s7055_s21  ;;  %p7062_p5 = scmp.lt.u32.totalorder %s7060_s2, %s7055_s21 }
 0x109   : > { %p7064_p12 = scmp.lt.u32.totalorder %s7055_s21, %s7747_s6 }
 0x10a   : > { %p7058_p4 = pnand %p7057_p2, %p7056_p0  ;;  %p7063_p10 = por %p7062_p5, %p7061_p9 }
 0x10c   : > { %p7059_p7 = pneg %p7058_p4  ;;  %p7065_p3 = por %p7064_p12, %p7063_p10 }
 0x10e   : > { %p7066_p1 = pnand %p7065_p3, %p7059_p7 }
 0x110   : > { %7069 = shalt.err (!%p7066_p1)
}
 0x111   : > { %s7070_s22 = scalar_lea.vmem %s7734_s28, 4096  ;;  %s7360_s20 = smov [#allocation2]  }
 0x112   : > { %p7071_p0 = scmp.ne.s32.totalorder %s7734_s28, %s7070_s22  ;;  %s7075_s19 = sshll.u32 %s7360_s20, 4  ;;  %s7076_s19 = int_to_ptr.vmem [resolvable:$false] %s7075_s19 }
 0x113   : > { %s7077_s3 = scalar_lea.vmem %s7076_s19, 8192  ;;  %p7078_p8 = scmp.lt.s32.totalorder %s7734_s28, %s7076_s19 }
 0x114   : > { %p7073_p4 = pnand %p7071_p0, %p7057_p2  ;;  %p7079_p9 = scmp.lt.s32.totalorder %s7077_s3, %s7070_s22 }
 0x116   : > { %p7074_p6 = pneg %p7073_p4  ;;  %p7080_p5 = por %p7079_p9, %p7078_p8 }
 0x118   : > { %p7081_p10 = pnand %p7080_p5, %p7074_p6 }
 0x11a   : > { %7084 = shalt.err (!%p7081_p10)
}
 0x11b   : > { %s7361_s21 = smov 256   ;;  %s11205_s8 = sld [smem:[#allocation33_spill]] }
 0x11c   : > { %s11206_s2 = sld [smem:[#allocation32_spill]]  ;;  %s7362_s27 = smov 128  }
 0x11d   : > { %s7363_s1 = smov 8   ;;  %s11048_s22 = sadd.s32 4294967294, %s7349_s0  }
 0x11e   : > { %6363 = dma.hbm_to_vmem [thread:$0]  (!%p7740_p13), %s7747_s6, 4096, %s7734_s28, %s7749_s4, %s7361_s21, %s7362_s27, %s7363_s1  }
 0x11f   : > { %p142_p6 = scmp.eq.s32.totalorder %s7726_s5, 0  ;;  %s144_s20 = sadd.s32 1, %s7317_s23 }
 0x120   : > { %p11207_p3 = scmp.eq.s32.totalorder %s7349_s0, 0  ;;  %p11209_p7 = scmp.eq.s32.totalorder %s7513_s17, 0 }
 0x121   : > { %p151_p8 = scmp.ne.s32.totalorder %s7317_s23, %s11205_s8  ;;  %p372_p13 = scmp.eq.s32.totalorder %s7513_s17, 3 }
 0x122   : > { %p157_p1 = scmp.ne.s32.totalorder %s11205_s8, %s11206_s2  ;;  %p378_p0 = scmp.eq.s32.totalorder %s11048_s22, 3 }
 0x123   : > { %s7785_s19 = scalar_select %p142_p6, %s7317_s23, %s144_s20  }
 0x124   : > { %p7789_p2 = por %p151_p8, %p11207_p3  ;;  %p7795_p12 = por %p157_p1, %p11209_p7 }
 0x125   : > { %s604_s5 = sand.u32 1, %s7349_s0   ;;  %s606_s28 = sand.u32 1, %s7317_s23  }
 0x126   : > { %s11210_s9 = scalar_select %p7795_p12, 1, 0 }
 0x127   : > { %p11211_p4 = scmp.ne.s32.totalorder %s7329_s26, %s7325_s25  ;;  %p11213_p5 = scmp.ne.s32.totalorder %s7325_s25, %s7321_s24 }
 0x128   : > { %p7818_p6 = por %p372_p13, %p151_p8  ;;  %p7822_p3 = por %p378_p0, %p157_p1 }
 0x129   : > { %p7807_p9 = por %p372_p13, %p11211_p4  ;;  %p7814_p10 = por %p378_p0, %p11213_p5 }
 0x12a   : > { %s11215_s4 = scalar_select %p7818_p6, 1, 0 }
 0x12b   : > { %s11212_s7 = scalar_select %p7807_p9, 1, 0 }
 0x12c   : > { %s11214_s6 = scalar_select %p7814_p10, 1, 0 }
 0x12d   : > { %s11216_s21 = scalar_select %p7822_p3, 1, 0 }
 0x12e   : > { %s5913_s8 = sshll.u32 %s606_s28, 3  ;;  %s5914_s2 = sshll.u32 %s7345_s30, 7 }
 0x12f   : > { %s11217_s20 = sld [smem:[#allocation210_spill]]  ;;  %s608_s10 = scalar_lea.vmem [#allocation5], %s5913_s8 }
 0x130   : > { %s615_s11 = sshll.u32 %s608_s10, 4  ;;  %p11218_p8 = scmp.lt.s32.totalorder %s7349_s0, 4  ;;  %s7832_s11 = int_to_ptr.vmem [resolvable:$true] %s615_s11 }
 0x131   : > { %s605_s28 = scalar_lea.sflag [#allocation6], %s604_s5 }
 0x132   : > { %p7838_p1 = pnand %p11218_p8, %p7789_p2 }
 0x134   : > { %p7087_p13 = pneg %p7838_p1 }
 0x135   : > { %s7830_s22 = scalar_lea.hbm %s11217_s20, %s5914_s2  ;;  %s7090_s3 = scalar_lea.hbm %s11217_s20, 256 }
 0x136   : > { %s7085_s27 = scalar_lea.hbm %s7830_s22, 128  ;;  %p7091_p2 = scmp.lt.u32.totalorder %s7830_s22, %s11217_s20 }
 0x137   : > { %p7086_p7 = scmp.ne.s32.totalorder %s7830_s22, %s7085_s27  ;;  %p7092_p5 = scmp.lt.u32.totalorder %s7090_s3, %s7085_s27 }
 0x138   : > { %p7094_p3 = scmp.lt.u32.totalorder %s7085_s27, %s7830_s22 }
 0x139   : > { %p7088_p0 = pnand %p7087_p13, %p7086_p7  ;;  %p7093_p8 = por %p7092_p5, %p7091_p2 }
 0x13b   : > { %p7089_p4 = pneg %p7088_p0  ;;  %p7095_p10 = por %p7094_p3, %p7093_p8 }
 0x13d   : > { %p7096_p9 = pnand %p7095_p10, %p7089_p4 }
 0x13f   : > { %7099 = shalt.err (!%p7096_p9)
}
 0x140   : > { %s7100_s5 = scalar_lea.vmem %s7832_s11, 128  ;;  %s7364_s10 = smov [#allocation5]  }
 0x141   : > { %p7101_p7 = scmp.ne.s32.totalorder %s7832_s11, %s7100_s5  ;;  %s7105_s8 = sshll.u32 %s7364_s10, 4  ;;  %s7106_s8 = int_to_ptr.vmem [resolvable:$false] %s7105_s8 }
 0x142   : > { %s7107_s2 = scalar_lea.vmem %s7106_s8, 256  ;;  %p7108_p12 = scmp.lt.s32.totalorder %s7832_s11, %s7106_s8 }
 0x143   : > { %p7103_p0 = pnand %p7101_p7, %p7087_p13  ;;  %p7109_p2 = scmp.lt.s32.totalorder %s7107_s2, %s7100_s5 }
 0x145   : > { %p7104_p6 = pneg %p7103_p0  ;;  %p7110_p5 = por %p7109_p2, %p7108_p12 }
 0x147   : > { %p7111_p3 = pnand %p7110_p5, %p7104_p6 }
 0x149   : > { %7114 = shalt.err (!%p7111_p3)
}
 0x14a   : > { %6366 = dma.hbm_to_vmem [thread:$0]  (!%p7838_p1), %s7830_s22, 128, %s7832_s11, %s605_s28  }
 0x14b   : > { %s11220_s27 = sld [smem:[#allocation38_spill]] }
 0x151   : > { %p11221_p9 = scmp.ne.s32.totalorder %s11220_s27, 0 }
 0x153   : > { %624 = sbr.rel (%p11221_p9) target bundleno = 1206 (0x4b6), region = 72 }
 0x15a   : > { %s7870_s3 = sand.u32 1, %s7325_s25  }
 0x15b   : > { %s5916_s1 = sshll.u32 %s7870_s3, 8  ;;  %s627_s10 = scalar_lea.sflag [#allocation3], %s7870_s3 }
 0x15c   : > { %s7874_s5 = scalar_lea.vmem [#allocation2], %s5916_s1 }
 0x15d   : > { %7272 = dma.done.wait (%p7719_p11), %s627_s10, 4096  }
 0x15e   : > { %7274 = vsyncadd (%p7719_p11), %s627_s10, 4294963200  ;;  %s11222_s11 = sld [smem:[#allocation33_spill]]  ;;  %s11053_s12 = sand.u32 1, %s7513_s17  }
 0x15f   : > { %s636_s8 = scalar_lea.sflag [#allocation6], %s11053_s12  ;;  %p11223_p12 = scmp.ne.s32.totalorder %s11210_s9, 0 }
 0x164   : > { %s11052_s22 = sand.u32 1, %s11222_s11  }
 0x165   : > { %s5917_s28 = sshll.u32 %s11052_s22, 3 }
 0x166   : > { %s639_s2 = scalar_lea.vmem [#allocation5], %s5917_s28 }
 0x167   : > { %7276 = dma.done.wait (%p11223_p12), %s636_s8, 128  }
 0x168   : > { %7278 = vsyncadd (%p11223_p12), %s636_s8, 4294967168  ;;  %p11224_p10 = scmp.eq.s32.totalorder %s7513_s17, 0 }
 0x16a   : > { %7280 = dma.done.wait (%p11224_p10), [#allocation6], 16   ;;  %p11225_p11 = pmov %p11224_p10 }
 0x16b   : > { %p11226_p6 = pmov %p11224_p10 }
 0x16c   : > { %7282 = vsyncadd (%p11225_p11), [#allocation6], 4294967280 }
 0x16d   : > { %7284 = dma.done.wait (%p11226_p6), [#allocation9], 32   ;;  %p11227_p1 = pmov %p11226_p6 }
 0x16f   : > { %7286 = vsyncadd (%p11227_p1), [#allocation9], 4294967264  ;;  %p11228_p13 = pmov %p11227_p1 }
 0x170   : > { %p11229_p4 = pmov %p11227_p1 }
 0x171   : > { %7288 = dma.done.wait (%p11228_p13), [#allocation12], 2048  }
 0x172   : > { %7290 = vsyncadd (%p11229_p4), [#allocation12], 4294965248  ;;  %p11230_p8 = pmov %p11227_p1 }
 0x173   : > { %p11231_p7 = pmov %p11227_p1 }
 0x174   : > { %7292 = dma.done.wait (%p11230_p8), [#allocation15], 2048  }
 0x175   : > { %7294 = vsyncadd (%p11231_p7), [#allocation15], 4294965248  ;;  %s11232_s9 = sld [smem:[#allocation35_spill]]  ;;  %s11234_s16 = sld [smem:[#allocation209_spill]] }
 0x176   : > { %s11233_s11 = sld [smem:[#allocation208_spill]]  ;;  %s7914_s13 = scalar_lea.vmem [#allocation17], %s5916_s1 }
 0x177   : > { %s7916_s15 = scalar_lea.vmem [#allocation18], %s5917_s28  ;;  %s7918_s30 = scalar_lea.vmem [#allocation20], %s5917_s28 }
 0x178   : > { %s7920_s29 = scalar_lea.vmem [#allocation21], %s5917_s28  ;;  %s11235_s14 = sld [smem:[#allocation34_spill]] }
 0x17b   : > { %p745_p0 = scmp.lt.s32.totalorder %s11232_s9, 1 }
 0x17d   : > { %s11789_s9 = smov (!%p745_p0, %s11232_s9), 1 }
 0x17e   : > { %s5929_s18 = sshll.u32 %s11789_s9, 3  ;;  %p5931_p2 = scmp.ne.s32.totalorder %s11235_s14, 0 }
 0x17f   : > { %s748_s8 = scalar_lea.vmem %s11233_s11, %s5929_s18  ;;  %s752_s20 = scalar_lea.vmem %s11234_s16, %s5929_s18  ;;  %v763_v2 = vld [vmem:[%s639_s2] sm:$0xff] (!%p5931_p2) }
 0x180   : > { %758 = sbr.rel (%p5931_p2) target bundleno = 391 (0x187), region = 112  ;;  %v759_v0 = vld [vmem:[%s748_s8] sm:$0xff] (!%p5931_p2)  ;;  %764 = vst [vmem:[%s7920_s29] sm:$0xff] (!%p5931_p2), %v763_v2 }
 0x181   : > { %v761_v1 = vld [vmem:[%s752_s20] sm:$0xff] (!%p5931_p2)  ;;  %760 = vst [vmem:[%s7916_s15] sm:$0xff] (!%p5931_p2), %v759_v0 }
 0x182   : > { %762 = vst [vmem:[%s7918_s30] sm:$0xff] (!%p5931_p2), %v761_v1 }
 0x187 PF: > { %v6499_v3 = vld [vmem:[#allocation11] sm:$0xff]   ;;  %v6500_v4 = vld [vmem:[#allocation11 + $0x8] sm:$0xff]   ;;  %v6501_v5 = vld [vmem:[#allocation11 + $0x10] sm:$0xff]   ;;  %v801_v6 = vlaneseq  ;;  %s11237_s20 = sld [smem:[#allocation211_spill]]  ;;  %s11238_s22 = sld [smem:[#allocation212_spill]] }
 0x188   : > { %6106 = vmatprep.subr.bf16.mxu0 %v6499_v3  ;;  %v6503_v7 = vld [vmem:[#allocation13] sm:$0xff]   ;;  %v6505_v8 = vld [vmem:[#allocation13 + $0x8] sm:$0xff]   ;;  %v6502_v9 = vld [vmem:[#allocation11 + $0x18] sm:$0xff]   ;;  %s11756_s18 = sld [smem:[#allocation221_spill]]  ;;  %s5581_s10 = sshll.u32 %s7916_s15, 4  ;;  %s5582_s10 = int_to_ptr.vmem [resolvable:$true] %s5581_s10 }
 0x189   : > { %6107 = vmatpush3.bf16.msra.mxu0 %v6499_v3  ;;  %6154 = vmatprep.subr.bf16.mxu1 %v6503_v7  ;;  %v802_v10 = vshrl.u32 %v801_v6, 7  ;;  %v6507_v11 = vld [vmem:[#allocation13 + $0x10] sm:$0xff]   ;;  %v6504_v12 = vld [vmem:[#allocation11 + $0x20] sm:$0xff]   ;;  %v6509_v14 = vld [vmem:[#allocation13 + $0x18] sm:$0xff]   ;;  %s11757_s11 = sand.u32 1, %s7513_s17   ;;  %s7115_s14 = scalar_lea.vmem %s5582_s10, 128 }
 0x18a   : > { %6108 = vmatprep.subr.bf16.mxu0 %v6500_v4  ;;  %6155 = vmatpush3.bf16.msra.mxu1 %v6503_v7  ;;  %v7929_v15 = vld [vmem:[%s7874_s5] sm:$0xff]  ;;  %v6511_v17 = vld [vmem:[#allocation13 + $0x20] sm:$0xff]   ;;  %v7932_v18 = vld [vmem:[%s7874_s5 + $0x8] sm:$0xff]  ;;  %s10835_s8 = scalar_lea.sflag [#allocation19], %s11757_s11  ;;  %p7116_p5 = scmp.ne.s32.totalorder %s5582_s10, %s7115_s14 }
 0x18b   : > { %6156 = vmatprep.subr.bf16.mxu1 %v6505_v8  ;;  %v7926_v13 = vsub.s32 0, %v802_v10  ;;  %v6506_v16 = vld [vmem:[#allocation11 + $0x28] sm:$0xff]   ;;  %v7938_v20 = vld [vmem:[%s7874_s5 + $0x10] sm:$0xff]  ;;  %v6508_v29 = vld [vmem:[#allocation11 + $0x30] sm:$0xff]   ;;  %p11758_p3 = scmp.ne.s32.totalorder %s11215_s4, 0  ;;  %s7365_s16 = smov [#allocation18]  }
 0x18c   : > { %v7944_v23 = vld [vmem:[%s7874_s5 + $0x18] sm:$0xff]  ;;  %v7961_v31 = vld [vmem:[%s7874_s5 + $0x20] sm:$0xff]  ;;  %v7964_v32 = vld [vmem:[%s7874_s5 + $0x28] sm:$0xff] }
 0x18d   : > { %6109 = vmatpush3.bf16.msra.mxu0 %v6500_v4  ;;  %11236 = vst [vmem:[#allocation42_spill] sm:$0xff] %v7926_v13  ;;  %v799_v19 = vld [vmem:[%s11237_s20] sm:$0x1]  ;;  %v7967_v33 = vld [vmem:[%s7874_s5 + $0x30] sm:$0xff]  ;;  %v7976_v37 = vld [vmem:[%s7874_s5 + $0x38] sm:$0xff]  ;;  %p7117_p9 = pnand %p7116_p5, %p11758_p3  ;;  %s7119_s20 = sshll.u32 %s7365_s16, 4  ;;  %s7120_s20 = int_to_ptr.vmem [resolvable:$false] %s7119_s20 }
 0x18e   : > { %6110 = vmatprep.subr.bf16.mxu0 %v6501_v5  ;;  %6157 = vmatpush3.bf16.msra.mxu1 %v6505_v8  ;;  %v7941_v21 = vrot.slane %v799_v19, %v7926_v13  ;;  %v838_v22 = vsub.f32 1.0, %v799_v19  ;;  %v7947_v24 = vld [vmem:[%s7916_s15] sm:$0xff]  ;;  %v8007_v56 = vld [vmem:[%s7874_s5 + $0x48] sm:$0xff]  ;;  %s7121_s1 = scalar_lea.vmem %s7120_s20, 256  ;;  %p7122_p10 = scmp.lt.s32.totalorder %s5582_s10, %s7120_s20 }
 0x18f   : > { %6158 = vmatprep.subr.bf16.mxu1 %v6507_v11  ;;  %v6513_v39 = vld [vmem:[#allocation13 + $0x28] sm:$0xff]   ;;  %v6510_v57 = vld [vmem:[#allocation11 + $0x38] sm:$0xff]   ;;  %v6514_v59 = vld [vmem:[#allocation13 + $0x30] sm:$0xff]   ;;  %p7118_p12 = pneg %p7117_p9  ;;  %p7123_p11 = scmp.lt.s32.totalorder %s7121_s1, %s7115_s14 }
 0x190   : > { %v806_v25 = vmul.f32 %v7941_v21, %v7929_v15  ;;  %v807_v26 = vmul.f32 %v7941_v21, %v7932_v18  ;;  %v7954_v27 = vrot.slane %v838_v22, %v7926_v13  ;;  %v808_v28 = vmul.f32 %v7941_v21, %v7938_v20  ;;  %v1150_v46 = vld [vmem:[%s11238_s22] sm:$0x1]  ;;  %v6512_v6 = vld [vmem:[#allocation14] sm:$0xff]  }
 0x191   : > { %6111 = vmatpush3.bf16.msra.mxu0 %v6501_v5  ;;  %v809_v30 = vmul.f32 %v7941_v21, %v7944_v23  ;;  %v810_v40 = vmul.f32 %v7941_v21, %v7961_v31  ;;  %v811_v41 = vmul.f32 %v7941_v21, %v7964_v32  ;;  %v812_v49 = vmul.f32 %v7941_v21, %v7967_v33  ;;  %v8000_v51 = vld [vmem:[%s7874_s5 + $0x40] sm:$0xff]  ;;  %v8037_v10 = vld [vmem:[%s7874_s5 + $0x50] sm:$0xff]  ;;  %p7124_p6 = por %p7123_p11, %p7122_p10 }
 0x192   : > { %6112 = vmatprep.subr.bf16.mxu0 %v6502_v9  ;;  %6159 = vmatpush3.bf16.msra.mxu1 %v6507_v11  ;;  %v845_v34 = vmul.f32 %v7954_v27, %v7947_v24  ;;  %v846_v35 = vmul.f32 %v7954_v27, %v7929_v15  ;;  %v847_v36 = vmul.f32 %v7954_v27, %v7932_v18  ;;  %v1189_v55 = vsub.f32 1.0, %v1150_v46 }
 0x193   : > { %6160 = vmatprep.subr.bf16.mxu1 %v6509_v14  ;;  %v848_v38 = vmul.f32 %v7954_v27, %v7938_v20  ;;  %v849_v45 = vmul.f32 %v7954_v27, %v7944_v23  ;;  %v850_v48 = vmul.f32 %v7954_v27, %v7961_v31  ;;  %v813_v50 = vmul.f32 %v7941_v21, %v7976_v37  ;;  %p7125_p1 = pnand %p7124_p6, %p7118_p12 }
 0x194   : > { %v877_v42 = vadd.f32 %v845_v34, %v806_v25  ;;  %v878_v43 = vadd.f32 %v846_v35, %v807_v26  ;;  %v7984_v44 = vadd.f32 %v847_v36, %v808_v28  ;;  %v851_v54 = vmul.f32 %v7954_v27, %v7964_v32 }
 0x195   : > { %6113 = vmatpush3.bf16.msra.mxu0 %v6502_v9  ;;  %v7991_v47 = vadd.f32 %v848_v38, %v809_v30  ;;  %v8002_v53 = vadd.f32 %v849_v45, %v810_v40  ;;  %v882_v60 = vadd.f32 %v850_v48, %v811_v41  ;;  %v852_v61 = vmul.f32 %v7954_v27, %v7967_v33 }
 0x196   : > { %6114 = vmatprep.subr.bf16.mxu0 %v6504_v12  ;;  %6161 = vmatpush3.bf16.msra.mxu1 %v6509_v14  ;;  %v909_v52 = vpack.c.bf16 %v878_v43, %v877_v42  ;;  %v8013_v62 = vadd.f32 %v851_v54, %v812_v49  ;;  %v8016_v63 = vrot.slane %v1150_v46, %v7926_v13  ;;  %v6517_v49 = vld [vmem:[#allocation14 + $0x10] sm:$0xff]  }
 0x197   : > { %6162 = vmatprep.subr.bf16.mxu1 %v6511_v17  ;;  %v910_v58 = vpack.c.bf16 %v7991_v47, %v7984_v44  ;;  %v8019_v0 = vrot.slane %v1189_v55, %v7926_v13  ;;  %v814_v1 = vmul.f32 %v7941_v21, %v8000_v51  ;;  %v911_v2 = vpack.c.bf16 %v882_v60, %v8002_v53  ;;  %v8079_v53 = vld [vmem:[%s7874_s5 + $0xf8] sm:$0xff] }
 0x198   : > { %6122 = vmatprep.mubr.bf16.mxu0 %v909_v52  ;;  %v8024_v3 = vadd.f32 %v852_v61, %v813_v50  ;;  %v815_v4 = vmul.f32 %v7941_v21, %v8007_v56  ;;  %v853_v5 = vmul.f32 %v7954_v27, %v7976_v37  ;;  %v1157_v7 = vmul.f32 %v8016_v63, %v7929_v15  ;;  %v8076_v52 = vld [vmem:[%s7874_s5 + $0x60] sm:$0xff] }
 0x199   : > { %6115 = vmatpush3.bf16.msra.mxu0 %v6504_v12  ;;  %v1158_v8 = vmul.f32 %v8016_v63, %v7932_v18  ;;  %v1196_v9 = vmul.f32 %v8019_v0, %v7947_v24  ;;  %v6516_v12 = vld [vmem:[#allocation13 + $0x38] sm:$0xff]   ;;  %v1197_v14 = vmul.f32 %v8019_v0, %v7929_v15  ;;  %v1160_v22 = vmul.f32 %v8016_v63, %v7944_v23 }
 0x19a   : > { %6116 = vmatprep.subr.bf16.mxu0 %v6506_v16  ;;  %6163 = vmatpush3.bf16.msra.mxu1 %v6511_v17  ;;  %v912_v11 = vpack.c.bf16 %v8024_v3, %v8013_v62  ;;  %v8046_v17 = vld [vmem:[%s7874_s5 + $0x58] sm:$0xff]  ;;  %v1198_v25 = vmul.f32 %v8019_v0, %v7932_v18  ;;  %v1199_v26 = vmul.f32 %v8019_v0, %v7938_v20 }
 0x19b   : > { %6164 = vmatprep.subr.bf16.mxu1 %v6513_v39  ;;  %v1228_v19 = vadd.f32 %v1196_v9, %v1157_v7  ;;  %v1229_v28 = vadd.f32 %v1197_v14, %v1158_v8  ;;  %v8056_v30 = vadd.f32 %v853_v5, %v814_v1  ;;  %v816_v34 = vmul.f32 %v7941_v21, %v8037_v10 }
 0x19c   : > { %v1231_v36 = vadd.f32 %v1199_v26, %v1160_v22  ;;  %v817_v38 = vmul.f32 %v7941_v21, %v8046_v17  ;;  %v855_v42 = vmul.f32 %v7954_v27, %v8007_v56  ;;  %v856_v44 = vmul.f32 %v7954_v27, %v8037_v10  ;;  %798 = vst [vmem:[%s7916_s15] sm:$0xff] %v8079_v53 }
 0x19d   : > { %6117 = vmatpush3.bf16.msra.mxu0 %v6506_v16  ;;  %v1159_v16 = vmul.f32 %v8016_v63, %v7938_v20  ;;  %v1260_v40 = vpack.c.bf16 %v1229_v28, %v1228_v19  ;;  %v1161_v45 = vmul.f32 %v8016_v63, %v7961_v31  ;;  %v1162_v46 = vmul.f32 %v8016_v63, %v7964_v32 }
 0x19e   : > { %6118 = vmatprep.subr.bf16.mxu0 %v6508_v29  ;;  %6165 = vmatpush3.bf16.msra.mxu1 %v6513_v39  ;;  %v6515_v39 = vld [vmem:[#allocation14 + $0x8] sm:$0xff]   ;;  %v8071_v48 = vadd.f32 %v855_v42, %v816_v34  ;;  %v1200_v50 = vmul.f32 %v8019_v0, %v7944_v23  ;;  %v8081_v54 = vadd.f32 %v856_v44, %v817_v38  ;;  %v8139_v44 = vld [vmem:[%s7874_s5 + $0x88] sm:$0xff] }
 0x19f   : > { %6166 = vmatprep.subr.bf16.mxu1 %v6514_v59  ;;  %v1230_v35 = vadd.f32 %v1198_v25, %v1159_v16  ;;  %6170 = vmatprep.mubr.bf16.mxu1 %v1260_v40  ;;  %v1201_v55 = vmul.f32 %v8019_v0, %v7961_v31  ;;  %v1164_v61 = vmul.f32 %v8016_v63, %v7976_v37  ;;  %v6518_v16 = vld [vmem:[#allocation14 + $0x18] sm:$0xff]  }
 0x1a0   : > { %v1232_v60 = vadd.f32 %v1200_v50, %v1161_v45  ;;  %v1202_v1 = vmul.f32 %v8019_v0, %v7964_v32  ;;  %v818_v7 = vmul.f32 %v7941_v21, %v8076_v52  ;;  %v858_v14 = vmul.f32 %v7954_v27, %v8076_v52 }
 0x1a1   : > { %6119 = vmatpush3.bf16.msra.mxu0 %v6508_v29  ;;  %v854_v29 = vmul.f32 %v7954_v27, %v8000_v51  ;;  %v1261_v43 = vpack.c.bf16 %v1231_v36, %v1230_v35  ;;  %v1233_v5 = vadd.f32 %v1201_v55, %v1162_v46  ;;  %v1165_v36 = vmul.f32 %v8016_v63, %v8000_v51 }
 0x1a2   : > { %6120 = vmatprep.subr.bf16.mxu0 %v6510_v57  ;;  %6167 = vmatpush3.bf16.msra.mxu1 %v6514_v59  ;;  %v8091_v59 = vld [vmem:[%s7874_s5 + $0x70] sm:$0xff]  ;;  %v1166_v38 = vmul.f32 %v8016_v63, %v8007_v56  ;;  %v1205_v42 = vmul.f32 %v8019_v0, %v8000_v51  ;;  %v1167_v62 = vmul.f32 %v8016_v63, %v8037_v10 }
 0x1a3   : > { %6168 = vmatprep.subr.bf16.mxu1 %v6516_v12  ;;  %v886_v41 = vadd.f32 %v854_v29, %v815_v4  ;;  %v914_v4 = vpack.c.bf16 %v8081_v54, %v8071_v48  ;;  %v1262_v19 = vpack.c.bf16 %v1233_v5, %v1232_v60  ;;  %v820_v25 = vmul.f32 %v7941_v21, %v8091_v59  ;;  %v6519_v5 = vld [vmem:[#allocation14 + $0x20] sm:$0xff]  }
 0x1a4   : > { %v860_v35 = vmul.f32 %v7954_v27, %v8091_v59  ;;  %v1168_v3 = vmul.f32 %v8016_v63, %v8046_v17  ;;  %v1237_v46 = vadd.f32 %v1205_v42, %v1166_v38  ;;  %v1206_v50 = vmul.f32 %v8019_v0, %v8007_v56  ;;  %v8207_v54 = vld [vmem:[%s7874_s5 + $0xb0] sm:$0xff] }
 0x1a5   : > { %6121 = vmatpush3.bf16.msra.mxu0 %v6510_v57  ;;  %v913_v47 = vpack.c.bf16 %v886_v41, %v8056_v30  ;;  %v1163_v57 = vmul.f32 %v8016_v63, %v7967_v33  ;;  %v1204_v41 = vmul.f32 %v8019_v0, %v7976_v37  ;;  %v1207_v55 = vmul.f32 %v8019_v0, %v8037_v10 }
 0x1a6   : > { %6202 = vmatprep.subr.bf16.mxu0 %v6512_v6  ;;  %6169 = vmatpush3.bf16.msra.mxu1 %v6516_v12  ;;  %v857_v12 = vmul.f32 %v7954_v27, %v8046_v17 }
 0x1a7   : > { %v1234_v8 = vadd.f32 %v1202_v1, %v1163_v57  ;;  %v8152_v57 = vld [vmem:[%s7874_s5 + $0x90] sm:$0xff] }
 0x1a8   : > { %6123 = vmatmul.mubr.bf16.vlgmr.msra.gmra.mrb[0].mxu0 %v910_v58  ;;  %v8088_v58 = vld [vmem:[%s7874_s5 + $0x68] sm:$0xff]  ;;  %v889_v26 = vadd.f32 %v857_v12, %v818_v7  ;;  %v1238_v7 = vadd.f32 %v1206_v50, %v1167_v62  ;;  %v1171_v62 = vmul.f32 %v8016_v63, %v8091_v59 }
 0x1a9   : > { %6203 = vmatpush3.bf16.msra.mxu0 %v6512_v6  ;;  %6126 = vmatprep.mubr.bf16.mxu0 %v911_v2  ;;  %v8100_v2 = vld [vmem:[%s7874_s5 + $0x78] sm:$0xff]  ;;  %v1203_v6 = vmul.f32 %v8019_v0, %v7967_v33  ;;  %v819_v9 = vmul.f32 %v7941_v21, %v8088_v58  ;;  %v859_v30 = vmul.f32 %v7954_v27, %v8088_v58 }
 0x1aa   : > { %6204 = vmatprep.subr.bf16.mxu0 %v6515_v39  ;;  %6171 = vmatmul.mubr.bf16.vlgmr.msra.gmra.mrb[0].mxu1 %v1261_v43  ;;  %v821_v29 = vmul.f32 %v7941_v21, %v8100_v2  ;;  %v8136_v43 = vld [vmem:[%s7874_s5 + $0x80] sm:$0xff]  ;;  %v861_v1 = vmul.f32 %v7954_v27, %v8100_v2  ;;  %v1172_v48 = vmul.f32 %v8016_v63, %v8100_v2 }
 0x1ab   : > { %v1235_v22 = vadd.f32 %v1203_v6, %v1164_v61  ;;  %v890_v28 = vadd.f32 %v858_v14, %v819_v9  ;;  %6174 = vmatprep.mubr.bf16.mxu1 %v1262_v19  ;;  %v8129_v40 = vadd.f32 %v859_v30, %v820_v25  ;;  %v822_v60 = vmul.f32 %v7941_v21, %v8136_v43 }
 0x1ac   : > { %v8141_v45 = vadd.f32 %v860_v35, %v821_v29  ;;  %v823_v61 = vmul.f32 %v7941_v21, %v8139_v44  ;;  %v862_v9 = vmul.f32 %v7954_v27, %v8136_v43  ;;  %v824_v14 = vmul.f32 %v7941_v21, %v8152_v57 }
 0x1ad   : > { %6205 = vmatpush3.bf16.msra.mxu0 %v6515_v39  ;;  %v1263_v34 = vpack.c.bf16 %v1235_v22, %v1234_v8  ;;  %v915_v39 = vpack.c.bf16 %v890_v28, %v889_v26  ;;  %v1239_v8 = vadd.f32 %v1207_v55, %v1168_v3  ;;  %v8167_v12 = vadd.f32 %v861_v1, %v822_v60  ;;  %v8202_v3 = vld [vmem:[%s7874_s5 + $0xa8] sm:$0xff] }
 0x1ae   : > { %6206 = vmatprep.subr.bf16.mxu0 %v6517_v49  ;;  %v8173_v25 = vadd.f32 %v862_v9, %v823_v61  ;;  %v863_v26 = vmul.f32 %v7954_v27, %v8139_v44  ;;  %v864_v28 = vmul.f32 %v7954_v27, %v8152_v57  ;;  %v1169_v29 = vmul.f32 %v8016_v63, %v8076_v52 }
 0x1af   : > { %v1265_v22 = vpack.c.bf16 %v1239_v8, %v1238_v7  ;;  %v1170_v30 = vmul.f32 %v8016_v63, %v8088_v58  ;;  %v1209_v35 = vmul.f32 %v8019_v0, %v8076_v52  ;;  %v1210_v55 = vmul.f32 %v8019_v0, %v8088_v58  ;;  %v6521_v7 = vld [vmem:[#allocation14 + $0x30] sm:$0xff]   ;;  %v8226_v8 = vld [vmem:[#allocation7] sm:$0x1] }
 0x1b0   : > { %6127 = vmatmul.mubr.bf16.gmra.mrb[4].mxu0 %v912_v11  ;;  %v1236_v11 = vadd.f32 %v1204_v41, %v1165_v36  ;;  %v8188_v36 = vld [vmem:[%s7874_s5 + $0xa0] sm:$0xff]  ;;  %v917_v38 = vpack.c.bf16 %v8173_v25, %v8167_v12  ;;  %v8195_v41 = vadd.f32 %v863_v26, %v824_v14  ;;  %v1211_v60 = vmul.f32 %v8019_v0, %v8091_v59 }
 0x1b1   : > { %6130 = vmatprep.mubr.bf16.mxu0 %v913_v47  ;;  %6207 = vmatpush3.bf16.msra.mxu0 %v6517_v49  ;;  %v8155_v47 = vld [vmem:[%s7874_s5 + $0x98] sm:$0xff]  ;;  %v916_v49 = vpack.c.bf16 %v8141_v45, %v8129_v40  ;;  %v827_v1 = vmul.f32 %v7941_v21, %v8202_v3  ;;  %v1242_v9 = vadd.f32 %v1210_v55, %v1171_v62  ;;  %v8257_v55 = vld [vmem:[%s7874_s5 + $0xc8] sm:$0xff] }
 0x1b2   : > { %6208 = vmatprep.subr.bf16.mxu0 %v6518_v16  ;;  %v1264_v6 = vpack.c.bf16 %v1237_v46, %v1236_v11  ;;  %6175 = vmatmul.mubr.bf16.gmra.mrb[4].mxu1 %v1263_v34  ;;  %v825_v19 = vmul.f32 %v7941_v21, %v8155_v47  ;;  %v1208_v34 = vmul.f32 %v8019_v0, %v8046_v17 }
 0x1b3   : > { %v1241_v46 = vadd.f32 %v1209_v35, %v1170_v30  ;;  %v1243_v12 = vadd.f32 %v1211_v60, %v1172_v48  ;;  %v828_v14 = vmul.f32 %v7941_v21, %v8207_v54  ;;  %v8245_v35 = vld [vmem:[%s7874_s5 + $0xc0] sm:$0xff]  ;;  %v6522_v60 = vld [vmem:[#allocation14 + $0x38] sm:$0xff]  }
 0x1b4   : > { %6178 = vmatprep.mubr.bf16.mxu1 %v1264_v6  ;;  %v8197_v42 = vadd.f32 %v864_v28, %v825_v19  ;;  %v1240_v11 = vadd.f32 %v1208_v34, %v1169_v29  ;;  %v866_v6 = vmul.f32 %v7954_v27, %v8188_v36  ;;  %v867_v28 = vmul.f32 %v7954_v27, %v8202_v3 }
 0x1b5   : > { %6209 = vmatpush3.bf16.msra.mxu0 %v6518_v16  ;;  %v6520_v16 = vld [vmem:[#allocation14 + $0x28] sm:$0xff]   ;;  %v868_v29 = vmul.f32 %v7954_v27, %v8207_v54  ;;  %v1267_v30 = vpack.c.bf16 %v1243_v12, %v1242_v9  ;;  %v1173_v34 = vmul.f32 %v8016_v63, %v8136_v43  ;;  %v830_v12 = vmul.f32 %v7941_v21, %v8245_v35 }
 0x1b6   : > { %6210 = vmatprep.subr.bf16.mxu0 %v6519_v5  ;;  %v918_v50 = vpack.c.bf16 %v8197_v42, %v8195_v41  ;;  %v1266_v61 = vpack.c.bf16 %v1241_v46, %v1240_v11  ;;  %v8234_v26 = vadd.f32 %v866_v6, %v827_v1  ;;  %v8250_v46 = vadd.f32 %v867_v28, %v828_v14  ;;  %v8271_v6 = vld [vmem:[%s7874_s5 + $0xd0] sm:$0xff]  ;;  %v8274_v9 = vld [vmem:[%s7874_s5 + $0xd8] sm:$0xff] }
 0x1b7   : > { %v1176_v1 = vmul.f32 %v8016_v63, %v8155_v47  ;;  %v870_v28 = vmul.f32 %v7954_v27, %v8245_v35  ;;  %v873_v41 = vmul.f32 %v7954_v27, %v8274_v9 }
 0x1b8   : > { %6131 = vmatmul.mubr.bf16.gmra.mrb[8].mxu0 %v914_v4  ;;  %v8210_v4 = vld [vmem:[%s7874_s5 + $0xb8] sm:$0xff] }
 0x1b9   : > { %6134 = vmatprep.mubr.bf16.mxu0 %v915_v39  ;;  %6211 = vmatpush3.bf16.msra.mxu0 %v6519_v5  ;;  %v826_v39 = vmul.f32 %v7941_v21, %v8188_v36  ;;  %v865_v5 = vmul.f32 %v7954_v27, %v8155_v47  ;;  %v829_v19 = vmul.f32 %v7941_v21, %v8210_v4 }
 0x1ba   : > { %6212 = vmatprep.subr.bf16.mxu0 %v6520_v16  ;;  %6179 = vmatmul.mubr.bf16.gmra.mrb[8].mxu1 %v1265_v22  ;;  %v1174_v22 = vmul.f32 %v8016_v63, %v8139_v44 }
 0x1bb   : > { %v8232_v25 = vadd.f32 %v865_v5, %v826_v39  ;;  %6182 = vmatprep.mubr.bf16.mxu1 %v1266_v61  ;;  %v8252_v48 = vadd.f32 %v868_v29, %v829_v19  ;;  %v1213_v39 = vmul.f32 %v8019_v0, %v8136_v43  ;;  %v1175_v61 = vmul.f32 %v8016_v63, %v8152_v57 }
 0x1bc   : > { %v1214_v5 = vmul.f32 %v8019_v0, %v8139_v44  ;;  %v832_v29 = vmul.f32 %v7941_v21, %v8271_v6 }
 0x1bd   : > { %6213 = vmatpush3.bf16.msra.mxu0 %v6520_v16  ;;  %v919_v11 = vpack.c.bf16 %v8234_v26, %v8232_v25  ;;  %v1212_v16 = vmul.f32 %v8019_v0, %v8100_v2  ;;  %v920_v40 = vpack.c.bf16 %v8252_v48, %v8250_v46  ;;  %v1245_v14 = vadd.f32 %v1213_v39, %v1174_v22 }
 0x1be   : > { %6214 = vmatprep.subr.bf16.mxu0 %v6521_v7  ;;  %v1246_v19 = vadd.f32 %v1214_v5, %v1175_v61  ;;  %v831_v25 = vmul.f32 %v7941_v21, %v8257_v55  ;;  %v869_v26 = vmul.f32 %v7954_v27, %v8210_v4  ;;  %v871_v39 = vmul.f32 %v7954_v27, %v8257_v55 }
 0x1bf   : > { %v1244_v45 = vadd.f32 %v1212_v16, %v1173_v34  ;;  %v833_v34 = vmul.f32 %v7941_v21, %v8274_v9  ;;  %v1177_v5 = vmul.f32 %v8016_v63, %v8188_v36  ;;  %v1224_v48 = vmul.f32 %v8019_v0, %v8274_v9 }
 0x1c0   : > { %6135 = vmatmul.mubr.bf16.gmra.mrb[12].mxu0 %v916_v49  ;;  %v1215_v49 = vmul.f32 %v8019_v0, %v8152_v57  ;;  %v901_v16 = vadd.f32 %v869_v26, %v830_v12  ;;  %v8300_v62 = vadd.f32 %v871_v39, %v832_v29  ;;  %v1216_v12 = vmul.f32 %v8019_v0, %v8155_v47  ;;  %v8321_v29 = vld [vmem:[%s7874_s5 + $0xf0] sm:$0xff] }
 0x1c1   : > { %6138 = vmatprep.mubr.bf16.mxu0 %v917_v38  ;;  %6215 = vmatpush3.bf16.msra.mxu0 %v6521_v7  ;;  %v1268_v22 = vpack.c.bf16 %v1245_v14, %v1244_v45  ;;  %v872_v7 = vmul.f32 %v7954_v27, %v8271_v6  ;;  %v8309_v14 = vld [vmem:[%s7874_s5 + $0xe0] sm:$0xff]  ;;  %v1179_v26 = vmul.f32 %v8016_v63, %v8207_v54 }
 0x1c2   : > { %v1247_v38 = vadd.f32 %v1215_v49, %v1176_v1  ;;  %6216 = vmatprep.subr.bf16.mxu0 %v6522_v60  ;;  %6183 = vmatmul.mubr.bf16.gmra.mrb[12].mxu1 %v1267_v30  ;;  %v902_v1 = vadd.f32 %v870_v28, %v831_v25  ;;  %v1178_v49 = vmul.f32 %v8016_v63, %v8202_v3 }
 0x1c3   : > { %6186 = vmatprep.mubr.bf16.mxu1 %v1268_v22  ;;  %v8302_v45 = vadd.f32 %v872_v7, %v833_v34  ;;  %v1217_v30 = vmul.f32 %v8019_v0, %v8188_v36  ;;  %v1218_v28 = vmul.f32 %v8019_v0, %v8202_v3  ;;  %v1248_v22 = vadd.f32 %v1216_v12, %v1177_v5 }
 0x1c4   : > { %v1269_v61 = vpack.c.bf16 %v1247_v38, %v1246_v19  ;;  %v8312_v19 = vld [vmem:[%s7874_s5 + $0xe8] sm:$0xff]  ;;  %v921_v25 = vpack.c.bf16 %v902_v1, %v901_v16  ;;  %v1180_v38 = vmul.f32 %v8016_v63, %v8210_v4  ;;  %v1219_v39 = vmul.f32 %v8019_v0, %v8207_v54  ;;  %s11755_s5 = sld [smem:[#allocation35_spill]] }
 0x1c5   : > { %6217 = vmatpush3.bf16.msra.mxu0 %v6522_v60  ;;  %v922_v34 = vpack.c.bf16 %v8302_v45, %v8300_v62  ;;  %v1249_v16 = vadd.f32 %v1217_v30, %v1178_v49  ;;  %v1250_v7 = vadd.f32 %v1218_v28, %v1179_v26  ;;  %v834_v1 = vmul.f32 %v7941_v21, %v8309_v14 }
 0x1c6   : > { %v835_v60 = vmul.f32 %v7941_v21, %v8312_v19  ;;  %v874_v5 = vmul.f32 %v7954_v27, %v8309_v14  ;;  %v836_v49 = vmul.f32 %v7941_v21, %v8321_v29  ;;  %v875_v30 = vmul.f32 %v7954_v27, %v8312_v19 }
 0x1c7   : > { %v1270_v42 = vpack.c.bf16 %v1249_v16, %v1248_v22  ;;  %v8340_v12 = vadd.f32 %v873_v41, %v834_v1  ;;  %v876_v26 = vmul.f32 %v7954_v27, %v8321_v29  ;;  %v1182_v16 = vmul.f32 %v8016_v63, %v8257_v55 }
 0x1c8   : > { %6139 = vmatmul.mubr.bf16.gmra.mrb[16].mxu0 %v918_v50  ;;  %v1251_v50 = vadd.f32 %v1219_v39, %v1180_v38  ;;  %v906_v22 = vadd.f32 %v874_v5, %v835_v60  ;;  %v1181_v38 = vmul.f32 %v8016_v63, %v8245_v35  ;;  %v8352_v39 = vadd.f32 %v875_v30, %v836_v49 }
 0x1c9   : > { %6142 = vmatprep.mubr.bf16.mxu0 %v919_v11  ;;  %v837_v11 = vmul.f32 %v7941_v21, %v8079_v53  ;;  %v1220_v21 = vmul.f32 %v8019_v0, %v8210_v4  ;;  %v1221_v41 = vmul.f32 %v8019_v0, %v8245_v35  ;;  %v1184_v60 = vmul.f32 %v8016_v63, %v8274_v9 }
 0x1ca   : > { %v1271_v28 = vpack.c.bf16 %v1251_v50, %v1250_v7  ;;  %6187 = vmatmul.mubr.bf16.gmra.mrb[16].mxu1 %v1269_v61  ;;  %v923_v27 = vpack.c.bf16 %v906_v22, %v8340_v12  ;;  %v1183_v7 = vmul.f32 %v8016_v63, %v8271_v6  ;;  %v1222_v61 = vmul.f32 %v8019_v0, %v8257_v55  ;;  %s10824_s28 = sshll.u32 %s11755_s5, 7 }
 0x1cb   : > { %v8354_v1 = vadd.f32 %v876_v26, %v837_v11  ;;  %6190 = vmatprep.mubr.bf16.mxu1 %v1270_v42  ;;  %v1252_v5 = vadd.f32 %v1220_v21, %v1181_v38  ;;  %v1253_v49 = vadd.f32 %v1221_v41, %v1182_v16  ;;  %v1223_v11 = vmul.f32 %v8019_v0, %v8271_v6  ;;  %s10830_s27 = scalar_lea.hbm %s11756_s18, %s10824_s28 }
 0x1cc   : > { %v1254_v42 = vadd.f32 %v1222_v61, %v1183_v7  ;;  %v8376_v12 = vrot.slane %v8226_v8, %v7926_v13  ;;  %v11239_v30 = vsub.f32 1.0, %v8226_v8  ;;  %v1185_v22 = vmul.f32 %v8016_v63, %v8309_v14 }
 0x1cd   : > { %v924_v50 = vpack.c.bf16 %v8354_v1, %v8352_v39  ;;  %v1272_v38 = vpack.c.bf16 %v1253_v49, %v1252_v5  ;;  %v1255_v16 = vadd.f32 %v1223_v11, %v1184_v60  ;;  %v1186_v46 = vmul.f32 %v8016_v63, %v8312_v19 }
 0x1ce   : > { %v8381_v26 = vrot.slane %v11239_v30, %v7926_v13  ;;  %v1509_v8 = vmul.f32 %v8376_v12, %v7932_v18  ;;  %v1510_v7 = vmul.f32 %v8376_v12, %v7938_v20  ;;  %v1511_v60 = vmul.f32 %v8376_v12, %v7944_v23 }
 0x1cf   : > { %v1273_v41 = vpack.c.bf16 %v1255_v16, %v1254_v42  ;;  %v1256_v42 = vadd.f32 %v1224_v48, %v1185_v22  ;;  %v1187_v30 = vmul.f32 %v8016_v63, %v8321_v29  ;;  %v1188_v16 = vmul.f32 %v8016_v63, %v8079_v53 }
 0x1d0   : > { %6143 = vmatmul.mubr.bf16.gmra.mrb[20].mxu0 %v920_v40  ;;  %v1508_v40 = vmul.f32 %v8376_v12, %v7929_v15  ;;  %v1547_v21 = vmul.f32 %v8381_v26, %v7947_v24  ;;  %v1549_v61 = vmul.f32 %v8381_v26, %v7932_v18  ;;  %v1550_v11 = vmul.f32 %v8381_v26, %v7938_v20 }
 0x1d1   : > { %6146 = vmatprep.mubr.bf16.mxu0 %v921_v25  ;;  %v1548_v25 = vmul.f32 %v8381_v26, %v7929_v15  ;;  %v1225_v24 = vmul.f32 %v8019_v0, %v8309_v14  ;;  %v1226_v20 = vmul.f32 %v8019_v0, %v8312_v19  ;;  %v1512_v22 = vmul.f32 %v8376_v12, %v7961_v31 }
 0x1d2   : > { %v1579_v5 = vadd.f32 %v1547_v21, %v1508_v40  ;;  %6191 = vmatmul.mubr.bf16.gmra.mrb[20].mxu1 %v1271_v28  ;;  %v8407_v15 = vadd.f32 %v1549_v61, %v1510_v7  ;;  %v8413_v40 = vadd.f32 %v1550_v11, %v1511_v60  ;;  %v1227_v28 = vmul.f32 %v8019_v0, %v8321_v29 }
 0x1d3   : > { %v1580_v49 = vadd.f32 %v1548_v25, %v1509_v8  ;;  %6194 = vmatprep.mubr.bf16.mxu1 %v1272_v38  ;;  %v1257_v8 = vadd.f32 %v1225_v24, %v1186_v46  ;;  %v1513_v48 = vmul.f32 %v8376_v12, %v7964_v32  ;;  %v1551_v63 = vmul.f32 %v8381_v26, %v7944_v23 }
 0x1d4   : > { %v1612_v38 = vpack.c.bf16 %v8413_v40, %v8407_v15  ;;  %v1258_v21 = vadd.f32 %v1226_v20, %v1187_v30  ;;  %v1552_v0 = vmul.f32 %v8381_v26, %v7961_v31  ;;  %v1259_v25 = vadd.f32 %v1227_v28, %v1188_v16 }
 0x1d5   : > { %v1611_v18 = vpack.c.bf16 %v1580_v49, %v1579_v5  ;;  %v1274_v46 = vpack.c.bf16 %v1257_v8, %v1256_v42  ;;  %v8432_v7 = vadd.f32 %v1551_v63, %v1512_v22  ;;  %v1514_v60 = vmul.f32 %v8376_v12, %v7967_v33 }
 0x1d6   : > { %v1515_v23 = vmul.f32 %v8376_v12, %v7976_v37  ;;  %v8438_v62 = vadd.f32 %v1552_v0, %v1513_v48  ;;  %v1553_v45 = vmul.f32 %v8381_v26, %v7964_v32  ;;  %v1516_v31 = vmul.f32 %v8376_v12, %v8000_v51 }
 0x1d7   : > { %v1517_v61 = vmul.f32 %v8376_v12, %v8007_v56  ;;  %v1555_v5 = vmul.f32 %v8381_v26, %v7976_v37  ;;  %v1556_v49 = vmul.f32 %v8381_v26, %v8000_v51  ;;  %v1519_v37 = vmul.f32 %v8376_v12, %v8046_v17 }
 0x1d8   : > { %6147 = vmatmul.mubr.bf16.gmra.mrb[24].mxu0 %v922_v34  ;;  %v1554_v34 = vmul.f32 %v8381_v26, %v7967_v33  ;;  %v1613_v11 = vpack.c.bf16 %v8438_v62, %v8432_v7  ;;  %v8454_v32 = vadd.f32 %v1553_v45, %v1514_v60  ;;  %v1518_v33 = vmul.f32 %v8376_v12, %v8037_v10 }
 0x1d9   : > { %6150 = vmatprep.mubr.bf16.mxu0 %v923_v27  ;;  %v1275_v27 = vpack.c.bf16 %v1259_v25, %v1258_v21  ;;  %v8460_v42 = vadd.f32 %v1555_v5, %v1516_v31  ;;  %v8462_v30 = vadd.f32 %v1556_v49, %v1517_v61  ;;  %v1557_v51 = vmul.f32 %v8381_v26, %v8007_v56 }
 0x1da   : > { %v8456_v24 = vadd.f32 %v1554_v34, %v1515_v23  ;;  %6195 = vmatmul.mubr.bf16.gmra.mrb[24].mxu1 %v1273_v41  ;;  %v1558_v8 = vmul.f32 %v8381_v26, %v8037_v10  ;;  %v1520_v41 = vmul.f32 %v8376_v12, %v8076_v52  ;;  %v1521_v20 = vmul.f32 %v8376_v12, %v8088_v58 }
 0x1db   : > { %6198 = vmatprep.mubr.bf16.mxu1 %v1274_v46  ;;  %v1615_v28 = vpack.c.bf16 %v8462_v30, %v8460_v42  ;;  %v8478_v22 = vadd.f32 %v1557_v51, %v1518_v33  ;;  %v1559_v56 = vmul.f32 %v8381_v26, %v8046_v17  ;;  %v1560_v48 = vmul.f32 %v8381_v26, %v8076_v52  ;;  %v1855_v42 = vld [vmem:[#allocation10] sm:$0x1] }
 0x1dc   : > { %v1614_v16 = vpack.c.bf16 %v8456_v24, %v8454_v32  ;;  %v8487_v10 = vadd.f32 %v1558_v8, %v1519_v37  ;;  %v1522_v63 = vmul.f32 %v8376_v12, %v8091_v59  ;;  %v1523_v46 = vmul.f32 %v8376_v12, %v8100_v2  ;;  %v6524_v24 = vld [vmem:[#allocation16 + $0x8] sm:$0xff]  }
 0x1dd   : > { %v1561_v21 = vmul.f32 %v8381_v26, %v8088_v58  ;;  %v8495_v17 = vadd.f32 %v1559_v56, %v1520_v41  ;;  %v8497_v0 = vadd.f32 %v1560_v48, %v1521_v20  ;;  %v1562_v52 = vmul.f32 %v8381_v26, %v8091_v59 }
 0x1de   : > { %v1524_v39 = vmul.f32 %v8376_v12, %v8136_v43  ;;  %v1616_v1 = vpack.c.bf16 %v8487_v10, %v8478_v22  ;;  %v1525_v25 = vmul.f32 %v8376_v12, %v8139_v44  ;;  %v1563_v58 = vmul.f32 %v8381_v26, %v8100_v2 }
 0x1df   : > { %v1594_v7 = vadd.f32 %v1562_v52, %v1523_v46  ;;  %v1564_v59 = vmul.f32 %v8381_v26, %v8136_v43  ;;  %v1526_v60 = vmul.f32 %v8376_v12, %v8152_v57  ;;  %v1527_v62 = vmul.f32 %v8376_v12, %v8155_v47 }
 0x1e0   : > { %6151 = vmatmul.mubr.bf16.gmra.mrb[28].mxu0 %v924_v50  ;;  %v8505_v50 = vadd.f32 %v1561_v21, %v1522_v63  ;;  %v1595_v23 = vadd.f32 %v1563_v58, %v1524_v39  ;;  %v1565_v45 = vmul.f32 %v8381_v26, %v8139_v44  ;;  %v1566_v2 = vmul.f32 %v8381_v26, %v8152_v57 }
 0x1e1   : > { %6218 = vmatprep.mubr.bf16.mxu0 %v1611_v18  ;;  %v1617_v18 = vpack.c.bf16 %v8497_v0, %v8495_v17  ;;  %v1596_v31 = vadd.f32 %v1564_v59, %v1525_v25  ;;  %v1528_v43 = vmul.f32 %v8376_v12, %v8188_v36  ;;  %v1529_v61 = vmul.f32 %v8376_v12, %v8202_v3 }
 0x1e2   : > { %6199 = vmatmul.mubr.bf16.gmra.mrb[28].mxu1 %v1275_v27  ;;  %v1618_v34 = vpack.c.bf16 %v1594_v7, %v8505_v50  ;;  %v1597_v5 = vadd.f32 %v1565_v45, %v1526_v60  ;;  %v1598_v49 = vadd.f32 %v1566_v2, %v1527_v62  ;;  %v1567_v33 = vmul.f32 %v8381_v26, %v8155_v47 }
 0x1e3   : > { %v1568_v44 = vmul.f32 %v8381_v26, %v8188_v36  ;;  %v1619_v37 = vpack.c.bf16 %v1596_v31, %v1595_v23  ;;  %v1530_v57 = vmul.f32 %v8376_v12, %v8207_v54  ;;  %v1531_v27 = vmul.f32 %v8376_v12, %v8210_v4 }
 0x1e4   : > { %v1569_v51 = vmul.f32 %v8381_v26, %v8202_v3  ;;  %v1620_v8 = vpack.c.bf16 %v1598_v49, %v1597_v5  ;;  %v1599_v41 = vadd.f32 %v1567_v33, %v1528_v43  ;;  %v1570_v36 = vmul.f32 %v8381_v26, %v8207_v54 }
 0x1e5   : > { %v1600_v47 = vadd.f32 %v1568_v44, %v1529_v61  ;;  %v1532_v56 = vmul.f32 %v8376_v12, %v8245_v35  ;;  %v1533_v48 = vmul.f32 %v8376_v12, %v8257_v55  ;;  %v1571_v3 = vmul.f32 %v8381_v26, %v8210_v4 }
 0x1e6   : > { %v1601_v20 = vadd.f32 %v1569_v51, %v1530_v57  ;;  %v1602_v15 = vadd.f32 %v1570_v36, %v1531_v27  ;;  %v1572_v40 = vmul.f32 %v8381_v26, %v8245_v35  ;;  %v1573_v46 = vmul.f32 %v8381_v26, %v8257_v55 }
 0x1e7   : > { %v1621_v63 = vpack.c.bf16 %v1600_v47, %v1599_v41  ;;  %v1603_v54 = vadd.f32 %v1571_v3, %v1532_v56  ;;  %v1574_v21 = vmul.f32 %v8381_v26, %v8271_v6  ;;  %v1536_v0 = vmul.f32 %v8376_v12, %v8309_v14 }
 0x1e8   : > { %6219 = vmatmul.mubr.bf16.vlgmr.msra.gmra.mrb[32].mxu0 %v1612_v38  ;;  %v1534_v38 = vmul.f32 %v8376_v12, %v8271_v6  ;;  %v1622_v17 = vpack.c.bf16 %v1602_v15, %v1601_v20  ;;  %v1604_v4 = vadd.f32 %v1572_v40, %v1533_v48  ;;  %v1537_v35 = vmul.f32 %v8376_v12, %v8312_v19 }
 0x1e9   : > { %6222 = vmatprep.mubr.bf16.mxu0 %v1613_v11  ;;  %v1535_v11 = vmul.f32 %v8376_v12, %v8274_v9  ;;  %v1575_v50 = vmul.f32 %v8381_v26, %v8274_v9  ;;  %v1576_v25 = vmul.f32 %v8381_v26, %v8309_v14  ;;  %v1538_v6 = vmul.f32 %v8376_v12, %v8321_v29 }
 0x1ea   : > { %v1605_v52 = vadd.f32 %v1573_v46, %v1534_v38  ;;  %v1623_v55 = vpack.c.bf16 %v1604_v4, %v1603_v54  ;;  %v1539_v58 = vmul.f32 %v8376_v12, %v8079_v53  ;;  %v1577_v7 = vmul.f32 %v8381_v26, %v8312_v19  ;;  %v6523_v19 = vld [vmem:[#allocation16] sm:$0xff]   ;;  %v6525_v46 = vld [vmem:[#allocation16 + $0x10] sm:$0xff]  }
 0x1eb   : > { %v1606_v39 = vadd.f32 %v1574_v21, %v1535_v11  ;;  %v1607_v60 = vadd.f32 %v1575_v50, %v1536_v0  ;;  %v1608_v23 = vadd.f32 %v1576_v25, %v1537_v35  ;;  %v1578_v62 = vmul.f32 %v8381_v26, %v8321_v29  ;;  %6250 = vmatprep.subr.bf16.mxu1 %v6523_v19  ;;  %v1852_v29 = vld [vmem:[#allocation8] sm:$0x1] }
 0x1ec   : > { %v1609_v9 = vadd.f32 %v1577_v7, %v1538_v6  ;;  %6251 = vmatpush3.bf16.msra.mxu1 %v6523_v19  ;;  %v1853_v26 = vmul.f32 1.442695, %v1852_v29  ;;  %v1856_v22 = vmul.f32 1.442695, %v1855_v42  ;;  %v8632_v19 = vld [vmem:[%s7920_s29] sm:$0xff] }
 0x1ed   : > { %v1624_v59 = vpack.c.bf16 %v1606_v39, %v1605_v52  ;;  %v1625_v14 = vpack.c.bf16 %v1608_v23, %v1607_v60  ;;  %v1610_v53 = vadd.f32 %v1578_v62, %v1539_v58  ;;  %6252 = vmatprep.subr.bf16.mxu1 %v6524_v24  ;;  %v8621_v60 = vld [vmem:[%s7918_s30] sm:$0xff] }
 0x1ee   : > { %6531 = vpow2.f32 %v1853_v26 }
 0x1ef   : > { %v1626_v12 = vpack.c.bf16 %v1610_v53, %v1609_v9  ;;  %6533 = vpow2.f32 %v1856_v22 }
 0x1f0   : > { %6223 = vmatmul.mubr.bf16.gmra.mrb[36].mxu0 %v1614_v16  ;;  %6253 = vmatpush3.bf16.msra.mxu1 %v6524_v24 }
 0x1f1   : > { %6226 = vmatprep.mubr.bf16.mxu0 %v1615_v28  ;;  %6254 = vmatprep.subr.bf16.mxu1 %v6525_v46 }
 0x1f4   : > { %6255 = vmatpush3.bf16.msra.mxu1 %v6525_v46 }
 0x1f8   : > { %6227 = vmatmul.mubr.bf16.gmra.mrb[40].mxu0 %v1616_v1  ;;  %v8584_v32 = vpop.eup %6531 }
 0x1f9   : > { %6230 = vmatprep.mubr.bf16.mxu0 %v1617_v18  ;;  %11240 = vst [vmem:[#allocation43_spill] sm:$0xff] %v8584_v32  ;;  %v2274_v30 = vmul.f32 -1.0, %v8584_v32  ;;  %v2754_v16 = vmul.f32 -2.0, %v8584_v32  ;;  %v3233_v28 = vmul.f32 -3.0, %v8584_v32  ;;  %v3234_v10 = vmul.f32 -4.0, %v8584_v32  ;;  %v6534_v48 = vpop.eup %6533 }
 0x1fa   : > { %v3714_v18 = vmul.f32 -8.0, %v8584_v32  ;;  %v4194_v2 = vmul.f32 -16.0, %v8584_v32  ;;  %v3711_v31 = vmul.f32 -5.0, %v8584_v32  ;;  %v3712_v61 = vmul.f32 -6.0, %v8584_v32 }
 0x1fb   : > { %v2306_v1 = vmul.f32 1.442695, %v2274_v30  ;;  %v2787_v45 = vmul.f32 1.442695, %v2754_v16  ;;  %v3269_v43 = vmul.f32 1.442695, %v3234_v10  ;;  %v8612_v58 = vrot.slane %v6534_v48, %v7926_v13 }
 0x1fc   : > { %v3753_v5 = vmul.f32 1.442695, %v3714_v18  ;;  %v3713_v49 = vmul.f32 -7.0, %v8584_v32  ;;  %v4241_v33 = vmul.f32 1.442695, %v4194_v2  ;;  %v4187_v44 = vmul.f32 -9.0, %v8584_v32 }
 0x1fd   : > { %6535 = vpow2.f32 %v2306_v1  ;;  %v4188_v57 = vmul.f32 -10.0, %v8584_v32  ;;  %v3749_v27 = vmul.f32 1.442695, %v3712_v61  ;;  %v4190_v51 = vmul.f32 -12.0, %v8584_v32 }
 0x1fe   : > { %6537 = vpow2.f32 %v2787_v45  ;;  %v4227_v41 = vmul.f32 1.442695, %v4187_v44  ;;  %v4191_v47 = vmul.f32 -13.0, %v8584_v32  ;;  %v4192_v20 = vmul.f32 -14.0, %v8584_v32 }
 0x1ff   : > { %v4229_v36 = vmul.f32 1.442695, %v4188_v57  ;;  %v4233_v56 = vmul.f32 1.442695, %v4190_v51  ;;  %v4627_v40 = vmul.f32 -17.0, %v8584_v32  ;;  %v4630_v51 = vmul.f32 -20.0, %v8584_v32 }
 0x200   : > { %6231 = vmatmul.mubr.bf16.gmra.mrb[44].mxu0 %v1618_v34  ;;  %v3267_v34 = vmul.f32 1.442695, %v3233_v28  ;;  %v4235_v3 = vmul.f32 1.442695, %v4191_v47  ;;  %v4237_v15 = vmul.f32 1.442695, %v4192_v20 }
 0x201   : > { %6234 = vmatprep.mubr.bf16.mxu0 %v1619_v37  ;;  %v3747_v37 = vmul.f32 1.442695, %v3711_v31  ;;  %v4675_v11 = vmul.f32 1.442695, %v4627_v40 }
 0x202   : > { %6539 = vpow2.f32 %v3267_v34 }
 0x203   : > { %6541 = vpow2.f32 %v3269_v43 }
 0x204   : > { %6543 = vpow2.f32 %v3753_v5 }
 0x205   : > { %6545 = vpow2.f32 %v4241_v33 }
 0x206   : > { %6547 = vpow2.f32 %v3747_v37 }
 0x207   : > { %6549 = vpow2.f32 %v3749_v27 }
 0x208   : > { %6235 = vmatmul.mubr.bf16.gmra.mrb[48].mxu0 %v1620_v8  ;;  %v3751_v8 = vmul.f32 1.442695, %v3713_v49 }
 0x209   : > { %6238 = vmatprep.mubr.bf16.mxu0 %v1621_v63  ;;  %v6536_v63 = vpop.eup %6535 }
 0x20a   : > { %6551 = vpow2.f32 %v3751_v8  ;;  %v6538_v38 = vpop.eup %6537  ;;  %v8602_v4 = vrot.slane %v6536_v63, %v7926_v13 }
 0x20b   : > { %6553 = vpow2.f32 %v4227_v41  ;;  %v8605_v0 = vrot.slane %v6538_v38, %v7926_v13 }
 0x20c   : > { %6555 = vpow2.f32 %v4229_v36  ;;  %v6540_v54 = vpop.eup %6539  ;;  %11241 = vst [vmem:[#allocation44_spill] sm:$0xff] %v8602_v4  ;;  %v8615_v7 = vmul.f32 0.0, %v8602_v4  ;;  %v8645_v28 = vmul.f32 %v8621_v60, %v8602_v4 }
 0x20d   : > { %6557 = vpow2.f32 %v4233_v56  ;;  %v6542_v21 = vpop.eup %6541  ;;  %11242 = vst [vmem:[#allocation45_spill] sm:$0xff] %v8605_v0  ;;  %v3370_v52 = vrot.slane %v6540_v54, %v7926_v13  ;;  %v8624_v23 = vmul.f32 0.0, %v8605_v0  ;;  %v8655_v34 = vmul.f32 %v8621_v60, %v8605_v0 }
 0x20e   : > { %6559 = vpow2.f32 %v4235_v3  ;;  %v8609_v25 = vrot.slane %v6542_v21, %v7926_v13  ;;  %11243 = vst [vmem:[#allocation46_spill] sm:$0xff] %v8615_v7 }
 0x20f   : > { %6561 = vpow2.f32 %v4237_v15  ;;  %v8626_v53 = vmul.f32 0.0, %v3370_v52  ;;  %v8641_v16 = vmul.f32 %v8632_v19, %v3370_v52  ;;  %v8659_v5 = vmul.f32 %v8621_v60, %v3370_v52 }
 0x210   : > { %6239 = vmatmul.mubr.bf16.gmra.mrb[52].mxu0 %v1622_v17  ;;  %v6544_v17 = vpop.eup %6543  ;;  %6563 = vpow2.f32 %v4675_v11  ;;  %v8669_v57 = vmul.f32 %v8621_v60, %v8609_v25 }
 0x211   : > { %6242 = vmatprep.mubr.bf16.mxu0 %v1623_v55  ;;  %v6546_v35 = vpop.eup %6545  ;;  %11244 = vst [vmem:[#allocation47_spill] sm:$0xff] %v8626_v53  ;;  %11247 = vst [vmem:[#allocation50_spill] sm:$0xff] %v8641_v16 }
 0x212   : > { %v6548_v39 = vpop.eup %6547  ;;  %v8638_v30 = vrot.slane %v6546_v35, %v7926_v13 }
 0x213   : > { %v6550_v50 = vpop.eup %6549  ;;  %v8635_v29 = vrot.slane %v6548_v39, %v7926_v13 }
 0x214   : > { %v6552_v55 = vpop.eup %6551  ;;  %v8648_v18 = vrot.slane %v6550_v50, %v7926_v13 }
 0x215   : > { %v6554_v62 = vpop.eup %6553  ;;  %11246 = vst [vmem:[#allocation49_spill] sm:$0xff] %v8635_v29  ;;  %v8651_v45 = vrot.slane %v6552_v55, %v7926_v13  ;;  %v8662_v49 = vmul.f32 0.0, %v8635_v29  ;;  %v8681_v36 = vmul.f32 %v8621_v60, %v8635_v29  ;;  %v4681_v55 = vmul.f32 1.442695, %v4630_v51 }
 0x216   : > { %v6556_v26 = vpop.eup %6555  ;;  %11248 = vst [vmem:[#allocation51_spill] sm:$0xff] %v8648_v18  ;;  %v4342_v31 = vrot.slane %v6554_v62, %v7926_v13  ;;  %v8674_v41 = vmul.f32 0.0, %v8648_v18 }
 0x217   : > { %v6558_v22 = vpop.eup %6557  ;;  %11249 = vst [vmem:[#allocation52_spill] sm:$0xff] %v8651_v45  ;;  %11250 = vst [vmem:[#allocation53_spill] sm:$0xff] %v8662_v49  ;;  %v8665_v33 = vrot.slane %v6556_v26, %v7926_v13  ;;  %v8677_v47 = vmul.f32 0.0, %v8651_v45 }
 0x218   : > { %6243 = vmatmul.mubr.bf16.gmra.mrb[56].mxu0 %v1624_v59  ;;  %v8618_v59 = vrot.slane %v6544_v17, %v7926_v13  ;;  %v6560_v43 = vpop.eup %6559  ;;  %v4354_v27 = vrot.slane %v6558_v22, %v7926_v13  ;;  %11252 = vst [vmem:[#allocation55_spill] sm:$0xff] %v8674_v41  ;;  %v8690_v15 = vmul.f32 0.0, %v4342_v31  ;;  %v8693_v40 = vmul.f32 %v8632_v19, %v4342_v31 }
 0x219   : > { %6246 = vmatprep.mubr.bf16.mxu0 %v1625_v14  ;;  %11251 = vst [vmem:[#allocation54_spill] sm:$0xff] %v8665_v33  ;;  %v6562_v44 = vpop.eup %6561  ;;  %11253 = vst [vmem:[#allocation56_spill] sm:$0xff] %v8677_v47  ;;  %v4358_v38 = vrot.slane %v6560_v43, %v7926_v13  ;;  %v8697_v46 = vmul.f32 0.0, %v8665_v33  ;;  %v8700_v21 = vmul.f32 %v8621_v60, %v4342_v31 }
 0x21a   : > { %v8684_v20 = vmul.f32 0.0, %v8618_v59  ;;  %v6564_v56 = vpop.eup %6563  ;;  %v8688_v63 = vmul.f32 %v8621_v60, %v8618_v59  ;;  %11255 = vst [vmem:[#allocation58_spill] sm:$0xff] %v8690_v15  ;;  %11256 = vst [vmem:[#allocation59_spill] sm:$0xff] %v8693_v40  ;;  %v8703_v17 = vrot.slane %v6562_v44, %v7926_v13  ;;  %v8707_v52 = vmul.f32 %v8632_v19, %v8665_v33 }
 0x21b   : > { %11257 = vst [vmem:[#allocation60_spill] sm:$0xff] %v8697_v46  ;;  %11258 = vst [vmem:[#allocation61_spill] sm:$0xff] %v8700_v21  ;;  %v8709_v39 = vmul.f32 0.0, %v4354_v27  ;;  %v8712_v50 = vmul.f32 %v8632_v19, %v4354_v27  ;;  %v8725_v22 = vmul.f32 %v8632_v19, %v8638_v30  ;;  %v8733_v43 = vmul.f32 %v8632_v19, %v4358_v38 }
 0x21c   : > { %11254 = vst [vmem:[#allocation57_spill] sm:$0xff] %v8684_v20  ;;  %11259 = vst [vmem:[#allocation62_spill] sm:$0xff] %v8703_v17  ;;  %v8730_v31 = vmul.f32 0.0, %v8703_v17  ;;  %v8736_v44 = vmul.f32 %v8621_v60, %v4358_v38 }
 0x21d   : > { %11260 = vst [vmem:[#allocation63_spill] sm:$0xff] %v8707_v52  ;;  %11261 = vst [vmem:[#allocation64_spill] sm:$0xff] %v8709_v39 }
 0x21e   : > { %11262 = vst [vmem:[#allocation65_spill] sm:$0xff] %v8712_v50  ;;  %11266 = vst [vmem:[#allocation69_spill] sm:$0xff] %v8725_v22 }
 0x21f   : > { %11268 = vst [vmem:[#allocation71_spill] sm:$0xff] %v8730_v31  ;;  %11269 = vst [vmem:[#allocation72_spill] sm:$0xff] %v8733_v43 }
 0x220   : > { %6247 = vmatmul.mubr.bf16.gmra.mrb[60].mxu0 %v1626_v12  ;;  %v8629_v12 = vmul.f32 0.0, %v8609_v25  ;;  %11270 = vst [vmem:[#allocation73_spill] sm:$0xff] %v8736_v44 }
 0x222   : > { %11245 = vst [vmem:[#allocation48_spill] sm:$0xff] %v8629_v12 }
 0x27b   : > { %v6124_v6 = vpop.f32.mrb[0].mxu0 }
 0x27c   : > { %v1862_v9 = vmul.f32 1.442695, %v6124_v6  ;;  %v1023_v14 = vpop.f32.mrb[1].mxu0 }
 0x27d   : > { %v1858_v24 = vmul.f32 1.442695, %v1023_v14  ;;  %v6125_v42 = vpop.f32.mrb[2].mxu0  ;;  %v6172_v61 = vpop.f32.mrb[0].mxu1  ;;  %v4808_v14 = vrot.slane %v6564_v56, %v7926_v13 }
 0x27e   : > { %6565 = vpow2.f32 %v1862_v9  ;;  %v1864_v10 = vmul.f32 1.442695, %v6125_v42  ;;  %v1026_v1 = vpop.f32.mrb[3].mxu0  ;;  %v1374_v37 = vpop.f32.mrb[1].mxu1  ;;  %v8715_v9 = vmul.f32 %v8621_v60, %v4354_v27  ;;  %v8721_v42 = vmul.f32 0.0, %v8638_v30 }
 0x27f   : > { %6567 = vpow2.f32 %v1858_v24  ;;  %v1860_v2 = vmul.f32 1.442695, %v1026_v1  ;;  %v6173_v8 = vpop.f32.mrb[2].mxu1  ;;  %v8718_v24 = vmul.f32 0.0, %v4358_v38 }
 0x280   : > { %6569 = vpow2.f32 %v1864_v10  ;;  %v1377_v3 = vpop.f32.mrb[3].mxu1  ;;  %11263 = vst [vmem:[#allocation66_spill] sm:$0xff] %v8715_v9  ;;  %11265 = vst [vmem:[#allocation68_spill] sm:$0xff] %v8721_v42  ;;  %v6526_v9 = vld [vmem:[#allocation16 + $0x18] sm:$0xff]  }
 0x281   : > { %6571 = vpow2.f32 %v1860_v2  ;;  %11264 = vst [vmem:[#allocation67_spill] sm:$0xff] %v8718_v24  ;;  %6256 = vmatprep.subr.bf16.mxu1 %v6526_v9 }
 0x282   : > { %6257 = vmatpush3.bf16.msra.mxu1 %v6526_v9 }
 0x283   : > { %v6128_v48 = vpop.f32.mrb[4].mxu0 }
 0x284   : > { %v1870_v54 = vmul.f32 1.442695, %v6128_v48  ;;  %v1039_v11 = vpop.f32.mrb[5].mxu0  ;;  %v8745_v48 = vmul.f32 %v8632_v19, %v8703_v17 }
 0x285   : > { %v6129_v35 = vpop.f32.mrb[6].mxu0  ;;  %v1866_v6 = vmul.f32 1.442695, %v1039_v11  ;;  %v6176_v2 = vpop.f32.mrb[4].mxu1 }
 0x286   : > { %6573 = vpow2.f32 %v1870_v54  ;;  %v1042_v62 = vpop.f32.mrb[7].mxu0  ;;  %v1872_v26 = vmul.f32 1.442695, %v6129_v35  ;;  %v8741_v56 = vpop.f32.mrb[5].mxu1  ;;  %11272 = vst [vmem:[#allocation75_spill] sm:$0xff] %v8745_v48  ;;  %v8749_v54 = vmul.f32 %v8621_v60, %v8638_v30 }
 0x287   : > { %v1868_v1 = vmul.f32 1.442695, %v1042_v62  ;;  %6575 = vpow2.f32 %v4681_v55  ;;  %v8754_v35 = vpop.f32.mrb[6].mxu1  ;;  %v4631_v62 = vmul.f32 -21.0, %v8584_v32 }
 0x288   : > { %v8727_v10 = vpop.eup %6565  ;;  %11273 = vst [vmem:[#allocation76_spill] sm:$0xff] %v8749_v54  ;;  %6577 = vpow2.f32 %v1866_v6  ;;  %v8764_v18 = vpop.f32.mrb[7].mxu1  ;;  %v8767_v6 = vmul.f32 %v4808_v14, %v8621_v60 }
 0x289   : > { %11267 = vst [vmem:[#allocation70_spill] sm:$0xff] %v8727_v10  ;;  %v8738_v27 = vpop.eup %6567  ;;  %v1924_v51 = vmul.f32 %v8727_v10, %v6172_v61  ;;  %v8757_v61 = vmul.f32 %v4808_v14, %v8632_v19  ;;  %6579 = vpow2.f32 %v1872_v26  ;;  %v8773_v16 = vmul.f32 %v8727_v10, %v8602_v4 }
 0x28a   : > { %11271 = vst [vmem:[#allocation74_spill] sm:$0xff] %v8738_v27  ;;  %v8751_v11 = vpop.eup %6569  ;;  %v1922_v38 = vmul.f32 %v8738_v27, %v1374_v37  ;;  %11277 = vst [vmem:[#allocation80_spill] sm:$0xff] %v8767_v6  ;;  %6581 = vpow2.f32 %v1868_v1  ;;  %v8782_v14 = vadd.f32 %v8738_v27, %v8615_v7  ;;  %v8786_v54 = vmul.f32 1.442695, %v4631_v62 }
 0x28b   : > { %11274 = vst [vmem:[#allocation77_spill] sm:$0xff] %v8751_v11  ;;  %11275 = vst [vmem:[#allocation78_spill] sm:$0xff] %v8757_v61  ;;  %v8760_v33 = vpop.eup %6571  ;;  %v2628_v17 = vmul.f32 %v8602_v4, %v1924_v51  ;;  %v1925_v45 = vmul.f32 %v8751_v11, %v6173_v8  ;;  %v6132_v55 = vpop.f32.mrb[8].mxu0  ;;  %v8778_v61 = vmul.f32 %v8738_v27, %v8602_v4 }
 0x28c   : > { %11276 = vst [vmem:[#allocation79_spill] sm:$0xff] %v8760_v33  ;;  %v2626_v37 = vmul.f32 %v8602_v4, %v1922_v38  ;;  %v2657_v19 = vadd.f32 %v8615_v7, %v1922_v38  ;;  %v1055_v29 = vpop.f32.mrb[9].mxu0  ;;  %11278 = vst [vmem:[#allocation81_spill] sm:$0xff] %v8773_v16  ;;  %v1923_v32 = vmul.f32 %v8760_v33, %v1377_v3  ;;  %v1878_v22 = vmul.f32 1.442695, %v6132_v55 }
 0x28d   : > { %v2660_v26 = vadd.f32 %v2628_v17, %v1925_v45  ;;  %v6133_v8 = vpop.f32.mrb[10].mxu0  ;;  %11279 = vst [vmem:[#allocation82_spill] sm:$0xff] %v8782_v14  ;;  %v5099_v13 = vmul.f32 %v8612_v58, %v1922_v38  ;;  %11280 = vst [vmem:[#allocation83_spill] sm:$0xff] %v8786_v54  ;;  %v8789_v17 = vmul.f32 %v8612_v58, %v1924_v51  ;;  %v1874_v62 = vmul.f32 1.442695, %v1055_v29  ;;  %v8803_v54 = vpop.f32.mrb[8].mxu1 }
 0x28e   : > { %v3135_v1 = vadd.f32 %v2657_v19, %v8615_v7  ;;  %v1058_v6 = vpop.f32.mrb[11].mxu0  ;;  %v2627_v3 = vmul.f32 %v8602_v4, %v1923_v32  ;;  %v2658_v48 = vadd.f32 %v2626_v37, %v1923_v32  ;;  %v8794_v42 = vmul.f32 %v8751_v11, %v8602_v4  ;;  %v8808_v50 = vpop.f32.mrb[9].mxu1 }
 0x28f   : > { %v2629_v38 = vmul.f32 %v8602_v4, %v1925_v45  ;;  %v8801_v55 = vmul.f32 %v8612_v58, %v1925_v45  ;;  %v3105_v31 = vmul.f32 %v8605_v0, %v2657_v19  ;;  %v8814_v39 = vadd.f32 %v5099_v13, %v8621_v60  ;;  %v8819_v45 = vpop.f32.mrb[10].mxu1 }
 0x290   : > { %11281 = vst [vmem:[#allocation84_spill] sm:$0xff] %v8794_v42  ;;  %v8796_v27 = vpop.eup %6573  ;;  %v3611_v43 = vadd.f32 %v3135_v1, %v8615_v7  ;;  %v2659_v44 = vadd.f32 %v2627_v3, %v1924_v51  ;;  %v3106_v37 = vmul.f32 %v8605_v0, %v2658_v48  ;;  %v3136_v24 = vadd.f32 %v8624_v23, %v2658_v48  ;;  %v8826_v21 = vpop.f32.mrb[11].mxu1 }
 0x291   : > { %11282 = vst [vmem:[#allocation85_spill] sm:$0xff] %v8796_v27  ;;  %11283 = vst [vmem:[#allocation86_spill] sm:$0xff] %v8801_v55  ;;  %6583 = vpow2.f32 %v1878_v22  ;;  %v8817_v29 = vmul.f32 %v8796_v27, %v6176_v2  ;;  %v8821_v51 = vpop.eup %6575  ;;  %v1880_v55 = vmul.f32 1.442695, %v6133_v8  ;;  %v8831_v60 = vmul.f32 %v8605_v0, %v2660_v26 }
 0x292   : > { %v8811_v52 = vadd.f32 %v3611_v43, %v8615_v7  ;;  %11285 = vst [vmem:[#allocation88_spill] sm:$0xff] %v8814_v39  ;;  %11286 = vst [vmem:[#allocation89_spill] sm:$0xff] %v8821_v51  ;;  %v3137_v19 = vadd.f32 %v3105_v31, %v2659_v44  ;;  %v3138_v3 = vadd.f32 %v3106_v37, %v2660_v26  ;;  %v8828_v13 = vpop.eup %6577  ;;  %6585 = vpow2.f32 %v1874_v62 }
 0x293   : > { %v3612_v48 = vadd.f32 %v3136_v24, %v8624_v23  ;;  %v8824_v40 = vpop.f32.mrb[12].mxu0  ;;  %11287 = vst [vmem:[#allocation90_spill] sm:$0xff] %v8828_v13  ;;  %v5100_v2 = vmul.f32 %v8612_v58, %v1923_v32  ;;  %v8838_v8 = vpop.eup %6579  ;;  %v3583_v37 = vmul.f32 %v8609_v25, %v3135_v1  ;;  %v8842_v39 = vmul.f32 %v8618_v59, %v3611_v43 }
 0x294   : > { %11284 = vst [vmem:[#allocation87_spill] sm:$0xff] %v8811_v52  ;;  %v4547_v22 = vadd.f32 %v8811_v52, %v8615_v7  ;;  %v8836_v31 = vpop.f32.mrb[13].mxu0  ;;  %11288 = vst [vmem:[#allocation91_spill] sm:$0xff] %v8838_v8  ;;  %v3613_v51 = vadd.f32 %v8626_v53, %v3137_v19  ;;  %v1876_v26 = vmul.f32 1.442695, %v1058_v6  ;;  %v8847_v15 = vpop.eup %6581  ;;  %v8850_v32 = vmul.f32 %v8609_v25, %v3136_v24 }
 0x295   : > { %v8845_v46 = vpop.f32.mrb[14].mxu0  ;;  %11289 = vst [vmem:[#allocation92_spill] sm:$0xff] %v8847_v15  ;;  %v3614_v62 = vadd.f32 %v8629_v12, %v3138_v3  ;;  %v4084_v9 = vadd.f32 %v3612_v48, %v8624_v23  ;;  %6587 = vpow2.f32 %v1880_v55  ;;  %v2632_v6 = vmul.f32 %v8602_v4, %v8817_v29 }
 0x296   : > { %v4997_v52 = vadd.f32 %v8645_v28, %v4547_v22  ;;  %v8855_v1 = vpop.f32.mrb[15].mxu0  ;;  %v4085_v43 = vadd.f32 %v3613_v51, %v8626_v53  ;;  %v1926_v7 = vmul.f32 %v8828_v13, %v8741_v56  ;;  %v8863_v24 = vmul.f32 %v8609_v25, %v3137_v19  ;;  %v8872_v22 = vpop.f32.mrb[12].mxu1 }
 0x297   : > { %v4548_v14 = vadd.f32 %v4084_v9, %v8624_v23  ;;  %v8870_v28 = vmul.f32 %v8612_v58, %v8817_v29  ;;  %11292 = vst [vmem:[#allocation95_spill] sm:$0xff] %v8872_v22  ;;  %v8875_v55 = vmul.f32 %v8609_v25, %v3138_v3  ;;  %v8878_v11 = vmul.f32 %v8618_v59, %v3612_v48  ;;  %v8881_v16 = vpop.f32.mrb[13].mxu1 }
 0x298   : > { %v8866_v42 = vadd.f32 %v5100_v2, %v4997_v52  ;;  %v2661_v56 = vadd.f32 %v2629_v38, %v1926_v7  ;;  %v3107_v19 = vmul.f32 %v8605_v0, %v2659_v44  ;;  %11293 = vst [vmem:[#allocation96_spill] sm:$0xff] %v8881_v16  ;;  %v4549_v52 = vadd.f32 %v4085_v43, %v8626_v53  ;;  %v8890_v3 = vpop.f32.mrb[14].mxu1 }
 0x299   : > { %11291 = vst [vmem:[#allocation94_spill] sm:$0xff] %v8870_v28  ;;  %v4998_v2 = vadd.f32 %v8655_v34, %v4548_v14  ;;  %v1929_v28 = vmul.f32 %v8838_v8, %v8754_v35  ;;  %11295 = vst [vmem:[#allocation98_spill] sm:$0xff] %v8890_v3  ;;  %v8893_v48 = vmul.f32 %v8618_v59, %v3613_v51  ;;  %6589 = vpow2.f32 %v1876_v26  ;;  %v8900_v22 = vpop.f32.mrb[15].mxu1 }
 0x29a   : > { %11290 = vst [vmem:[#allocation93_spill] sm:$0xff] %v8866_v42  ;;  %v8886_v42 = vadd.f32 %v3614_v62, %v8629_v12  ;;  %v8896_v38 = vmul.f32 %v8618_v59, %v3614_v62  ;;  %v3139_v44 = vadd.f32 %v3107_v19, %v2661_v56  ;;  %11298 = vst [vmem:[#allocation101_spill] sm:$0xff] %v8900_v22 }
 0x29b   : > { %11296 = vst [vmem:[#allocation99_spill] sm:$0xff] %v8893_v48  ;;  %v8898_v16 = vpop.f32.mrb[16].mxu0  ;;  %v8902_v34 = vpop.eup %6583  ;;  %v8905_v14 = vadd.f32 %v8789_v17, %v4998_v2  ;;  %v2630_v35 = vmul.f32 %v8602_v4, %v1926_v7  ;;  %v2664_v3 = vadd.f32 %v2632_v6, %v1929_v28  ;;  %v8913_v26 = vmul.f32 %v8638_v30, %v4084_v9 }
 0x29c   : > { %11294 = vst [vmem:[#allocation97_spill] sm:$0xff] %v8886_v42  ;;  %11297 = vst [vmem:[#allocation100_spill] sm:$0xff] %v8896_v38  ;;  %v4550_v51 = vadd.f32 %v8886_v42, %v8629_v12  ;;  %v8910_v48 = vpop.f32.mrb[17].mxu0  ;;  %v8916_v62 = vmul.f32 %v8638_v30, %v4085_v43  ;;  %v3615_v19 = vadd.f32 %v3583_v37, %v3139_v44  ;;  %v8921_v17 = vpop.eup %6585 }
 0x29d   : > { %11299 = vst [vmem:[#allocation102_spill] sm:$0xff] %v8902_v34  ;;  %11300 = vst [vmem:[#allocation103_spill] sm:$0xff] %v8905_v14  ;;  %v5103_v22 = vmul.f32 %v8612_v58, %v1926_v7  ;;  %v8919_v38 = vpop.f32.mrb[18].mxu0  ;;  %v8924_v2 = vadd.f32 %v8659_v5, %v4549_v52  ;;  %v3109_v6 = vmul.f32 %v8605_v0, %v2661_v56 }
 0x29e   : > { %11301 = vst [vmem:[#allocation104_spill] sm:$0xff] %v8913_v26  ;;  %11302 = vst [vmem:[#allocation105_spill] sm:$0xff] %v8916_v62  ;;  %v5000_v14 = vadd.f32 %v8669_v57, %v4550_v51  ;;  %v1927_v9 = vmul.f32 %v8847_v15, %v8764_v18  ;;  %v8930_v42 = vpop.f32.mrb[19].mxu0  ;;  %v3587_v37 = vmul.f32 %v8609_v25, %v3139_v44  ;;  %v1886_v62 = vmul.f32 1.442695, %v8824_v40  ;;  %v8944_v18 = vpop.f32.mrb[16].mxu1 }
 0x29f   : > { %11303 = vst [vmem:[#allocation106_spill] sm:$0xff] %v8921_v17  ;;  %11304 = vst [vmem:[#allocation107_spill] sm:$0xff] %v8924_v2  ;;  %v8934_v7 = vadd.f32 %v8662_v49, %v3615_v19  ;;  %v2633_v43 = vmul.f32 %v8602_v4, %v1929_v28  ;;  %v8941_v56 = vmul.f32 %v8612_v58, %v1929_v28  ;;  %v8946_v51 = vpop.eup %6587  ;;  %v1882_v2 = vmul.f32 1.442695, %v8836_v31 }
 0x2a0   : > { %v8938_v5 = vadd.f32 %v5103_v22, %v5000_v14  ;;  %v2631_v57 = vmul.f32 %v8602_v4, %v1927_v9  ;;  %v2662_v52 = vadd.f32 %v2630_v35, %v1927_v9  ;;  %11308 = vst [vmem:[#allocation111_spill] sm:$0xff] %v8944_v18  ;;  %11309 = vst [vmem:[#allocation112_spill] sm:$0xff] %v8946_v51  ;;  %v8957_v22 = vpop.f32.mrb[17].mxu1  ;;  %6591 = vpow2.f32 %v1886_v62 }
 0x2a1   : > { %11305 = vst [vmem:[#allocation108_spill] sm:$0xff] %v8934_v7  ;;  %11307 = vst [vmem:[#allocation110_spill] sm:$0xff] %v8941_v56  ;;  %v4551_v44 = vadd.f32 %v8934_v7, %v8662_v49  ;;  %v8953_v40 = vmul.f32 %v8902_v34, %v8803_v54  ;;  %v1930_v28 = vmul.f32 %v8921_v17, %v8808_v50  ;;  %v8963_v49 = vpop.f32.mrb[18].mxu1  ;;  %v1884_v7 = vmul.f32 1.442695, %v8855_v1 }
 0x2a2   : > { %11306 = vst [vmem:[#allocation109_spill] sm:$0xff] %v8938_v5  ;;  %11310 = vst [vmem:[#allocation113_spill] sm:$0xff] %v8957_v22  ;;  %v2663_v14 = vadd.f32 %v2631_v57, %v8817_v29  ;;  %v3110_v35 = vmul.f32 %v8605_v0, %v2662_v52  ;;  %v3140_v56 = vadd.f32 %v8831_v60, %v2662_v52  ;;  %v1888_v5 = vmul.f32 1.442695, %v8845_v46  ;;  %v8970_v26 = vpop.f32.mrb[19].mxu1 }
 0x2a3   : > { %11311 = vst [vmem:[#allocation114_spill] sm:$0xff] %v8963_v49  ;;  %v5001_v31 = vadd.f32 %v8681_v36, %v4551_v44  ;;  %v5104_v54 = vmul.f32 %v8612_v58, %v1927_v9  ;;  %v8968_v50 = vpop.f32.mrb[20].mxu0  ;;  %11312 = vst [vmem:[#allocation115_spill] sm:$0xff] %v8970_v26  ;;  %v8973_v29 = vmul.f32 %v8605_v0, %v2664_v3  ;;  %v8978_v62 = vpop.eup %6589  ;;  %6593 = vpow2.f32 %v1882_v2 }
 0x2a4   : > { %v3141_v57 = vadd.f32 %v3109_v6, %v2663_v14  ;;  %v3142_v60 = vadd.f32 %v3110_v35, %v2664_v3  ;;  %v3616_v46 = vadd.f32 %v8850_v32, %v3140_v56  ;;  %v8976_v52 = vpop.f32.mrb[21].mxu0  ;;  %11314 = vst [vmem:[#allocation117_spill] sm:$0xff] %v8978_v62  ;;  %v2665_v9 = vadd.f32 %v2633_v43, %v1930_v28 }
 0x2a5   : > { %11313 = vst [vmem:[#allocation116_spill] sm:$0xff] %v8976_v52  ;;  %v8980_v36 = vadd.f32 %v5104_v54, %v5001_v31  ;;  %v3111_v1 = vmul.f32 %v8605_v0, %v2663_v14  ;;  %v8983_v44 = vpop.f32.mrb[22].mxu0  ;;  %v8986_v26 = vmul.f32 %v8618_v59, %v3615_v19  ;;  %6595 = vpow2.f32 %v1888_v5  ;;  %v9006_v5 = vpop.f32.mrb[20].mxu1 }
 0x2a6   : > { %11316 = vst [vmem:[#allocation119_spill] sm:$0xff] %v8983_v44  ;;  %v3617_v6 = vadd.f32 %v8863_v24, %v3141_v57  ;;  %v3618_v3 = vadd.f32 %v8875_v55, %v3142_v60  ;;  %v8990_v32 = vpop.f32.mrb[23].mxu0  ;;  %6597 = vpow2.f32 %v1884_v7  ;;  %v2636_v35 = vmul.f32 %v8602_v4, %v8953_v40  ;;  %11320 = vst [vmem:[#allocation123_spill] sm:$0xff] %v9006_v5 }
 0x2a7   : > { %11315 = vst [vmem:[#allocation118_spill] sm:$0xff] %v8980_v36  ;;  %11317 = vst [vmem:[#allocation120_spill] sm:$0xff] %v8990_v32  ;;  %v8996_v2 = vmul.f32 %v8612_v58, %v8953_v40  ;;  %v3143_v43 = vadd.f32 %v3111_v1, %v2665_v9  ;;  %v8999_v14 = vmul.f32 %v8609_v25, %v3140_v56  ;;  %v9019_v1 = vpop.f32.mrb[21].mxu1 }
 0x2a8   : > { %v4088_v19 = vadd.f32 %v8674_v41, %v3616_v46  ;;  %v2634_v24 = vmul.f32 %v8602_v4, %v1930_v28  ;;  %v9004_v55 = vadd.f32 %v8684_v20, %v3618_v3  ;;  %v9009_v7 = vmul.f32 %v8609_v25, %v3141_v57  ;;  %11322 = vst [vmem:[#allocation125_spill] sm:$0xff] %v9019_v1  ;;  %v9033_v5 = vpop.f32.mrb[22].mxu1 }
 0x2a9   : > { %11318 = vst [vmem:[#allocation121_spill] sm:$0xff] %v8996_v2  ;;  %v9012_v31 = vmul.f32 %v8609_v25, %v3142_v60  ;;  %v9015_v54 = vmul.f32 %v8618_v59, %v3616_v46  ;;  %v9017_v56 = vadd.f32 %v3587_v37, %v3143_v43  ;;  %v9022_v2 = vmul.f32 %v8618_v59, %v3617_v6 }
 0x2aa   : > { %11319 = vst [vmem:[#allocation122_spill] sm:$0xff] %v9004_v55  ;;  %v9025_v36 = vmul.f32 %v8605_v0, %v2665_v9  ;;  %v4554_v57 = vadd.f32 %v9004_v55, %v8684_v20  ;;  %v9031_v60 = vmul.f32 %v8946_v51, %v8819_v45  ;;  %11324 = vst [vmem:[#allocation127_spill] sm:$0xff] %v9033_v5  ;;  %v9051_v45 = vpop.f32.mrb[23].mxu1  ;;  %v9063_v5 = vpop.eup %6591 }
 0x2ab   : > { %11321 = vst [vmem:[#allocation124_spill] sm:$0xff] %v9015_v54  ;;  %11323 = vst [vmem:[#allocation126_spill] sm:$0xff] %v9022_v2  ;;  %v9036_v37 = vmul.f32 %v8618_v59, %v3618_v3  ;;  %v9039_v46 = vadd.f32 %v8677_v47, %v3617_v6  ;;  %v9043_v1 = vadd.f32 %v8842_v39, %v9017_v56  ;;  %v9049_v20 = vpop.f32.mrb[24].mxu0  ;;  %v6527_v54 = vld [vmem:[#allocation16 + $0x20] sm:$0xff]  }
 0x2ac   : > { %v9047_v9 = vmul.f32 %v8978_v62, %v8826_v21  ;;  %11328 = vst [vmem:[#allocation131_spill] sm:$0xff] %v9049_v20  ;;  %11329 = vst [vmem:[#allocation132_spill] sm:$0xff] %v9051_v45  ;;  %v9054_v55 = vmul.f32 %v8638_v30, %v4088_v19  ;;  %v5004_v3 = vadd.f32 %v8688_v63, %v4554_v57  ;;  %v9061_v39 = vpop.f32.mrb[25].mxu0  ;;  %6258 = vmatprep.subr.bf16.mxu1 %v6527_v54 }
 0x2ad   : > { %11325 = vst [vmem:[#allocation128_spill] sm:$0xff] %v9036_v37  ;;  %11326 = vst [vmem:[#allocation129_spill] sm:$0xff] %v9039_v46  ;;  %v5107_v6 = vmul.f32 %v8612_v58, %v1930_v28  ;;  %v9059_v47 = vadd.f32 %v2636_v35, %v9031_v60  ;;  %v9066_v21 = vadd.f32 %v4088_v19, %v8674_v41  ;;  %v9074_v28 = vpop.f32.mrb[26].mxu0  ;;  %v11341_v37 = vld [vmem:[#allocation84_spill] sm:$0xff]  ;;  %6259 = vmatpush3.bf16.msra.mxu1 %v6527_v54 }
 0x2ae   : > { %11327 = vst [vmem:[#allocation130_spill] sm:$0xff] %v9043_v1  ;;  %11330 = vst [vmem:[#allocation133_spill] sm:$0xff] %v9054_v55  ;;  %v2564_v45 = vmul.f32 %v8760_v33, %v8602_v4  ;;  %v2567_v55 = vmul.f32 %v8828_v13, %v8602_v4  ;;  %v2568_v63 = vmul.f32 %v8847_v15, %v8602_v4  ;;  %v9085_v41 = vpop.f32.mrb[27].mxu0 }
 0x2af   : > { %11331 = vst [vmem:[#allocation134_spill] sm:$0xff] %v9061_v39  ;;  %11332 = vst [vmem:[#allocation135_spill] sm:$0xff] %v9063_v5  ;;  %v9077_v35 = vmul.f32 %v8609_v25, %v3143_v43  ;;  %v9079_v57 = vadd.f32 %v5107_v6, %v5004_v3  ;;  %v2569_v19 = vmul.f32 %v8796_v27, %v8602_v4  ;;  %v9087_v39 = vpop.eup %6593  ;;  %v11338_v3 = vld [vmem:[#allocation81_spill] sm:$0xff] }
 0x2b0   : > { %11333 = vst [vmem:[#allocation136_spill] sm:$0xff] %v9066_v21  ;;  %11334 = vst [vmem:[#allocation137_spill] sm:$0xff] %v9074_v28  ;;  %v2570_v21 = vmul.f32 %v8838_v8, %v8602_v4  ;;  %v2571_v20 = vmul.f32 %v8921_v17, %v8602_v4  ;;  %v9093_v28 = vadd.f32 %v8760_v33, %v8778_v61  ;;  %v11339_v6 = vld [vmem:[#allocation77_spill] sm:$0xff]  ;;  %v9100_v49 = vpop.eup %6595  ;;  %v9111_v61 = vpop.f32.mrb[24].mxu1 }
 0x2b1   : > { %11335 = vst [vmem:[#allocation138_spill] sm:$0xff] %v9079_v57  ;;  %11336 = vst [vmem:[#allocation139_spill] sm:$0xff] %v9085_v41  ;;  %v2596_v43 = vadd.f32 %v8727_v10, %v2564_v45  ;;  %v9098_v57 = vadd.f32 %v11339_v6, %v11338_v3  ;;  %v2598_v41 = vadd.f32 %v8828_v13, %v11341_v37  ;;  %v9113_v45 = vpop.eup %6597 }
 0x2b2   : > { %11337 = vst [vmem:[#allocation140_spill] sm:$0xff] %v9087_v39  ;;  %11340 = vst [vmem:[#allocation81_spill] sm:$0xff] %v9100_v49  ;;  %v9105_v32 = vadd.f32 %v8847_v15, %v2567_v55  ;;  %v2600_v44 = vadd.f32 %v8796_v27, %v2568_v63  ;;  %v9109_v22 = vadd.f32 %v8838_v8, %v2569_v19  ;;  %v9122_v15 = vpop.f32.mrb[25].mxu1  ;;  %v1894_v63 = vmul.f32 1.442695, %v8898_v16  ;;  %v11345_v19 = vld [vmem:[#allocation82_spill] sm:$0xff] }
 0x2b3   : > { %11342 = vst [vmem:[#allocation84_spill] sm:$0xff] %v9111_v61  ;;  %11343 = vst [vmem:[#allocation141_spill] sm:$0xff] %v9113_v45  ;;  %v2602_v3 = vadd.f32 %v8921_v17, %v2570_v21  ;;  %v9117_v6 = vadd.f32 %v8978_v62, %v2571_v20  ;;  %v2635_v37 = vmul.f32 %v8602_v4, %v9047_v9  ;;  %v9130_v17 = vpop.f32.mrb[26].mxu1  ;;  %v9139_v10 = vpop.f32.mrb[28].mxu0 }
 0x2b4   : > { %v2666_v55 = vadd.f32 %v2634_v24, %v9047_v9  ;;  %11344 = vst [vmem:[#allocation142_spill] sm:$0xff] %v9122_v15  ;;  %v3043_v8 = vmul.f32 %v8605_v0, %v11345_v19  ;;  %v3045_v27 = vmul.f32 %v8605_v0, %v2596_v43  ;;  %v3046_v21 = vmul.f32 %v8605_v0, %v9098_v57  ;;  %v9141_v33 = vpop.f32.mrb[27].mxu1  ;;  %v11349_v15 = vld [vmem:[#allocation46_spill] sm:$0xff]  ;;  %v9155_v18 = vpop.f32.mrb[29].mxu0 }
 0x2b5   : > { %11346 = vst [vmem:[#allocation82_spill] sm:$0xff] %v9130_v17  ;;  %v9133_v20 = vadd.f32 %v2635_v37, %v8953_v40  ;;  %v3047_v13 = vmul.f32 %v8605_v0, %v2598_v41  ;;  %v3049_v24 = vmul.f32 %v8605_v0, %v2600_v44  ;;  %v3050_v16 = vmul.f32 %v8605_v0, %v9109_v22  ;;  %v9167_v2 = vpop.f32.mrb[30].mxu0 }
 0x2b6   : > { %11347 = vst [vmem:[#allocation143_spill] sm:$0xff] %v9139_v10  ;;  %11348 = vst [vmem:[#allocation144_spill] sm:$0xff] %v9141_v33  ;;  %v9145_v61 = vadd.f32 %v11345_v19, %v11349_v15  ;;  %v9149_v17 = vadd.f32 %v8624_v23, %v9093_v28  ;;  %v9151_v40 = vadd.f32 %v3043_v8, %v2596_v43  ;;  %6599 = vpow2.f32 %v1894_v63 }
 0x2b7   : > { %v9153_v37 = vadd.f32 %v3045_v27, %v2598_v41  ;;  %11351 = vst [vmem:[#allocation146_spill] sm:$0xff] %v9155_v18  ;;  %v9158_v52 = vadd.f32 %v3046_v21, %v9105_v32  ;;  %v9160_v10 = vadd.f32 %v3047_v13, %v2600_v44  ;;  %v9162_v33 = vadd.f32 %v3049_v24, %v2602_v3  ;;  %v9175_v13 = vpop.f32.mrb[31].mxu0 }
 0x2b8   : > { %11350 = vst [vmem:[#allocation145_spill] sm:$0xff] %v9151_v40  ;;  %v9165_v19 = vadd.f32 %v3050_v16, %v9117_v6  ;;  %11353 = vst [vmem:[#allocation148_spill] sm:$0xff] %v9167_v2  ;;  %v3114_v8 = vmul.f32 %v8605_v0, %v2666_v55  ;;  %v3144_v41 = vadd.f32 %v8973_v29, %v2666_v55 }
 0x2b9   : > { %11352 = vst [vmem:[#allocation147_spill] sm:$0xff] %v9160_v10  ;;  %v3145_v27 = vadd.f32 %v9025_v36, %v9133_v20  ;;  %v3527_v43 = vmul.f32 %v8609_v25, %v9153_v37  ;;  %11354 = vst [vmem:[#allocation149_spill] sm:$0xff] %v9175_v13  ;;  %v9179_v44 = vmul.f32 %v8638_v30, %v9039_v46  ;;  %v9197_v10 = vpop.f32.mrb[28].mxu1 }
 0x2ba   : > { %v3528_v21 = vmul.f32 %v8609_v25, %v9158_v52  ;;  %v9185_v24 = vadd.f32 %v9145_v61, %v11349_v15  ;;  %v3552_v29 = vadd.f32 %v9149_v17, %v8624_v23  ;;  %v9191_v36 = vmul.f32 %v8618_v59, %v9017_v56  ;;  %11356 = vst [vmem:[#allocation151_spill] sm:$0xff] %v9197_v10  ;;  %v9204_v18 = vpop.f32.mrb[29].mxu1 }
 0x2bb   : > { %11355 = vst [vmem:[#allocation150_spill] sm:$0xff] %v9179_v44  ;;  %v2637_v55 = vmul.f32 %v8602_v4, %v9031_v60  ;;  %v3146_v16 = vadd.f32 %v3114_v8, %v9059_v47  ;;  %v3559_v44 = vadd.f32 %v3527_v43, %v9162_v33  ;;  %v3620_v13 = vadd.f32 %v8999_v14, %v3144_v41  ;;  %v9212_v43 = vpop.f32.mrb[30].mxu1 }
 0x2bc   : > { %v3560_v46 = vadd.f32 %v3528_v21, %v9165_v19  ;;  %v3621_v2 = vadd.f32 %v9009_v7, %v3145_v27  ;;  %v4003_v56 = vmul.f32 %v8618_v59, %v9185_v24  ;;  %11357 = vst [vmem:[#allocation152_spill] sm:$0xff] %v9204_v18  ;;  %v9208_v15 = vmul.f32 %v8612_v58, %v9031_v60  ;;  %v9224_v60 = vpop.f32.mrb[32].mxu0  ;;  %v9226_v63 = vpop.f32.mrb[31].mxu1 }
 0x2bd   : > { %v3622_v8 = vadd.f32 %v9012_v31, %v3146_v16  ;;  %v4004_v54 = vmul.f32 %v8618_v59, %v3552_v29  ;;  %11359 = vst [vmem:[#allocation154_spill] sm:$0xff] %v9212_v43  ;;  %v9216_v14 = vmul.f32 %v8605_v0, %v9059_v47  ;;  %v9219_v7 = vmul.f32 %v8605_v0, %v2602_v3  ;;  %v9236_v3 = vpop.f32.mrb[33].mxu0 }
 0x2be   : > { %11358 = vst [vmem:[#allocation153_spill] sm:$0xff] %v9208_v15  ;;  %v9222_v21 = vadd.f32 %v3552_v29, %v8624_v23  ;;  %v4035_v18 = vadd.f32 %v4003_v56, %v3559_v44  ;;  %11362 = vst [vmem:[#allocation157_spill] sm:$0xff] %v9224_v60  ;;  %v9230_v31 = vadd.f32 %v8626_v53, %v9151_v40 }
 0x2bf   : > { %11360 = vst [vmem:[#allocation155_spill] sm:$0xff] %v9219_v7  ;;  %11363 = vst [vmem:[#allocation158_spill] sm:$0xff] %v9226_v63  ;;  %v9233_v15 = vmul.f32 %v8609_v25, %v3144_v41  ;;  %v4036_v47 = vadd.f32 %v4004_v54, %v3560_v46  ;;  %v4092_v43 = vadd.f32 %v8878_v11, %v3620_v13  ;;  %v11366_v63 = vld [vmem:[#allocation99_spill] sm:$0xff] }
 0x2c0   : > { %11361 = vst [vmem:[#allocation156_spill] sm:$0xff] %v9222_v21  ;;  %11364 = vst [vmem:[#allocation159_spill] sm:$0xff] %v9230_v31  ;;  %v9239_v29 = vmul.f32 %v8609_v25, %v3145_v27  ;;  %v9242_v56 = vmul.f32 %v8609_v25, %v3146_v16  ;;  %v9245_v7 = vmul.f32 %v8618_v59, %v3559_v44  ;;  %v9250_v31 = vpop.f32.mrb[34].mxu0  ;;  %v11370_v16 = vld [vmem:[#allocation58_spill] sm:$0xff] }
 0x2c1   : > { %11365 = vst [vmem:[#allocation160_spill] sm:$0xff] %v9236_v3  ;;  %v9248_v40 = vadd.f32 %v11366_v63, %v3621_v2  ;;  %11368 = vst [vmem:[#allocation161_spill] sm:$0xff] %v9250_v31  ;;  %v9253_v41 = vmul.f32 %v8618_v59, %v3560_v46  ;;  %v9256_v11 = vmul.f32 %v8618_v59, %v3620_v13  ;;  %v9263_v53 = vpop.f32.mrb[35].mxu0  ;;  %v11376_v31 = vld [vmem:[#allocation61_spill] sm:$0xff] }
 0x2c2   : > { %v9259_v27 = vmul.f32 %v8618_v59, %v3621_v2  ;;  %v4555_v54 = vadd.f32 %v11370_v16, %v9043_v1  ;;  %11371 = vst [vmem:[#allocation58_spill] sm:$0xff] %v9263_v53  ;;  %v9266_v44 = vmul.f32 %v8618_v59, %v3622_v8  ;;  %v9269_v63 = vmul.f32 %v8638_v30, %v4035_v18 }
 0x2c3   : > { %11367 = vst [vmem:[#allocation99_spill] sm:$0xff] %v9248_v40  ;;  %11369 = vst [vmem:[#allocation162_spill] sm:$0xff] %v9253_v41  ;;  %v9273_v46 = vadd.f32 %v9222_v21, %v8624_v23  ;;  %v4507_v13 = vadd.f32 %v11370_v16, %v4035_v18  ;;  %v9277_v2 = vmul.f32 %v8638_v30, %v4036_v47  ;;  %v11375_v41 = vld [vmem:[#allocation60_spill] sm:$0xff] }
 0x2c4   : > { %11372 = vst [vmem:[#allocation163_spill] sm:$0xff] %v9269_v63  ;;  %v4508_v10 = vadd.f32 %v11375_v41, %v4036_v47  ;;  %v5005_v3 = vadd.f32 %v11376_v31, %v4555_v54  ;;  %v5108_v53 = vmul.f32 %v8612_v58, %v9047_v9  ;;  %v9284_v60 = vmul.f32 %v8638_v30, %v4092_v43  ;;  %v11377_v63 = vld [vmem:[#allocation95_spill] sm:$0xff]  ;;  %v11378_v23 = vld [vmem:[#allocation96_spill] sm:$0xff] }
 0x2c5   : > { %11373 = vst [vmem:[#allocation164_spill] sm:$0xff] %v9273_v46  ;;  %11374 = vst [vmem:[#allocation165_spill] sm:$0xff] %v9277_v2  ;;  %v9288_v1 = vmul.f32 %v9063_v5, %v11377_v63  ;;  %v1934_v18 = vmul.f32 %v9087_v39, %v11378_v23  ;;  %v2573_v16 = vmul.f32 %v8902_v34, %v8602_v4  ;;  %v1890_v31 = vmul.f32 1.442695, %v8910_v48  ;;  %v11382_v23 = vld [vmem:[#allocation59_spill] sm:$0xff]  ;;  %v6528_v48 = vld [vmem:[#allocation16 + $0x28] sm:$0xff]  }
 0x2c6   : > { %v9294_v2 = vadd.f32 %v5108_v53, %v5005_v3  ;;  %v3044_v9 = vmul.f32 %v8605_v0, %v9093_v28  ;;  %v3048_v47 = vmul.f32 %v8605_v0, %v9105_v32  ;;  %v9303_v54 = vmul.f32 %v8638_v30, %v9248_v40  ;;  %v9312_v3 = vpop.f32.mrb[36].mxu0  ;;  %6260 = vmatprep.subr.bf16.mxu1 %v6528_v48 }
 0x2c7   : > { %v9306_v63 = vadd.f32 %v11375_v41, %v4092_v43  ;;  %v9309_v21 = vadd.f32 %v11382_v23, %v4507_v13  ;;  %v2605_v53 = vadd.f32 %v8946_v51, %v2573_v16  ;;  %11384 = vst [vmem:[#allocation59_spill] sm:$0xff] %v9312_v3  ;;  %v1896_v28 = vmul.f32 1.442695, %v8919_v38  ;;  %v9321_v41 = vpop.f32.mrb[37].mxu0  ;;  %6261 = vmatpush3.bf16.msra.mxu1 %v6528_v48 }
 0x2c8   : > { %11379 = vst [vmem:[#allocation60_spill] sm:$0xff] %v9294_v2  ;;  %11380 = vst [vmem:[#allocation61_spill] sm:$0xff] %v9303_v54  ;;  %v9314_v2 = vpop.eup %6599  ;;  %v2640_v32 = vmul.f32 %v8602_v4, %v9288_v1  ;;  %v2669_v40 = vadd.f32 %v2637_v55, %v1934_v18  ;;  %v3052_v43 = vmul.f32 %v8605_v0, %v9117_v6  ;;  %v11387_v54 = vld [vmem:[#allocation100_spill] sm:$0xff]  ;;  %6601 = vpow2.f32 %v1890_v31 }
 0x2c9   : > { %11381 = vst [vmem:[#allocation95_spill] sm:$0xff] %v9306_v63  ;;  %11383 = vst [vmem:[#allocation96_spill] sm:$0xff] %v9309_v21  ;;  %v9324_v13 = vadd.f32 %v3044_v9, %v9098_v57  ;;  %v9327_v16 = vadd.f32 %v3048_v47, %v9109_v22  ;;  %v3115_v23 = vmul.f32 %v8605_v0, %v9133_v20  ;;  %v9334_v63 = vpop.f32.mrb[38].mxu0  ;;  %v1892_v6 = vmul.f32 1.442695, %v8930_v42  ;;  %v11389_v21 = vld [vmem:[#allocation98_spill] sm:$0xff] }
 0x2ca   : > { %11385 = vst [vmem:[#allocation166_spill] sm:$0xff] %v9314_v2  ;;  %11386 = vst [vmem:[#allocation167_spill] sm:$0xff] %v9321_v41  ;;  %v9332_v38 = vadd.f32 %v11387_v54, %v3622_v8  ;;  %v9337_v55 = vadd.f32 %v3052_v43, %v2605_v53  ;;  %v1937_v57 = vmul.f32 %v9100_v49, %v11389_v21  ;;  %v9341_v9 = vpop.f32.mrb[39].mxu0  ;;  %v11391_v31 = vld [vmem:[#allocation64_spill] sm:$0xff]  ;;  %v6529_v42 = vld [vmem:[#allocation16 + $0x30] sm:$0xff]   ;;  %6603 = vpow2.f32 %v1896_v28 }
 0x2cb   : > { %11388 = vst [vmem:[#allocation100_spill] sm:$0xff] %v9334_v63  ;;  %11390 = vst [vmem:[#allocation98_spill] sm:$0xff] %v9341_v9  ;;  %v3147_v22 = vadd.f32 %v3115_v23, %v2669_v40  ;;  %v3530_v20 = vmul.f32 %v8609_v25, %v9327_v16  ;;  %v9347_v8 = vadd.f32 %v8629_v12, %v9324_v13  ;;  %v11392_v54 = vld [vmem:[#allocation63_spill] sm:$0xff]  ;;  %6262 = vmatprep.subr.bf16.mxu1 %v6529_v42  ;;  %v11395_v41 = vld [vmem:[#allocation66_spill] sm:$0xff]  ;;  %v9376_v3 = vpop.f32.mrb[40].mxu0 }
 0x2cc   : > { %v4558_v47 = vadd.f32 %v11391_v31, %v9332_v38  ;;  %v9352_v43 = vadd.f32 %v11392_v54, %v4508_v10  ;;  %v9356_v21 = vmul.f32 %v8612_v58, %v9288_v1  ;;  %v2672_v48 = vadd.f32 %v2640_v32, %v1937_v57  ;;  %v11396_v54 = vld [vmem:[#allocation101_spill] sm:$0xff]  ;;  %6263 = vmatpush3.bf16.msra.mxu1 %v6529_v42 }
 0x2cd   : > { %v2638_v23 = vmul.f32 %v8602_v4, %v1934_v18  ;;  %v3562_v46 = vadd.f32 %v3530_v20, %v9337_v55  ;;  %v3623_v9 = vadd.f32 %v9077_v35, %v3147_v22  ;;  %v4006_v63 = vmul.f32 %v8618_v59, %v9347_v8  ;;  %11398 = vst [vmem:[#allocation101_spill] sm:$0xff] %v9376_v3 }
 0x2ce   : > { %11393 = vst [vmem:[#allocation64_spill] sm:$0xff] %v9352_v43  ;;  %11394 = vst [vmem:[#allocation63_spill] sm:$0xff] %v9356_v21  ;;  %6605 = vpow2.f32 %v1892_v6  ;;  %v5008_v10 = vadd.f32 %v11395_v41, %v4558_v47  ;;  %v5111_v28 = vmul.f32 %v8612_v58, %v1934_v18  ;;  %v9367_v43 = vmul.f32 %v9113_v45, %v11396_v54  ;;  %v6530_v6 = vld [vmem:[#allocation16 + $0x38] sm:$0xff]  }
 0x2cf   : > { %v3117_v32 = vmul.f32 %v8605_v0, %v2669_v40  ;;  %v4038_v21 = vadd.f32 %v4006_v63, %v3562_v46  ;;  %v9371_v20 = vadd.f32 %v8986_v26, %v3623_v9  ;;  %v9374_v35 = vmul.f32 %v8602_v4, %v1937_v57  ;;  %v9386_v63 = vpop.f32.mrb[41].mxu0  ;;  %6264 = vmatprep.subr.bf16.mxu1 %v6530_v6 }
 0x2d0   : > { %v9378_v41 = vadd.f32 %v5111_v28, %v5008_v10  ;;  %v2572_v18 = vmul.f32 %v8978_v62, %v8602_v4  ;;  %v2574_v47 = vmul.f32 %v8946_v51, %v8602_v4  ;;  %v2575_v40 = vmul.f32 %v9087_v39, %v8602_v4  ;;  %11400 = vst [vmem:[#allocation169_spill] sm:$0xff] %v9386_v63  ;;  %v9395_v54 = vpop.f32.mrb[42].mxu0  ;;  %v11432_v63 = vld [vmem:[#allocation111_spill] sm:$0xff] }
 0x2d1   : > { %11397 = vst [vmem:[#allocation66_spill] sm:$0xff] %v9371_v20  ;;  %v9389_v26 = vmul.f32 %v8612_v58, %v1937_v57  ;;  %v1902_v42 = vmul.f32 1.442695, %v8968_v50  ;;  %v2639_v10 = vmul.f32 %v8602_v4, %v9367_v43  ;;  %v2670_v28 = vadd.f32 %v2638_v23, %v9367_v43  ;;  %11402 = vst [vmem:[#allocation171_spill] sm:$0xff] %v9395_v54 }
 0x2d2   : > { %11399 = vst [vmem:[#allocation168_spill] sm:$0xff] %v9378_v41  ;;  %v9398_v51 = vadd.f32 %v8902_v34, %v2572_v18  ;;  %v2606_v41 = vadd.f32 %v9087_v39, %v2574_v47  ;;  %v9402_v62 = vadd.f32 %v9113_v45, %v2575_v40  ;;  %v3054_v57 = vmul.f32 %v8605_v0, %v2605_v53  ;;  %v9415_v34 = vpop.eup %6601 }
 0x2d3   : > { %11401 = vst [vmem:[#allocation170_spill] sm:$0xff] %v9389_v26  ;;  %v9405_v26 = vpop.f32.mrb[43].mxu0  ;;  %6265 = vmatpush3.bf16.msra.mxu1 %v6530_v6  ;;  %v9408_v50 = vmul.f32 %v8609_v25, %v3147_v22  ;;  %v9411_v23 = vadd.f32 %v2639_v10, %v9288_v1  ;;  %v3118_v54 = vmul.f32 %v8605_v0, %v2670_v28  ;;  %11405 = vst [vmem:[#allocation174_spill] sm:$0xff] %v9415_v34 }
 0x2d4   : > { %11403 = vst [vmem:[#allocation172_spill] sm:$0xff] %v9398_v51  ;;  %11404 = vst [vmem:[#allocation173_spill] sm:$0xff] %v9405_v26  ;;  %v3148_v18 = vadd.f32 %v9216_v14, %v2670_v28  ;;  %v9418_v47 = vmul.f32 %v8605_v0, %v2672_v48  ;;  %v3053_v53 = vmul.f32 %v8605_v0, %v9398_v51  ;;  %v9429_v28 = vpop.eup %6603  ;;  %6607 = vpow2.f32 %v1902_v42 }
 0x2d5   : > { %v3086_v6 = vadd.f32 %v3054_v57, %v9402_v62  ;;  %v3523_v22 = vmul.f32 %v8609_v25, %v9145_v61  ;;  %v4510_v1 = vadd.f32 %v11391_v31, %v4038_v21  ;;  %v3149_v40 = vadd.f32 %v3117_v32, %v9411_v23  ;;  %11406 = vst [vmem:[#allocation175_spill] sm:$0xff] %v9429_v28 }
 0x2d6   : > { %v3150_v10 = vadd.f32 %v3118_v54, %v2672_v48  ;;  %v3524_v14 = vmul.f32 %v8609_v25, %v9149_v17  ;;  %v3085_v39 = vadd.f32 %v3053_v53, %v2606_v41  ;;  %v3531_v26 = vmul.f32 %v8609_v25, %v9162_v33  ;;  %v9447_v48 = vpop.f32.mrb[44].mxu0 }
 0x2d7   : > { %v3532_v57 = vmul.f32 %v8609_v25, %v9165_v19  ;;  %v9436_v51 = vadd.f32 %v3523_v22, %v9153_v37  ;;  %v9439_v61 = vmul.f32 %v8618_v59, %v3562_v46  ;;  %v9442_v31 = vmul.f32 %v8618_v59, %v3623_v9  ;;  %11408 = vst [vmem:[#allocation177_spill] sm:$0xff] %v9447_v48  ;;  %v9455_v46 = vpop.f32.mrb[45].mxu0 }
 0x2d8   : > { %v9445_v17 = vadd.f32 %v3524_v14, %v9158_v52  ;;  %v9449_v32 = vpop.eup %6605  ;;  %v9452_v33 = vmul.f32 %v8638_v30, %v4038_v21  ;;  %v3563_v19 = vadd.f32 %v3531_v26, %v3085_v39  ;;  %v3624_v54 = vadd.f32 %v9233_v15, %v3148_v18  ;;  %11411 = vst [vmem:[#allocation180_spill] sm:$0xff] %v9455_v46  ;;  %v9463_v22 = vpop.f32.mrb[46].mxu0  ;;  %v11413_v21 = vld [vmem:[#allocation65_spill] sm:$0xff] }
 0x2d9   : > { %11409 = vst [vmem:[#allocation178_spill] sm:$0xff] %v9449_v32  ;;  %v3564_v37 = vadd.f32 %v3532_v57, %v3086_v6  ;;  %v3625_v9 = vadd.f32 %v9239_v29, %v3149_v40  ;;  %v3626_v42 = vadd.f32 %v9242_v56, %v3150_v10  ;;  %v4007_v52 = vmul.f32 %v8618_v59, %v9436_v51  ;;  %v11417_v29 = vld [vmem:[#allocation124_spill] sm:$0xff]  ;;  %v9475_v56 = vpop.f32.mrb[47].mxu0 }
 0x2da   : > { %11407 = vst [vmem:[#allocation176_spill] sm:$0xff] %v9445_v17  ;;  %11410 = vst [vmem:[#allocation179_spill] sm:$0xff] %v9452_v33  ;;  %v4008_v53 = vmul.f32 %v8618_v59, %v9445_v17  ;;  %v9466_v14 = vadd.f32 %v11413_v21, %v4510_v1  ;;  %v9469_v26 = vmul.f32 %v8605_v0, %v2606_v41 }
 0x2db   : > { %11412 = vst [vmem:[#allocation181_spill] sm:$0xff] %v9463_v22  ;;  %v9472_v15 = vmul.f32 %v8609_v25, %v3086_v6  ;;  %v4096_v57 = vadd.f32 %v11417_v29, %v3624_v54  ;;  %11418 = vst [vmem:[#allocation124_spill] sm:$0xff] %v9475_v56  ;;  %v9478_v46 = vmul.f32 %v8609_v25, %v3148_v18  ;;  %v11419_v6 = vld [vmem:[#allocation126_spill] sm:$0xff]  ;;  %v11421_v29 = vld [vmem:[#allocation67_spill] sm:$0xff]  ;;  %v9525_v56 = vpop.f32.mrb[48].mxu0 }
 0x2dc   : > { %11414 = vst [vmem:[#allocation65_spill] sm:$0xff] %v9466_v14  ;;  %11415 = vst [vmem:[#allocation182_spill] sm:$0xff] %v9469_v26  ;;  %v9481_v17 = vmul.f32 %v8609_v25, %v3149_v40  ;;  %v4039_v22 = vadd.f32 %v4007_v52, %v3563_v19  ;;  %v4040_v48 = vadd.f32 %v4008_v53, %v3564_v37 }
 0x2dd   : > { %11416 = vst [vmem:[#allocation183_spill] sm:$0xff] %v9472_v15  ;;  %v9484_v1 = vmul.f32 %v8609_v25, %v3085_v39  ;;  %v9487_v41 = vmul.f32 %v8609_v25, %v3150_v10  ;;  %v9490_v21 = vadd.f32 %v11419_v6, %v3625_v9  ;;  %v4559_v15 = vadd.f32 %v11421_v29, %v9371_v20  ;;  %v11423_v6 = vld [vmem:[#allocation73_spill] sm:$0xff] }
 0x2de   : > { %v9495_v18 = vmul.f32 %v8618_v59, %v3563_v19  ;;  %v9498_v40 = vmul.f32 %v8618_v59, %v3564_v37  ;;  %v9501_v52 = vmul.f32 %v8618_v59, %v3624_v54  ;;  %v9504_v39 = vmul.f32 %v8618_v59, %v3625_v9  ;;  %v11427_v9 = vld [vmem:[#allocation71_spill] sm:$0xff]  ;;  %11429 = vst [vmem:[#allocation186_spill] sm:$0xff] %v9525_v56 }
 0x2df   : > { %11420 = vst [vmem:[#allocation126_spill] sm:$0xff] %v9490_v21  ;;  %v9507_v10 = vmul.f32 %v8618_v59, %v3626_v42  ;;  %v4511_v53 = vadd.f32 %v11421_v29, %v4039_v22  ;;  %v5009_v26 = vadd.f32 %v11423_v6, %v4559_v15  ;;  %v5112_v19 = vmul.f32 %v8612_v58, %v9367_v43  ;;  %v11431_v15 = vld [vmem:[#allocation116_spill] sm:$0xff] }
 0x2e0   : > { %11422 = vst [vmem:[#allocation67_spill] sm:$0xff] %v9498_v40  ;;  %v9514_v14 = vmul.f32 %v8638_v30, %v4039_v22  ;;  %v9517_v37 = vmul.f32 %v8638_v30, %v4040_v48  ;;  %v9520_v54 = vmul.f32 %v8638_v30, %v4096_v57  ;;  %v9523_v40 = vadd.f32 %v11427_v9, %v4096_v57  ;;  %v11433_v22 = vld [vmem:[#allocation113_spill] sm:$0xff] }
 0x2e1   : > { %v9527_v29 = vadd.f32 %v5112_v19, %v5009_v26  ;;  %v1898_v6 = vmul.f32 1.442695, %v11431_v15  ;;  %v9532_v43 = vmul.f32 %v9314_v2, %v11432_v63  ;;  %v1938_v3 = vmul.f32 %v9415_v34, %v11433_v22  ;;  %v11438_v22 = vld [vmem:[#allocation72_spill] sm:$0xff] }
 0x2e2   : > { %11424 = vst [vmem:[#allocation73_spill] sm:$0xff] %v9514_v14  ;;  %11425 = vst [vmem:[#allocation184_spill] sm:$0xff] %v9517_v37  ;;  %v9536_v37 = vpop.f32.mrb[49].mxu0  ;;  %v9538_v14 = vpop.eup %6607  ;;  %v4512_v57 = vadd.f32 %v11427_v9, %v4040_v48  ;;  %v2579_v26 = vmul.f32 %v9415_v34, %v8602_v4  ;;  %v3056_v19 = vmul.f32 %v8605_v0, %v9402_v62  ;;  %v11441_v9 = vld [vmem:[#allocation120_spill] sm:$0xff] }
 0x2e3   : > { %11426 = vst [vmem:[#allocation185_spill] sm:$0xff] %v9520_v54  ;;  %11428 = vst [vmem:[#allocation71_spill] sm:$0xff] %v9523_v40  ;;  %v2577_v40 = vmul.f32 %v9063_v5, %v8602_v4  ;;  %v9547_v63 = vpop.f32.mrb[50].mxu0  ;;  %v9551_v15 = vmul.f32 %v8638_v30, %v9490_v21  ;;  %v1900_v56 = vmul.f32 1.442695, %v11441_v9  ;;  %v2673_v62 = vadd.f32 %v9374_v35, %v1938_v3 }
 0x2e4   : > { %11430 = vst [vmem:[#allocation187_spill] sm:$0xff] %v9527_v29  ;;  %11434 = vst [vmem:[#allocation116_spill] sm:$0xff] %v9536_v37  ;;  %v9554_v29 = vadd.f32 %v11438_v22, %v4511_v53  ;;  %v11440_v37 = vld [vmem:[#allocation119_spill] sm:$0xff]  ;;  %v9558_v54 = vpop.f32.mrb[51].mxu0  ;;  %v9562_v33 = vadd.f32 %v9449_v32, %v2579_v26  ;;  %v3119_v21 = vmul.f32 %v8605_v0, %v9411_v23  ;;  %6609 = vpow2.f32 %v1898_v6  ;;  %v11443_v22 = vld [vmem:[#allocation128_spill] sm:$0xff] }
 0x2e5   : > { %11435 = vst [vmem:[#allocation111_spill] sm:$0xff] %v9538_v14  ;;  %11436 = vst [vmem:[#allocation113_spill] sm:$0xff] %v9547_v63  ;;  %v1904_v48 = vmul.f32 1.442695, %v11440_v37  ;;  %v2609_v20 = vadd.f32 %v9100_v49, %v2577_v40  ;;  %v2644_v53 = vmul.f32 %v8602_v4, %v9532_v43  ;;  %v3526_v37 = vmul.f32 %v8609_v25, %v9324_v13  ;;  %v11445_v6 = vld [vmem:[#allocation68_spill] sm:$0xff]  ;;  %v11447_v63 = vld [vmem:[#allocation75_spill] sm:$0xff] }
 0x2e6   : > { %11437 = vst [vmem:[#allocation188_spill] sm:$0xff] %v9551_v15  ;;  %11439 = vst [vmem:[#allocation72_spill] sm:$0xff] %v9554_v29  ;;  %v9572_v9 = vadd.f32 %v11443_v22, %v3626_v42  ;;  %v3151_v26 = vadd.f32 %v3119_v21, %v2673_v62  ;;  %v3534_v35 = vmul.f32 %v8609_v25, %v9337_v55 }
 0x2e7   : > { %11442 = vst [vmem:[#allocation119_spill] sm:$0xff] %v9558_v54  ;;  %v3058_v40 = vmul.f32 %v8605_v0, %v2609_v20  ;;  %v3088_v15 = vadd.f32 %v3056_v19, %v2609_v20  ;;  %6611 = vpow2.f32 %v1904_v48  ;;  %v9578_v23 = vadd.f32 %v3526_v37, %v9327_v16  ;;  %v11446_v54 = vld [vmem:[#allocation114_spill] sm:$0xff]  ;;  %v9590_v19 = vpop.f32.mrb[52].mxu0  ;;  %v11451_v48 = vld [vmem:[#allocation76_spill] sm:$0xff] }
 0x2e8   : > { %11444 = vst [vmem:[#allocation120_spill] sm:$0xff] %v9572_v9  ;;  %v4562_v29 = vadd.f32 %v11445_v6, %v9572_v9  ;;  %v1941_v13 = vmul.f32 %v9429_v28, %v11446_v54  ;;  %v9585_v42 = vadd.f32 %v11447_v63, %v4512_v57  ;;  %6613 = vpow2.f32 %v1900_v56  ;;  %11450 = vst [vmem:[#allocation114_spill] sm:$0xff] %v9590_v19  ;;  %v9597_v54 = vpop.f32.mrb[53].mxu0  ;;  %v11471_v19 = vld [vmem:[#allocation69_spill] sm:$0xff] }
 0x2e9   : > { %v9588_v20 = vadd.f32 %v3058_v40, %v9562_v33  ;;  %v3566_v21 = vadd.f32 %v3534_v35, %v3088_v15  ;;  %v3627_v55 = vadd.f32 %v9408_v50, %v3151_v26  ;;  %v4010_v16 = vmul.f32 %v8618_v59, %v9578_v23  ;;  %11452 = vst [vmem:[#allocation75_spill] sm:$0xff] %v9597_v54  ;;  %v9605_v35 = vpop.f32.mrb[54].mxu0 }
 0x2ea   : > { %11448 = vst [vmem:[#allocation128_spill] sm:$0xff] %v9585_v42  ;;  %v5012_v37 = vadd.f32 %v11451_v48, %v4562_v29  ;;  %v5115_v22 = vmul.f32 %v8612_v58, %v1938_v3  ;;  %v9601_v56 = vmul.f32 %v8612_v58, %v9532_v43  ;;  %v2642_v57 = vmul.f32 %v8602_v4, %v1938_v3  ;;  %v11457_v48 = vld [vmem:[#allocation131_spill] sm:$0xff]  ;;  %v9613_v42 = vpop.f32.mrb[55].mxu0 }
 0x2eb   : > { %11449 = vst [vmem:[#allocation68_spill] sm:$0xff] %v9588_v20  ;;  %v3121_v63 = vmul.f32 %v8605_v0, %v2673_v62  ;;  %v2676_v40 = vadd.f32 %v2644_v53, %v1941_v13  ;;  %11454 = vst [vmem:[#allocation189_spill] sm:$0xff] %v9605_v35  ;;  %v9607_v50 = vadd.f32 %v4010_v16, %v3566_v21  ;;  %v1910_v20 = vmul.f32 1.442695, %v11457_v48  ;;  %v9666_v35 = vpop.f32.mrb[56].mxu0 }
 0x2ec   : > { %11453 = vst [vmem:[#allocation76_spill] sm:$0xff] %v9601_v56  ;;  %v4099_v9 = vadd.f32 %v9191_v36, %v3627_v55  ;;  %v9610_v29 = vadd.f32 %v5115_v22, %v5012_v37  ;;  %11458 = vst [vmem:[#allocation131_spill] sm:$0xff] %v9613_v42  ;;  %v9616_v54 = vmul.f32 %v8609_v25, %v3088_v15  ;;  %v11459_v56 = vld [vmem:[#allocation115_spill] sm:$0xff] }
 0x2ed   : > { %11455 = vst [vmem:[#allocation190_spill] sm:$0xff] %v9607_v50  ;;  %v1939_v3 = vmul.f32 %v9449_v32, %v11459_v56  ;;  %v2576_v62 = vmul.f32 %v9113_v45, %v8602_v4  ;;  %v2578_v53 = vmul.f32 %v9100_v49, %v8602_v4  ;;  %v9625_v36 = vmul.f32 %v8609_v25, %v3151_v26  ;;  %v11460_v22 = vld [vmem:[#allocation87_spill] sm:$0xff] }
 0x2ee   : > { %11456 = vst [vmem:[#allocation191_spill] sm:$0xff] %v9610_v29  ;;  %v9628_v16 = vmul.f32 %v8618_v59, %v3566_v21  ;;  %v2645_v37 = vmul.f32 %v8602_v4, %v1941_v13  ;;  %v4531_v15 = vmul.f32 %v8638_v30, %v11460_v22  ;;  %v9638_v49 = vpop.eup %6609  ;;  %v4514_v26 = vadd.f32 %v11445_v6, %v9607_v50  ;;  %v11467_v50 = vld [vmem:[#allocation80_spill] sm:$0xff] }
 0x2ef   : > { %v9634_v48 = vadd.f32 %v9063_v5, %v2576_v62  ;;  %v2610_v56 = vadd.f32 %v9415_v34, %v2578_v53  ;;  %v2643_v29 = vmul.f32 %v8602_v4, %v1939_v3  ;;  %v2674_v45 = vadd.f32 %v2642_v57, %v1939_v3  ;;  %11462 = vst [vmem:[#allocation87_spill] sm:$0xff] %v9638_v49  ;;  %v11464_v34 = vld [vmem:[#allocation46_spill] sm:$0xff] }
 0x2f0   : > { %v9643_v21 = vmul.f32 %v8612_v58, %v1941_v13  ;;  %6615 = vpow2.f32 %v1910_v20  ;;  %v4563_v42 = vadd.f32 %v4531_v15, %v4099_v9  ;;  %v9651_v57 = vadd.f32 %v9185_v24, %v11464_v34  ;;  %v11468_v9 = vld [vmem:[#allocation134_spill] sm:$0xff] }
 0x2f1   : > { %11461 = vst [vmem:[#allocation115_spill] sm:$0xff] %v9634_v48  ;;  %v2675_v22 = vadd.f32 %v2643_v29, %v9532_v43  ;;  %v3057_v62 = vmul.f32 %v8605_v0, %v9634_v48  ;;  %v3122_v53 = vmul.f32 %v8605_v0, %v2674_v45  ;;  %v9653_v5 = vpop.eup %6611  ;;  %v3152_v6 = vadd.f32 %v9418_v47, %v2674_v45 }
 0x2f2   : > { %11463 = vst [vmem:[#allocation192_spill] sm:$0xff] %v9643_v21  ;;  %11465 = vst [vmem:[#allocation193_spill] sm:$0xff] %v9651_v57  ;;  %v5013_v13 = vadd.f32 %v11467_v50, %v4563_v42  ;;  %v5116_v20 = vmul.f32 %v8612_v58, %v1939_v3  ;;  %v1906_v15 = vmul.f32 1.442695, %v11468_v9  ;;  %v9659_v43 = vpop.eup %6613  ;;  %v9662_v29 = vmul.f32 %v8618_v59, %v3627_v55  ;;  %v9677_v50 = vpop.f32.mrb[57].mxu0  ;;  %v11480_v9 = vld [vmem:[#allocation123_spill] sm:$0xff] }
 0x2f3   : > { %11466 = vst [vmem:[#allocation194_spill] sm:$0xff] %v9653_v5  ;;  %11469 = vst [vmem:[#allocation80_spill] sm:$0xff] %v9659_v43  ;;  %v9664_v21 = vadd.f32 %v3057_v62, %v2610_v56  ;;  %v3153_v48 = vadd.f32 %v3121_v63, %v2675_v22  ;;  %v3154_v24 = vadd.f32 %v3122_v53, %v2676_v40  ;;  %v9687_v62 = vpop.f32.mrb[58].mxu0 }
 0x2f4   : > { %11470 = vst [vmem:[#allocation134_spill] sm:$0xff] %v9666_v35  ;;  %v9669_v34 = vadd.f32 %v11471_v19, %v4514_v26  ;;  %v9672_v45 = vmul.f32 %v8605_v0, %v2676_v40  ;;  %v3628_v47 = vadd.f32 %v9478_v46, %v3152_v6  ;;  %v9675_v42 = vadd.f32 %v5116_v20, %v5013_v13  ;;  %v11475_v19 = vld [vmem:[#allocation137_spill] sm:$0xff]  ;;  %v11479_v13 = vld [vmem:[#allocation139_spill] sm:$0xff] }
 0x2f5   : > { %11474 = vst [vmem:[#allocation196_spill] sm:$0xff] %v9677_v50  ;;  %v9681_v55 = vadd.f32 %v9484_v1, %v9664_v21  ;;  %v3629_v63 = vadd.f32 %v9481_v17, %v3153_v48  ;;  %v4483_v3 = vmul.f32 %v8638_v30, %v9651_v57  ;;  %v1912_v26 = vmul.f32 1.442695, %v11475_v19  ;;  %11476 = vst [vmem:[#allocation137_spill] sm:$0xff] %v9687_v62  ;;  %v11495_v62 = vld [vmem:[#allocation132_spill] sm:$0xff] }
 0x2f6   : > { %11472 = vst [vmem:[#allocation69_spill] sm:$0xff] %v9669_v34  ;;  %11473 = vst [vmem:[#allocation195_spill] sm:$0xff] %v9675_v42  ;;  %v9690_v40 = vmul.f32 %v8605_v0, %v2610_v56  ;;  %v3630_v46 = vadd.f32 %v9487_v41, %v3154_v24  ;;  %v4100_v53 = vadd.f32 %v9256_v11, %v3628_v47  ;;  %6617 = vpow2.f32 %v1906_v15  ;;  %v11481_v56 = vld [vmem:[#allocation104_spill] sm:$0xff]  ;;  %v11483_v41 = vld [vmem:[#allocation125_spill] sm:$0xff]  ;;  %v9712_v15 = vpop.f32.mrb[59].mxu0 }
 0x2f7   : > { %v4043_v1 = vadd.f32 %v9245_v7, %v9681_v55  ;;  %v9697_v17 = vadd.f32 %v9259_v27, %v3629_v63  ;;  %v1908_v20 = vmul.f32 1.442695, %v11479_v13  ;;  %v1944_v19 = vmul.f32 %v9538_v14, %v11480_v9  ;;  %11484 = vst [vmem:[#allocation123_spill] sm:$0xff] %v9712_v15 }
 0x2f8   : > { %11477 = vst [vmem:[#allocation197_spill] sm:$0xff] %v9690_v40  ;;  %v9703_v34 = vmul.f32 %v8609_v25, %v3152_v6  ;;  %v9706_v40 = vadd.f32 %v11481_v56, %v4100_v53  ;;  %v1942_v11 = vmul.f32 %v9638_v49, %v11483_v41  ;;  %v2581_v7 = vmul.f32 %v9314_v2, %v8602_v4 }
 0x2f9   : > { %11478 = vst [vmem:[#allocation198_spill] sm:$0xff] %v9697_v17  ;;  %v9715_v27 = vmul.f32 %v8609_v25, %v3153_v48  ;;  %v4515_v13 = vadd.f32 %v4483_v3, %v4043_v1  ;;  %6619 = vpow2.f32 %v1912_v26  ;;  %v3060_v6 = vmul.f32 %v8605_v0, %v9562_v33  ;;  %v11486_v3 = vld [vmem:[#allocation97_spill] sm:$0xff] }
 0x2fa   : > { %11482 = vst [vmem:[#allocation139_spill] sm:$0xff] %v9706_v40  ;;  %v9719_v9 = vpop.eup %6615  ;;  %v9722_v53 = vmul.f32 %v8609_v25, %v3154_v24  ;;  %v2613_v56 = vadd.f32 %v9429_v28, %v2581_v7  ;;  %v2677_v41 = vadd.f32 %v2645_v37, %v1942_v11  ;;  %v3123_v40 = vmul.f32 %v8605_v0, %v2675_v22  ;;  %v11489_v7 = vld [vmem:[#allocation89_spill] sm:$0xff] }
 0x2fb   : > { %11485 = vst [vmem:[#allocation104_spill] sm:$0xff] %v9719_v9  ;;  %v9727_v17 = vmul.f32 %v8618_v59, %v3628_v47  ;;  %6621 = vpow2.f32 %v1908_v20  ;;  %v4102_v48 = vadd.f32 %v9266_v44, %v3630_v46  ;;  %v4534_v33 = vmul.f32 %v8638_v30, %v11486_v3  ;;  %v11488_v20 = vld [vmem:[#allocation42_spill] sm:$0xff] }
 0x2fc   : > { %v9733_v26 = vmul.f32 %v8618_v59, %v3629_v63  ;;  %v9735_v24 = vadd.f32 %v3060_v6, %v2613_v56  ;;  %v3155_v1 = vadd.f32 %v3123_v40, %v2677_v41  ;;  %v9739_v37 = vadd.f32 %v9347_v8, %v8629_v12  ;;  %v11492_v8 = vld [vmem:[#allocation127_spill] sm:$0xff] }
 0x2fd   : > { %v9742_v22 = vmul.f32 %v8618_v59, %v3630_v46  ;;  %v2648_v47 = vmul.f32 %v8602_v4, %v1944_v19  ;;  %v4566_v44 = vadd.f32 %v4534_v33, %v4102_v48  ;;  %v4820_v42 = vrot.slane %v11489_v7, %v11488_v20  ;;  %v11493_v46 = vld [vmem:[#allocation78_spill] sm:$0xff] }
 0x2fe   : > { %11487 = vst [vmem:[#allocation125_spill] sm:$0xff] %v9739_v37  ;;  %v9748_v3 = vmul.f32 %v8612_v58, %v1944_v19  ;;  %v9752_v63 = vadd.f32 %v9616_v54, %v9735_v24  ;;  %v3631_v40 = vadd.f32 %v9625_v36, %v3155_v1  ;;  %v1945_v6 = vmul.f32 %v9653_v5, %v11492_v8  ;;  %v9762_v33 = vld [vmem:[%s7918_s30] sm:$0xff] }
 0x2ff   : > { %v9758_v15 = vadd.f32 %v11493_v46, %v4515_v13  ;;  %v2646_v48 = vmul.f32 %v8602_v4, %v1942_v11  ;;  %v4984_v7 = vmul.f32 %v9762_v33, %v4820_v42  ;;  %v9772_v36 = vmul.f32 %v8605_v0, %v2613_v56 }
 0x300   : > { %11490 = vst [vmem:[#allocation97_spill] sm:$0xff] %v9748_v3  ;;  %11491 = vst [vmem:[#allocation42_spill] sm:$0xff] %v9752_v63  ;;  %v9767_v3 = vmul.f32 %v9659_v43, %v11495_v62  ;;  %v9769_v54 = vpop.eup %6617  ;;  %v4046_v13 = vadd.f32 %v9439_v61, %v9752_v63  ;;  %v4103_v8 = vadd.f32 %v9442_v31, %v3631_v40 }
 0x301   : > { %11494 = vst [vmem:[#allocation89_spill] sm:$0xff] %v9758_v15  ;;  %11496 = vst [vmem:[#allocation127_spill] sm:$0xff] %v9772_v36  ;;  %v4486_v46 = vmul.f32 %v8638_v30, %v9739_v37  ;;  %v3125_v15 = vmul.f32 %v8605_v0, %v2677_v41  ;;  %v5016_v50 = vadd.f32 %v4984_v7, %v4566_v44  ;;  %v9793_v41 = vld [vmem:[%s7920_s29] sm:$0xff]  ;;  %v11499_v7 = vld [vmem:[#allocation143_spill] sm:$0xff] }
 0x302   : > { %v5119_v62 = vmul.f32 %v8612_v58, %v1942_v11  ;;  %v2680_v35 = vadd.f32 %v2648_v47, %v1945_v6  ;;  %v2580_v57 = vmul.f32 %v9449_v32, %v8602_v4  ;;  %v2582_v56 = vmul.f32 %v9429_v28, %v8602_v4 }
 0x303   : > { %v4518_v12 = vadd.f32 %v4486_v46, %v4046_v13  ;;  %v2647_v61 = vmul.f32 %v8602_v4, %v9767_v3  ;;  %v9787_v31 = vpop.eup %6619  ;;  %v9790_v36 = vmul.f32 %v8609_v25, %v3155_v1  ;;  %v4920_v11 = vmul.f32 %v9793_v41, %v4820_v42 }
 0x304   : > { %11497 = vst [vmem:[#allocation78_spill] sm:$0xff] %v9787_v31  ;;  %v9796_v47 = vadd.f32 %v5119_v62, %v5016_v50  ;;  %v2678_v44 = vadd.f32 %v2646_v48, %v9767_v3  ;;  %v1918_v13 = vmul.f32 1.442695, %v11499_v7  ;;  %v9801_v46 = vadd.f32 %v9314_v2, %v2580_v57  ;;  %v11501_v57 = vld [vmem:[#allocation108_spill] sm:$0xff]  ;;  %v11504_v2 = vld [vmem:[#allocation53_spill] sm:$0xff] }
 0x305   : > { %v2614_v28 = vadd.f32 %v9638_v49, %v2582_v56  ;;  %v2679_v32 = vadd.f32 %v2647_v61, %v1944_v19  ;;  %v9804_v37 = vpop.eup %6621  ;;  %v9807_v1 = vmul.f32 %v8618_v59, %v3631_v40  ;;  %v2649_v63 = vmul.f32 %v8602_v4, %v1945_v6  ;;  %v11502_v56 = vld [vmem:[#allocation83_spill] sm:$0xff] }
 0x306   : > { %11498 = vst [vmem:[#allocation132_spill] sm:$0xff] %v9796_v47  ;;  %11500 = vst [vmem:[#allocation143_spill] sm:$0xff] %v9801_v46  ;;  %v3126_v42 = vmul.f32 %v8605_v0, %v2678_v44  ;;  %v3156_v50 = vadd.f32 %v9672_v45, %v2678_v44  ;;  %v3061_v48 = vmul.f32 %v8605_v0, %v9801_v46  ;;  %6623 = vpow2.f32 %v11502_v56 }
 0x307   : > { %v3157_v62 = vadd.f32 %v3125_v15, %v2679_v32  ;;  %v4535_v7 = vmul.f32 %v8638_v30, %v11501_v57  ;;  %v9818_v19 = vmul.f32 %v8612_v58, %v1945_v6  ;;  %v9823_v47 = vadd.f32 %v11504_v2, %v9436_v51 }
 0x308   : > { %v3158_v40 = vadd.f32 %v3126_v42, %v2680_v35  ;;  %v3632_v61 = vadd.f32 %v9703_v34, %v3156_v50  ;;  %v9825_v45 = vadd.f32 %v3061_v48, %v2614_v28  ;;  %v3539_v15 = vmul.f32 %v8609_v25, %v9664_v21 }
 0x309   : > { %11503 = vst [vmem:[#allocation108_spill] sm:$0xff] %v9818_v19  ;;  %11505 = vst [vmem:[#allocation83_spill] sm:$0xff] %v9823_v47  ;;  %v3633_v44 = vadd.f32 %v9715_v27, %v3157_v62  ;;  %v4567_v57 = vadd.f32 %v4535_v7, %v4103_v8  ;;  %v9831_v56 = vmul.f32 %v8605_v0, %v2680_v35  ;;  %6625 = vpow2.f32 %v1918_v13  ;;  %v11511_v8 = vld [vmem:[#allocation146_spill] sm:$0xff]  ;;  %v11512_v13 = vld [vmem:[#allocation84_spill] sm:$0xff] }
 0x30a   : > { %v3634_v6 = vadd.f32 %v9722_v53, %v3158_v40  ;;  %v4104_v34 = vadd.f32 %v9501_v52, %v3632_v61  ;;  %v9835_v42 = vadd.f32 %v4920_v11, %v4518_v12  ;;  %v9838_v51 = vmul.f32 %v8605_v0, %v2614_v28  ;;  %v11509_v12 = vld [vmem:[#allocation133_spill] sm:$0xff] }
 0x30b   : > { %v9841_v48 = vadd.f32 %v3539_v15, %v9825_v45  ;;  %v9844_v21 = vadd.f32 %v9504_v39, %v3633_v44  ;;  %v9847_v27 = vmul.f32 %v8609_v25, %v3156_v50  ;;  %v9850_v35 = vmul.f32 %v8609_v25, %v3157_v62  ;;  %v11513_v50 = vld [vmem:[#allocation142_spill] sm:$0xff]  ;;  %v11514_v15 = vld [vmem:[#allocation148_spill] sm:$0xff] }
 0x30c   : > { %11506 = vst [vmem:[#allocation199_spill] sm:$0xff] %v9835_v42  ;;  %11507 = vst [vmem:[#allocation200_spill] sm:$0xff] %v9838_v51  ;;  %v4487_v52 = vmul.f32 %v8638_v30, %v9823_v47  ;;  %v9855_v53 = vadd.f32 %v11509_v12, %v4104_v34  ;;  %v1914_v11 = vmul.f32 1.442695, %v11511_v8  ;;  %v9862_v39 = vmul.f32 %v9719_v9, %v11512_v13 }
 0x30d   : > { %11508 = vst [vmem:[#allocation201_spill] sm:$0xff] %v9844_v21  ;;  %v4047_v28 = vadd.f32 %v9495_v18, %v9841_v48  ;;  %v9866_v7 = vmul.f32 %v9769_v54, %v11513_v50  ;;  %v9869_v62 = vmul.f32 %v8609_v25, %v3158_v40  ;;  %v1920_v19 = vmul.f32 1.442695, %v11514_v15  ;;  %v11516_v15 = vld [vmem:[#allocation149_spill] sm:$0xff] }
 0x30e   : > { %11510 = vst [vmem:[#allocation133_spill] sm:$0xff] %v9855_v53  ;;  %v2583_v34 = vmul.f32 %v9638_v49, %v8602_v4  ;;  %v2585_v18 = vmul.f32 %v9538_v14, %v8602_v4  ;;  %v9877_v12 = vmul.f32 %v8618_v59, %v3632_v61  ;;  %v9880_v8 = vmul.f32 %v8618_v59, %v3633_v44 }
 0x30f   : > { %v9882_v13 = vadd.f32 %v4487_v52, %v4047_v28  ;;  %v5120_v40 = vmul.f32 %v8612_v58, %v9767_v3  ;;  %v9887_v50 = vmul.f32 %v8618_v59, %v3634_v6  ;;  %v1916_v53 = vmul.f32 1.442695, %v11516_v15  ;;  %v11518_v15 = vld [vmem:[#allocation122_spill] sm:$0xff] }
 0x310   : > { %v9891_v21 = vadd.f32 %v9659_v43, %v2583_v34  ;;  %v2617_v51 = vadd.f32 %v9653_v5, %v2585_v18  ;;  %v6624_v61 = vpop.eup %6623  ;;  %6627 = vpow2.f32 %v1914_v11  ;;  %v2681_v44 = vadd.f32 %v2649_v63, %v9866_v7  ;;  %v11519_v11 = vld [vmem:[#allocation43_spill] sm:$0xff] }
 0x311   : > { %11515 = vst [vmem:[#allocation146_spill] sm:$0xff] %v9887_v50  ;;  %v3127_v52 = vmul.f32 %v8605_v0, %v2679_v32  ;;  %v4106_v28 = vadd.f32 %v9507_v10, %v3634_v6  ;;  %v4824_v3 = vrot.slane %v6624_v61, %v11488_v20  ;;  %6629 = vpow2.f32 %v1920_v19  ;;  %v11521_v6 = vld [vmem:[#allocation57_spill] sm:$0xff] }
 0x312   : > { %11517 = vst [vmem:[#allocation84_spill] sm:$0xff] %v9891_v21  ;;  %v3064_v50 = vmul.f32 %v8605_v0, %v9891_v21  ;;  %v4538_v34 = vmul.f32 %v8638_v30, %v11518_v15  ;;  %v2652_v18 = vmul.f32 %v8602_v4, %v9862_v39  ;;  %v3542_v63 = vmul.f32 %v8609_v25, %v9735_v24  ;;  %v9918_v21 = vpop.f32.mrb[60].mxu0 }
 0x313   : > { %v3159_v42 = vadd.f32 %v3127_v52, %v2681_v44  ;;  %v4634_v32 = vmul.f32 -24.0, %v11519_v11  ;;  %v9907_v49 = vpop.eup %6625  ;;  %v4985_v10 = vmul.f32 %v9762_v33, %v4824_v3  ;;  %v9914_v61 = vadd.f32 %v11521_v6, %v9578_v23  ;;  %11522 = vst [vmem:[#allocation148_spill] sm:$0xff] %v9918_v21  ;;  %v9925_v47 = vpop.f32.mrb[61].mxu0 }
 0x314   : > { %11520 = vst [vmem:[#allocation142_spill] sm:$0xff] %v9907_v49  ;;  %v9910_v19 = vadd.f32 %v3064_v50, %v2617_v51  ;;  %v9916_v15 = vadd.f32 %v4538_v34, %v4106_v28  ;;  %6631 = vpow2.f32 %v1916_v53  ;;  %v9922_v24 = vmul.f32 %v8612_v58, %v9862_v39  ;;  %11524 = vst [vmem:[#allocation122_spill] sm:$0xff] %v9925_v47  ;;  %v11526_v28 = vld [vmem:[#allocation82_spill] sm:$0xff]  ;;  %v9934_v53 = vpop.f32.mrb[62].mxu0  ;;  %v11543_v47 = vld [vmem:[#allocation163_spill] sm:$0xff] }
 0x315   : > { %v3635_v52 = vadd.f32 %v9790_v36, %v3159_v42  ;;  %v4689_v46 = vmul.f32 1.442695, %v4634_v32  ;;  %v5017_v50 = vadd.f32 %v4985_v10, %v4567_v57  ;;  %v2650_v2 = vmul.f32 %v8602_v4, %v9866_v7  ;;  %11527 = vst [vmem:[#allocation57_spill] sm:$0xff] %v9934_v53  ;;  %v9943_v32 = vpop.f32.mrb[63].mxu0 }
 0x316   : > { %11523 = vst [vmem:[#allocation149_spill] sm:$0xff] %v9922_v24  ;;  %v9930_v23 = vadd.f32 %v3542_v63, %v9910_v19  ;;  %v1949_v34 = vmul.f32 %v9787_v31, %v11526_v28  ;;  %v11528_v24 = vld [vmem:[#allocation144_spill] sm:$0xff]  ;;  %v2584_v57 = vmul.f32 %v9659_v43, %v8602_v4  ;;  %11529 = vst [vmem:[#allocation82_spill] sm:$0xff] %v9943_v32 }
 0x317   : > { %v4107_v21 = vadd.f32 %v9662_v29, %v3635_v52  ;;  %6633 = vpow2.f32 %v4689_v46  ;;  %v9939_v36 = vmul.f32 %v9804_v37, %v11528_v24  ;;  %v9945_v10 = vadd.f32 %v5120_v40, %v5017_v50 }
 0x318   : > { %11525 = vst [vmem:[#allocation43_spill] sm:$0xff] %v9930_v23  ;;  %v4050_v63 = vadd.f32 %v9628_v16, %v9930_v23  ;;  %v4490_v28 = vmul.f32 %v8638_v30, %v9914_v61  ;;  %v2684_v53 = vadd.f32 %v2652_v18, %v1949_v34  ;;  %v9952_v29 = vmul.f32 %v8605_v0, %v2617_v51 }
 0x319   : > { %11530 = vst [vmem:[#allocation144_spill] sm:$0xff] %v9945_v10  ;;  %v2586_v46 = vmul.f32 %v9653_v5, %v8602_v4  ;;  %v9957_v24 = vadd.f32 %v9538_v14, %v2584_v57  ;;  %v2651_v40 = vmul.f32 %v8602_v4, %v9939_v36  ;;  %v4921_v52 = vmul.f32 %v9793_v41, %v4824_v3 }
 0x31a   : > { %11531 = vst [vmem:[#allocation202_spill] sm:$0xff] %v9952_v29  ;;  %v3129_v16 = vmul.f32 %v8605_v0, %v2681_v44  ;;  %v9963_v50 = vadd.f32 %v4490_v28, %v4050_v63  ;;  %v2682_v18 = vadd.f32 %v2650_v2, %v9939_v36  ;;  %v9966_v23 = vpop.eup %6627  ;;  %v9969_v51 = vmul.f32 %v8609_v25, %v3159_v42  ;;  %v11535_v63 = vld [vmem:[#allocation130_spill] sm:$0xff] }
 0x31b   : > { %11532 = vst [vmem:[#allocation203_spill] sm:$0xff] %v9957_v24  ;;  %11533 = vst [vmem:[#allocation204_spill] sm:$0xff] %v9966_v23  ;;  %v2618_v29 = vadd.f32 %v9769_v54, %v2586_v46  ;;  %v2683_v57 = vadd.f32 %v2651_v40, %v9862_v39  ;;  %v3065_v5 = vmul.f32 %v8605_v0, %v9957_v24  ;;  %v9975_v14 = vpop.eup %6629  ;;  %v4635_v28 = vmul.f32 -25.0, %v11519_v11 }
 0x31c   : > { %11534 = vst [vmem:[#allocation205_spill] sm:$0xff] %v9975_v14  ;;  %v3130_v44 = vmul.f32 %v8605_v0, %v2682_v18  ;;  %v3160_v3 = vadd.f32 %v9831_v56, %v2682_v18  ;;  %v4539_v2 = vmul.f32 %v8638_v30, %v11535_v63  ;;  %v5123_v42 = vmul.f32 %v8612_v58, %v9866_v7 }
 0x31d   : > { %v9984_v46 = vadd.f32 %v3065_v5, %v2618_v29  ;;  %v3161_v39 = vadd.f32 %v3129_v16, %v2683_v57  ;;  %v3543_v40 = vmul.f32 %v8609_v25, %v9825_v45  ;;  %v9989_v24 = vadd.f32 %v4921_v52, %v9882_v13 }
 0x31e   : > { %v3162_v10 = vadd.f32 %v3130_v44, %v2684_v53  ;;  %v3636_v56 = vadd.f32 %v9847_v27, %v3160_v3  ;;  %v9992_v18 = vadd.f32 %v4539_v2, %v4107_v21  ;;  %v9994_v63 = vpop.eup %6631  ;;  %v4019_v5 = vmul.f32 %v8618_v59, %v9681_v55  ;;  %v11538_v44 = vld [vmem:[#allocation157_spill] sm:$0xff] }
 0x31f   : > { %11536 = vst [vmem:[#allocation130_spill] sm:$0xff] %v9989_v24  ;;  %11537 = vst [vmem:[#allocation206_spill] sm:$0xff] %v9994_v63  ;;  %v3575_v43 = vadd.f32 %v3543_v40, %v9984_v46  ;;  %v3637_v7 = vadd.f32 %v9850_v35, %v3161_v39  ;;  %v4691_v16 = vmul.f32 1.442695, %v4635_v28  ;;  %v2653_v45 = vmul.f32 %v8602_v4, %v1949_v34  ;;  %v11540_v40 = vld [vmem:[#allocation160_spill] sm:$0xff]  ;;  %v11542_v28 = vld [vmem:[#allocation161_spill] sm:$0xff] }
 0x320   : > { %v3638_v13 = vadd.f32 %v9869_v62, %v3162_v10  ;;  %v4108_v52 = vadd.f32 %v9727_v17, %v3636_v56  ;;  %v5958_v27 = vmul.f32 -1.442695, %v11538_v44  ;;  %v5956_v35 = vmul.f32 -1.442695, %v11540_v40  ;;  %v11544_v56 = vld [vmem:[#allocation107_spill] sm:$0xff] }
 0x321   : > { %v6634_v21 = vpop.eup %6633  ;;  %v4051_v2 = vadd.f32 %v4019_v5, %v3575_v43  ;;  %v10005_v24 = vadd.f32 %v9733_v26, %v3637_v7  ;;  %6635 = vpow2.f32 %v4691_v16  ;;  %v5959_v62 = vmul.f32 -1.442695, %v11542_v28  ;;  %v11545_v43 = vld [vmem:[#allocation86_spill] sm:$0xff] }
 0x322   : > { %v4836_v32 = vrot.slane %v6634_v21, %v11488_v20  ;;  %v10010_v55 = vadd.f32 %v9284_v60, %v4108_v52  ;;  %6637 = vpow2.f32 %v5958_v27  ;;  %v10018_v5 = vadd.f32 %v11545_v43, %v11544_v56  ;;  %v11546_v26 = vld [vmem:[#allocation58_spill] sm:$0xff]  ;;  %v11548_v60 = vld [vmem:[#allocation151_spill] sm:$0xff] }
 0x323   : > { %11539 = vst [vmem:[#allocation157_spill] sm:$0xff] %v10005_v24  ;;  %v10014_v17 = vadd.f32 %v11543_v47, %v4051_v2  ;;  %6639 = vpow2.f32 %v5956_v35  ;;  %v5957_v7 = vmul.f32 -1.442695, %v11546_v26  ;;  %v10023_v44 = vmul.f32 %v8612_v58, %v1949_v34  ;;  %v11550_v47 = vld [vmem:[#allocation152_spill] sm:$0xff] }
 0x324   : > { %11541 = vst [vmem:[#allocation160_spill] sm:$0xff] %v10010_v55  ;;  %v4988_v16 = vmul.f32 %v9762_v33, %v4836_v32  ;;  %6641 = vpow2.f32 %v5959_v62  ;;  %v10027_v52 = vmul.f32 %v9907_v49, %v11548_v60  ;;  %v10031_v27 = vmul.f32 %v9966_v23, %v11550_v47 }
 0x325   : > { %11547 = vst [vmem:[#allocation161_spill] sm:$0xff] %v10023_v44  ;;  %6643 = vpow2.f32 %v5957_v7  ;;  %v2587_v21 = vmul.f32 %v9769_v54, %v8602_v4  ;;  %v2589_v2 = vmul.f32 %v9719_v9, %v8602_v4  ;;  %v3132_v34 = vmul.f32 %v8605_v0, %v2684_v53 }
 0x326   : > { %11549 = vst [vmem:[#allocation163_spill] sm:$0xff] %v10027_v52  ;;  %v5020_v40 = vadd.f32 %v4988_v16, %v9916_v15  ;;  %v10040_v35 = vmul.f32 %v8605_v0, %v2618_v29  ;;  %v5124_v28 = vmul.f32 %v8612_v58, %v9939_v36  ;;  %v2685_v43 = vadd.f32 %v2653_v45, %v10031_v27 }
 0x327   : > { %v10045_v62 = vadd.f32 %v9804_v37, %v2587_v21  ;;  %v10048_v56 = vadd.f32 %v9787_v31, %v2589_v2  ;;  %v3131_v26 = vmul.f32 %v8605_v0, %v2683_v57  ;;  %v3608_v15 = vmul.f32 %v8609_v25, %v3160_v3  ;;  %v11555_v21 = vld [vmem:[#allocation158_spill] sm:$0xff] }
 0x328   : > { %11551 = vst [vmem:[#allocation107_spill] sm:$0xff] %v10040_v35  ;;  %v10052_v7 = vadd.f32 %v5123_v42, %v5020_v40  ;;  %v10056_v53 = vmul.f32 %v8609_v25, %v3161_v39  ;;  %v4110_v29 = vadd.f32 %v9742_v22, %v3638_v13  ;;  %v4924_v36 = vmul.f32 %v9793_v41, %v4836_v32  ;;  %v11552_v39 = vld [vmem:[#allocation154_spill] sm:$0xff] }
 0x329   : > { %v10061_v16 = vmul.f32 %v8609_v25, %v3162_v10  ;;  %v3068_v60 = vmul.f32 %v8605_v0, %v10045_v62  ;;  %v3163_v45 = vadd.f32 %v3131_v26, %v2685_v43  ;;  %v3546_v57 = vmul.f32 %v8609_v25, %v9910_v19  ;;  %v11556_v40 = vld [vmem:[#allocation42_spill] sm:$0xff] }
 0x32a   : > { %v4542_v3 = vmul.f32 %v8638_v30, %v9332_v38  ;;  %v4638_v42 = vmul.f32 -28.0, %v11519_v11  ;;  %v10072_v22 = vmul.f32 %v9975_v14, %v11552_v39  ;;  %v2656_v47 = vmul.f32 %v8602_v4, %v10027_v52  ;;  %v11622_v35 = vld [vmem:[#allocation94_spill] sm:$0xff] }
 0x32b   : > { %v6636_v32 = vpop.eup %6635  ;;  %v10075_v10 = vadd.f32 %v3068_v60, %v10048_v56  ;;  %v3639_v13 = vadd.f32 %v9969_v51, %v3163_v45  ;;  %v10082_v19 = vmul.f32 %v9994_v63, %v11555_v21  ;;  %v4022_v26 = vmul.f32 %v8618_v59, %v11556_v40 }
 0x32c   : > { %11553 = vst [vmem:[#allocation86_spill] sm:$0xff] %v10072_v22  ;;  %v6638_v38 = vpop.eup %6637  ;;  %v4840_v2 = vrot.slane %v6636_v32, %v11488_v20  ;;  %v10087_v39 = vadd.f32 %v4542_v3, %v4110_v29  ;;  %v4697_v44 = vmul.f32 1.442695, %v4638_v42  ;;  %v2688_v14 = vadd.f32 %v2656_v47, %v10072_v22  ;;  %v11561_v22 = vld [vmem:[#allocation167_spill] sm:$0xff] }
 0x32d   : > { %11554 = vst [vmem:[#allocation58_spill] sm:$0xff] %v10075_v10  ;;  %v6640_v60 = vpop.eup %6639  ;;  %v2052_v55 = vadd.f32 1.0, %v6638_v38  ;;  %v3578_v51 = vadd.f32 %v3546_v57, %v10075_v10  ;;  %v4111_v45 = vadd.f32 %v9807_v1, %v3639_v13  ;;  %v2654_v32 = vmul.f32 %v8602_v4, %v10031_v27  ;;  %v11557_v38 = vld [vmem:[#allocation179_spill] sm:$0xff]  ;;  %v11563_v10 = vld [vmem:[#allocation100_spill] sm:$0xff] }
 0x32e   : > { %v6642_v49 = vpop.eup %6641  ;;  %v4989_v21 = vmul.f32 %v9762_v33, %v4840_v2  ;;  %v2050_v63 = vadd.f32 1.0, %v6640_v60  ;;  %6645 = vpow2.f32 %v4697_v44  ;;  %v2588_v42 = vmul.f32 %v9804_v37, %v8602_v4 }
 0x32f   : > { %v6644_v40 = vpop.eup %6643  ;;  %6647 = vrcp.f32 %v2052_v55  ;;  %v2053_v29 = vadd.f32 1.0, %v6642_v49  ;;  %v4054_v3 = vadd.f32 %v4022_v26, %v3578_v51  ;;  %v10098_v57 = vadd.f32 %v4924_v36, %v9963_v50 }
 0x330   : > { %v5021_v1 = vadd.f32 %v4989_v21, %v9992_v18  ;;  %v2051_v13 = vadd.f32 1.0, %v6644_v40  ;;  %v3133_v47 = vmul.f32 %v8605_v0, %v2685_v43  ;;  %v2590_v55 = vmul.f32 %v9787_v31, %v8602_v4  ;;  %v11559_v40 = vld [vmem:[#allocation66_spill] sm:$0xff] }
 0x331   : > { %6649 = vrcp.f32 %v2053_v29  ;;  %v10103_v60 = vadd.f32 %v11557_v38, %v4054_v3  ;;  %v10108_v49 = vadd.f32 %v9719_v9, %v2588_v42  ;;  %v2655_v50 = vmul.f32 %v8602_v4, %v10082_v19 }
 0x332   : > { %v10110_v44 = vadd.f32 %v5124_v28, %v5021_v1  ;;  %6651 = vrcp.f32 %v2050_v63  ;;  %v2686_v18 = vadd.f32 %v2654_v32, %v10082_v19  ;;  %v4925_v43 = vmul.f32 %v9793_v41, %v4840_v2 }
 0x333   : > { %11558 = vst [vmem:[#allocation151_spill] sm:$0xff] %v10108_v49  ;;  %6653 = vrcp.f32 %v2051_v13  ;;  %v2622_v36 = vadd.f32 %v9966_v23, %v2590_v55  ;;  %v3069_v26 = vmul.f32 %v8605_v0, %v10108_v49  ;;  %v2687_v51 = vadd.f32 %v2655_v50, %v10027_v52 }
 0x334   : > { %v3134_v21 = vmul.f32 %v8605_v0, %v2686_v18  ;;  %v3164_v28 = vadd.f32 %v3132_v34, %v2686_v18  ;;  %v4543_v63 = vmul.f32 %v8638_v30, %v11559_v40  ;;  %v3547_v32 = vmul.f32 %v8609_v25, %v9984_v46  ;;  %v11560_v34 = vld [vmem:[#allocation59_spill] sm:$0xff] }
 0x335   : > { %v3101_v29 = vadd.f32 %v3069_v26, %v2622_v36  ;;  %v4023_v2 = vmul.f32 %v8618_v59, %v9841_v48  ;;  %v4639_v3 = vmul.f32 -29.0, %v11519_v11  ;;  %v3165_v42 = vadd.f32 %v3133_v47, %v2687_v51  ;;  %v11564_v51 = vld [vmem:[#allocation98_spill] sm:$0xff] }
 0x336   : > { %v3166_v1 = vadd.f32 %v3134_v21, %v2688_v14  ;;  %v3640_v13 = vadd.f32 %v3608_v15, %v3164_v28  ;;  %v10128_v38 = vadd.f32 %v4543_v63, %v4111_v45  ;;  %v5962_v18 = vmul.f32 -1.442695, %v11560_v34  ;;  %v11565_v28 = vld [vmem:[#allocation103_spill] sm:$0xff] }
 0x337   : > { %v3579_v55 = vadd.f32 %v3547_v32, %v3101_v29  ;;  %v4699_v50 = vmul.f32 1.442695, %v4639_v3  ;;  %v5960_v40 = vmul.f32 -1.442695, %v11561_v22  ;;  %v3641_v52 = vadd.f32 %v10056_v53, %v3165_v42  ;;  %v11567_v53 = vld [vmem:[#allocation185_spill] sm:$0xff]  ;;  %v11573_v34 = vld [vmem:[#allocation171_spill] sm:$0xff] }
 0x338   : > { %v6646_v26 = vpop.eup %6645  ;;  %v10134_v46 = vadd.f32 %v10061_v16, %v3166_v1  ;;  %v4112_v48 = vadd.f32 %v9877_v12, %v3640_v13  ;;  %v5963_v47 = vmul.f32 -1.442695, %v11563_v10  ;;  %v5961_v21 = vmul.f32 -1.442695, %v11564_v51  ;;  %v11570_v32 = vld [vmem:[#allocation73_spill] sm:$0xff] }
 0x339   : > { %v6648_v14 = vpop.eup %6647  ;;  %v4852_v15 = vrot.slane %v6646_v26, %v11488_v20  ;;  %v4055_v45 = vadd.f32 %v4023_v2, %v3579_v55  ;;  %6655 = vpow2.f32 %v4699_v50  ;;  %v10144_v22 = vadd.f32 %v9880_v8, %v3641_v52  ;;  %v11571_v8 = vld [vmem:[#allocation101_spill] sm:$0xff] }
 0x33a   : > { %11562 = vst [vmem:[#allocation152_spill] sm:$0xff] %v10134_v46  ;;  %v10141_v63 = vmul.f32 %v6648_v14, %v11565_v28  ;;  %v10147_v16 = vadd.f32 %v11567_v53, %v4112_v48  ;;  %6657 = vpow2.f32 %v5962_v18  ;;  %v10151_v10 = vmul.f32 %v8605_v0, %v10048_v56  ;;  %v11572_v1 = vld [vmem:[#allocation169_spill] sm:$0xff]  ;;  %v11580_v28 = vld [vmem:[#allocation124_spill] sm:$0xff] }
 0x33b   : > { %11566 = vst [vmem:[#allocation154_spill] sm:$0xff] %v10144_v22  ;;  %v6650_v12 = vpop.eup %6649  ;;  %v4992_v29 = vmul.f32 %v9762_v33, %v4852_v15  ;;  %v10155_v2 = vadd.f32 %v11570_v32, %v4055_v45  ;;  %6659 = vpow2.f32 %v5960_v40  ;;  %v5966_v52 = vmul.f32 -1.442695, %v11571_v8  ;;  %v11575_v48 = vld [vmem:[#allocation177_spill] sm:$0xff]  ;;  %v11583_v8 = vld [vmem:[#allocation186_spill] sm:$0xff] }
 0x33c   : > { %11568 = vst [vmem:[#allocation158_spill] sm:$0xff] %v10147_v16  ;;  %11569 = vst [vmem:[#allocation42_spill] sm:$0xff] %v10151_v10  ;;  %v6652_v3 = vpop.eup %6651  ;;  %v10158_v42 = vmul.f32 %v6650_v12, %v10018_v5  ;;  %6661 = vpow2.f32 %v5963_v47  ;;  %v5964_v13 = vmul.f32 -1.442695, %v11572_v1  ;;  %v5127_v56 = vmul.f32 %v8612_v58, %v10031_v27  ;;  %v11574_v5 = vld [vmem:[#allocation173_spill] sm:$0xff]  ;;  %v11581_v12 = vld [vmem:[#allocation46_spill] sm:$0xff] }
 0x33d   : > { %v6654_v55 = vpop.eup %6653  ;;  %v5024_v50 = vadd.f32 %v4992_v29, %v10087_v39  ;;  %6663 = vpow2.f32 %v5961_v21  ;;  %v5967_v18 = vmul.f32 -1.442695, %v11573_v34  ;;  %v10167_v40 = vadd.f32 %v4925_v43, %v10014_v17  ;;  %v11578_v39 = vld [vmem:[#allocation180_spill] sm:$0xff]  ;;  %v11579_v17 = vld [vmem:[#allocation181_spill] sm:$0xff] }
 0x33e   : > { %6665 = vpow2.f32 %v5966_v52  ;;  %v5965_v26 = vmul.f32 -1.442695, %v11574_v5  ;;  %v5970_v47 = vmul.f32 -1.442695, %v11575_v48  ;;  %v10174_v45 = vmul.f32 %v8605_v0, %v2622_v36  ;;  %v11582_v29 = vld [vmem:[#allocation193_spill] sm:$0xff]  ;;  %v11587_v5 = vld [vmem:[#allocation47_spill] sm:$0xff] }
 0x33f   : > { %v10171_v14 = vadd.f32 %v5127_v56, %v5024_v50  ;;  %6667 = vpow2.f32 %v5964_v13  ;;  %v5968_v51 = vmul.f32 -1.442695, %v11578_v39  ;;  %v4928_v27 = vmul.f32 %v9793_v41, %v4852_v15  ;;  %v11584_v15 = vld [vmem:[#allocation79_spill] sm:$0xff]  ;;  %v11585_v13 = vld [vmem:[#allocation88_spill] sm:$0xff]  ;;  %v11586_v34 = vld [vmem:[#allocation93_spill] sm:$0xff] }
 0x340   : > { %11577 = vst [vmem:[#allocation66_spill] sm:$0xff] %v10174_v45  ;;  %v5128_v21 = vmul.f32 %v8612_v58, %v10082_v19  ;;  %6669 = vpow2.f32 %v5967_v18  ;;  %v5971_v43 = vmul.f32 -1.442695, %v11579_v17  ;;  %v5969_v53 = vmul.f32 -1.442695, %v11580_v28  ;;  %v11607_v45 = vld [vmem:[#allocation145_spill] sm:$0xff] }
 0x341   : > { %11576 = vst [vmem:[#allocation179_spill] sm:$0xff] %v10171_v14  ;;  %6671 = vpow2.f32 %v5965_v26  ;;  %v4499_v32 = vadd.f32 %v11582_v29, %v11581_v12  ;;  %v4901_v36 = vmul.f32 %v9793_v41, %v8602_v4  ;;  %v5974_v52 = vmul.f32 -1.442695, %v11583_v8  ;;  %v11588_v26 = vld [vmem:[#allocation159_spill] sm:$0xff]  ;;  %v11608_v10 = vld [vmem:[#allocation176_spill] sm:$0xff] }
 0x342   : > { %6673 = vpow2.f32 %v5970_v47  ;;  %v5036_v1 = vmul.f32 %v11584_v15, %v8612_v58  ;;  %v10190_v19 = vmul.f32 %v6652_v3, %v11585_v13  ;;  %v10193_v18 = vmul.f32 %v6654_v55, %v11586_v34  ;;  %v11591_v15 = vld [vmem:[#allocation164_spill] sm:$0xff] }
 0x343   : > { %v6656_v50 = vpop.eup %6655  ;;  %6675 = vpow2.f32 %v5968_v51  ;;  %v4933_v56 = vadd.f32 %v4901_v36, %v4499_v32  ;;  %v10197_v48 = vadd.f32 %v11588_v26, %v11587_v5  ;;  %v10200_v47 = vadd.f32 %v4928_v27, %v10103_v60  ;;  %v11590_v32 = vld [vmem:[#allocation116_spill] sm:$0xff] }
 0x344   : > { %v6658_v39 = vpop.eup %6657  ;;  %v10203_v17 = vrot.slane %v6656_v50, %v11488_v20  ;;  %6677 = vpow2.f32 %v5971_v43  ;;  %v4902_v3 = vmul.f32 %v9793_v41, %v8605_v0  ;;  %v10214_v36 = vmul.f32 -1.442695, %v11590_v32  ;;  %v11594_v32 = vld [vmem:[#allocation70_spill] sm:$0xff]  ;;  %v11619_v14 = vld [vmem:[#allocation136_spill] sm:$0xff] }
 0x345   : > { %11589 = vst [vmem:[#allocation59_spill] sm:$0xff] %v10200_v47  ;;  %v6660_v51 = vpop.eup %6659  ;;  %v2056_v28 = vadd.f32 1.0, %v6658_v39  ;;  %6679 = vpow2.f32 %v5969_v53  ;;  %v10207_v55 = vadd.f32 %v5036_v1, %v4933_v56  ;;  %v4501_v12 = vadd.f32 %v10197_v48, %v11587_v5  ;;  %v11592_v53 = vld [vmem:[#allocation50_spill] sm:$0xff]  ;;  %v11617_v47 = vld [vmem:[#allocation85_spill] sm:$0xff] }
 0x346   : > { %v6662_v29 = vpop.eup %6661  ;;  %v4993_v60 = vmul.f32 %v9762_v33, %v10203_v17  ;;  %v2054_v27 = vadd.f32 1.0, %v6660_v51  ;;  %6681 = vpow2.f32 %v5974_v52  ;;  %v4934_v13 = vadd.f32 %v4902_v3, %v11591_v15  ;;  %v11593_v5 = vld [vmem:[#allocation74_spill] sm:$0xff] }
 0x347   : > { %v6664_v43 = vpop.eup %6663  ;;  %6683 = vrcp.f32 %v2056_v28  ;;  %v2057_v8 = vadd.f32 1.0, %v6662_v29  ;;  %v4935_v1 = vadd.f32 %v11592_v53, %v4501_v12  ;;  %v5035_v39 = vmul.f32 %v11593_v5, %v8612_v58  ;;  %v11595_v28 = vld [vmem:[#allocation77_spill] sm:$0xff] }
 0x348   : > { %v6666_v50 = vpop.eup %6665  ;;  %v5025_v56 = vadd.f32 %v4993_v60, %v10128_v38  ;;  %6685 = vrcp.f32 %v2054_v27  ;;  %v2055_v34 = vadd.f32 1.0, %v6664_v43  ;;  %v5037_v16 = vmul.f32 %v11594_v32, %v8612_v58  ;;  %v11597_v38 = vld [vmem:[#allocation113_spill] sm:$0xff]  ;;  %v11598_v32 = vld [vmem:[#allocation119_spill] sm:$0xff] }
 0x349   : > { %v6668_v51 = vpop.eup %6667  ;;  %6687 = vrcp.f32 %v2057_v8  ;;  %v2060_v52 = vadd.f32 1.0, %v6666_v50  ;;  %v5038_v29 = vmul.f32 %v11595_v28, %v8612_v58  ;;  %v5975_v60 = vmul.f32 -1.442695, %v11597_v38  ;;  %v11600_v38 = vld [vmem:[#allocation48_spill] sm:$0xff] }
 0x34a   : > { %v6670_v3 = vpop.eup %6669  ;;  %v10225_v15 = vadd.f32 %v5128_v21, %v5025_v56  ;;  %6689 = vrcp.f32 %v2055_v34  ;;  %v2058_v12 = vadd.f32 1.0, %v6668_v51  ;;  %v10228_v53 = vadd.f32 %v5037_v16, %v4934_v13  ;;  %v11599_v34 = vld [vmem:[#allocation114_spill] sm:$0xff] }
 0x34b   : > { %v6672_v27 = vpop.eup %6671  ;;  %6691 = vrcp.f32 %v2060_v52  ;;  %v2061_v43 = vadd.f32 1.0, %v6670_v3  ;;  %v10230_v8 = vadd.f32 %v5038_v29, %v4935_v1  ;;  %v5973_v31 = vmul.f32 -1.442695, %v11598_v32  ;;  %v11601_v52 = vld [vmem:[#allocation125_spill] sm:$0xff]  ;;  %v11603_v29 = vld [vmem:[#allocation83_spill] sm:$0xff] }
 0x34c   : > { %11596 = vst [vmem:[#allocation167_spill] sm:$0xff] %v10225_v15  ;;  %v6674_v50 = vpop.eup %6673  ;;  %6693 = vrcp.f32 %v2058_v12  ;;  %v2059_v5 = vadd.f32 1.0, %v6672_v27  ;;  %v5067_v28 = vadd.f32 %v9793_v41, %v5035_v39  ;;  %v10235_v51 = vmul.f32 -1.442695, %v11599_v34  ;;  %v11602_v1 = vld [vmem:[#allocation53_spill] sm:$0xff]  ;;  %v11605_v34 = vld [vmem:[#allocation90_spill] sm:$0xff] }
 0x34d   : > { %v6676_v21 = vpop.eup %6675  ;;  %6695 = vrcp.f32 %v2061_v43  ;;  %v2064_v56 = vadd.f32 1.0, %v6674_v50  ;;  %v4502_v3 = vadd.f32 %v11601_v52, %v11600_v38  ;;  %v4503_v12 = vadd.f32 %v11603_v29, %v11602_v1  ;;  %v11604_v43 = vld [vmem:[#allocation49_spill] sm:$0xff] }
 0x34e   : > { %v6678_v16 = vpop.eup %6677  ;;  %6697 = vrcp.f32 %v2059_v5  ;;  %v2062_v13 = vadd.f32 1.0, %v6676_v21  ;;  %v4904_v27 = vmul.f32 %v9793_v41, %v8609_v25  ;;  %v4905_v50 = vmul.f32 %v9793_v41, %v11604_v43  ;;  %v11606_v21 = vld [vmem:[#allocation92_spill] sm:$0xff] }
 0x34f   : > { %v6680_v32 = vpop.eup %6679  ;;  %6699 = vrcp.f32 %v2064_v56  ;;  %v2065_v39 = vadd.f32 1.0, %v6678_v16  ;;  %v5039_v9 = vmul.f32 %v11605_v34, %v8612_v58  ;;  %v5040_v52 = vmul.f32 %v11606_v21, %v8612_v58  ;;  %v11609_v34 = vld [vmem:[#allocation55_spill] sm:$0xff] }
 0x350   : > { %v6682_v0 = vpop.eup %6681  ;;  %6701 = vrcp.f32 %v2062_v13  ;;  %v2063_v38 = vadd.f32 1.0, %v6680_v32  ;;  %v4936_v5 = vadd.f32 %v4904_v27, %v4502_v3  ;;  %v4937_v46 = vadd.f32 %v4905_v50, %v4503_v12  ;;  %v11610_v13 = vld [vmem:[#allocation56_spill] sm:$0xff]  ;;  %v11611_v3 = vld [vmem:[#allocation129_spill] sm:$0xff] }
 0x351   : > { %v6684_v1 = vpop.eup %6683  ;;  %6703 = vrcp.f32 %v2065_v39  ;;  %v2068_v29 = vadd.f32 1.0, %v6682_v0  ;;  %v3525_v56 = vmul.f32 %v8609_v25, %v11607_v45  ;;  %v10255_v22 = vadd.f32 %v11609_v34, %v11608_v10  ;;  %v11612_v0 = vld [vmem:[#allocation109_spill] sm:$0xff]  ;;  %v11613_v39 = vld [vmem:[#allocation147_spill] sm:$0xff] }
 0x352   : > { %v6686_v16 = vpop.eup %6685  ;;  %6705 = vrcp.f32 %v2063_v38  ;;  %v10251_v43 = vadd.f32 %v5039_v9, %v4936_v5  ;;  %v4553_v27 = vadd.f32 %v11611_v3, %v11610_v13  ;;  %v10259_v21 = vadd.f32 %v5040_v52, %v4937_v46  ;;  %v11614_v10 = vld [vmem:[#allocation51_spill] sm:$0xff]  ;;  %v11615_v5 = vld [vmem:[#allocation52_spill] sm:$0xff]  ;;  %v11616_v52 = vld [vmem:[#allocation118_spill] sm:$0xff] }
 0x353   : > { %v6688_v32 = vpop.eup %6687  ;;  %6707 = vrcp.f32 %v2068_v29  ;;  %v10262_v12 = vmul.f32 %v6686_v16, %v11612_v0  ;;  %v10265_v45 = vadd.f32 %v3525_v56, %v11613_v39  ;;  %v4504_v9 = vadd.f32 %v10255_v22, %v11609_v34 }
 0x354   : > { %v6690_v50 = vpop.eup %6689  ;;  %6709 = vpow2.f32 %v10214_v36  ;;  %v4906_v38 = vmul.f32 %v9793_v41, %v11614_v10  ;;  %v4907_v29 = vmul.f32 %v9793_v41, %v11615_v5  ;;  %v4970_v36 = vmul.f32 %v9762_v33, %v11614_v10 }
 0x355   : > { %v10274_v46 = vpop.eup %6691  ;;  %6711 = vpow2.f32 %v5975_v60  ;;  %v10277_v16 = vmul.f32 %v6690_v50, %v11616_v52  ;;  %v10281_v56 = vadd.f32 %v11610_v13, %v10265_v45  ;;  %v4971_v0 = vmul.f32 %v9762_v33, %v11615_v5  ;;  %v11618_v50 = vld [vmem:[#allocation75_spill] sm:$0xff] }
 0x356   : > { %v6694_v34 = vpop.eup %6693  ;;  %6713 = vpow2.f32 %v5973_v31  ;;  %v4938_v3 = vadd.f32 %v4906_v38, %v4504_v9  ;;  %v5041_v4 = vmul.f32 %v11617_v47, %v8612_v58  ;;  %v5976_v52 = vmul.f32 -1.442695, %v11618_v50  ;;  %v11620_v31 = vld [vmem:[#allocation189_spill] sm:$0xff] }
 0x357   : > { %v10289_v60 = vpop.eup %6695  ;;  %6715 = vrcp.f32 %v5067_v28  ;;  %v4505_v15 = vadd.f32 %v10281_v56, %v11610_v13  ;;  %v5002_v23 = vadd.f32 %v4970_v36, %v11619_v14  ;;  %v5979_v9 = vmul.f32 -1.442695, %v11620_v31  ;;  %v11621_v28 = vld [vmem:[#allocation91_spill] sm:$0xff] }
 0x358   : > { %v6698_v10 = vpop.eup %6697  ;;  %6717 = vrcp.f32 %v10207_v55  ;;  %v5003_v38 = vadd.f32 %v4971_v0, %v4553_v27  ;;  %v5073_v5 = vadd.f32 %v5041_v4, %v4938_v3  ;;  %v5042_v50 = vmul.f32 %v11621_v28, %v8612_v58  ;;  %v11623_v55 = vld [vmem:[#allocation131_spill] sm:$0xff]  ;;  %v11624_v4 = vld [vmem:[#allocation110_spill] sm:$0xff] }
 0x359   : > { %v10297_v24 = vpop.eup %6699  ;;  %6719 = vrcp.f32 %v10228_v53  ;;  %v4939_v47 = vadd.f32 %v4907_v29, %v4505_v15  ;;  %v5137_v49 = vadd.f32 %v11622_v35, %v5002_v23  ;;  %v4929_v14 = vmul.f32 %v9793_v41, %v10203_v17  ;;  %v11625_v29 = vld [vmem:[#allocation106_spill] sm:$0xff] }
 0x35a   : > { %v10303_v13 = vpop.eup %6701  ;;  %6721 = vrcp.f32 %v10230_v8  ;;  %v5977_v27 = vmul.f32 -1.442695, %v11623_v55  ;;  %v5138_v36 = vadd.f32 %v11624_v4, %v5003_v38  ;;  %v4506_v23 = vadd.f32 %v9914_v61, %v11521_v6  ;;  %v11629_v6 = vld [vmem:[#allocation60_spill] sm:$0xff] }
 0x35b   : > { %v10310_v3 = vpop.eup %6703  ;;  %6723 = vpow2.f32 %v10235_v51  ;;  %v5074_v15 = vadd.f32 %v5042_v50, %v4939_v47  ;;  %v10313_v53 = vmul.f32 %v6684_v1, %v5137_v49  ;;  %v4908_v8 = vmul.f32 %v9793_v41, %v8618_v59  ;;  %v11627_v49 = vld [vmem:[#allocation117_spill] sm:$0xff]  ;;  %v11628_v1 = vld [vmem:[#allocation138_spill] sm:$0xff]  ;;  %v11630_v47 = vld [vmem:[#allocation172_spill] sm:$0xff] }
 0x35c   : > { %v10317_v35 = vpop.eup %6705  ;;  %6725 = vpow2.f32 %v5976_v52  ;;  %v10319_v17 = vmul.f32 %v6688_v32, %v5138_v36  ;;  %v5043_v0 = vmul.f32 %v11625_v29, %v8612_v58  ;;  %v5044_v51 = vmul.f32 %v11627_v49, %v8612_v58  ;;  %v11631_v41 = vld [vmem:[#allocation155_spill] sm:$0xff]  ;;  %v11632_v4 = vld [vmem:[#allocation96_spill] sm:$0xff]  ;;  %v11634_v49 = vld [vmem:[#allocation54_spill] sm:$0xff] }
 0x35d   : > { %v10325_v31 = vpop.eup %6707  ;;  %6727 = vpow2.f32 %v5979_v9  ;;  %v10330_v38 = vmul.f32 %v6694_v34, %v11628_v1  ;;  %v10333_v61 = vmul.f32 %v6698_v10, %v11629_v6  ;;  %v4940_v52 = vadd.f32 %v4908_v8, %v4506_v23  ;;  %v11635_v6 = vld [vmem:[#allocation134_spill] sm:$0xff] }
 0x35e   : > { %11626 = vst [vmem:[#allocation100_spill] sm:$0xff] %v10325_v31  ;;  %v6710_v32 = vpop.eup %6709  ;;  %6729 = vpow2.f32 %v5977_v27  ;;  %v10337_v28 = vadd.f32 %v11631_v41, %v11630_v47  ;;  %v3529_v50 = vmul.f32 %v8609_v25, %v11613_v39  ;;  %v10343_v34 = vadd.f32 %v5044_v51, %v11632_v4  ;;  %v11636_v47 = vld [vmem:[#allocation196_spill] sm:$0xff] }
 0x35f   : > { %v6712_v9 = vpop.eup %6711  ;;  %v2066_v55 = vadd.f32 1.0, %v6710_v32  ;;  %6731 = vrcp.f32 %v10251_v43  ;;  %v4005_v10 = vmul.f32 %v8618_v59, %v11588_v26  ;;  %v10348_v23 = vadd.f32 %v5043_v0, %v4940_v52 }
 0x360   : > { %v6714_v36 = vpop.eup %6713  ;;  %v2069_v27 = vadd.f32 1.0, %v6712_v9  ;;  %6733 = vrcp.f32 %v10259_v21  ;;  %v3561_v8 = vadd.f32 %v3529_v50, %v10337_v28  ;;  %v10352_v39 = vadd.f32 %v4929_v14, %v10155_v2  ;;  %v11637_v14 = vld [vmem:[#allocation95_spill] sm:$0xff] }
 0x361   : > { %v6716_v29 = vpop.eup %6715  ;;  %6735 = vrcp.f32 %v2066_v55  ;;  %v2067_v43 = vadd.f32 1.0, %v6714_v36  ;;  %v4974_v51 = vmul.f32 %v9762_v33, %v11634_v49  ;;  %v5982_v32 = vmul.f32 -1.442695, %v11635_v6  ;;  %v11638_v55 = vld [vmem:[#allocation137_spill] sm:$0xff] }
 0x362   : > { %11633 = vst [vmem:[#allocation98_spill] sm:$0xff] %v10352_v39  ;;  %v6718_v1 = vpop.eup %6717  ;;  %6737 = vrcp.f32 %v2069_v27  ;;  %v5227_v26 = vmul.f32 %v6716_v29, %v10190_v19  ;;  %v10358_v21 = vadd.f32 %v4005_v10, %v3561_v8  ;;  %v5980_v2 = vmul.f32 -1.442695, %v11636_v47  ;;  %v11639_v19 = vld [vmem:[#allocation102_spill] sm:$0xff]  ;;  %v11641_v6 = vld [vmem:[#allocation121_spill] sm:$0xff] }
 0x363   : > { %v6720_v0 = vpop.eup %6719  ;;  %6739 = vrcp.f32 %v2067_v43  ;;  %v5228_v52 = vmul.f32 %v6718_v1, %v10193_v18  ;;  %v5006_v41 = vadd.f32 %v4974_v51, %v11637_v14  ;;  %v5983_v4 = vmul.f32 -1.442695, %v11638_v55  ;;  %v11640_v51 = vld [vmem:[#allocation64_spill] sm:$0xff]  ;;  %v11642_v14 = vld [vmem:[#allocation123_spill] sm:$0xff] }
 0x364   : > { %v6722_v50 = vpop.eup %6721  ;;  %v5229_v9 = vmul.f32 %v6720_v0, %v10141_v63  ;;  %6741 = vrcp.f32 %v5073_v5  ;;  %v5045_v36 = vmul.f32 %v11639_v19, %v8612_v58  ;;  %v4189_v18 = vmul.f32 -11.0, %v11519_v11 }
 0x365   : > { %v6724_v27 = vpop.eup %6723  ;;  %v5259_v10 = vpack.c.bf16 %v5228_v52, %v5227_v26  ;;  %v5230_v29 = vmul.f32 %v6722_v50, %v10158_v42  ;;  %6743 = vrcp.f32 %v5074_v15  ;;  %v5141_v63 = vadd.f32 %v11641_v6, %v5006_v41 }
 0x366   : > { %v6726_v43 = vpop.eup %6725  ;;  %v2072_v49 = vadd.f32 1.0, %v6724_v27  ;;  %6745 = vpow2.f32 %v5982_v32  ;;  %v5077_v1 = vadd.f32 %v5045_v36, %v11640_v51  ;;  %v5981_v55 = vmul.f32 -1.442695, %v11642_v14  ;;  %v11644_v36 = vld [vmem:[#allocation140_spill] sm:$0xff]  ;;  %v11645_v27 = vld [vmem:[#allocation141_spill] sm:$0xff]  ;;  %v11652_v14 = vld [vmem:[#allocation182_spill] sm:$0xff] }
 0x367   : > { %v6728_v5 = vpop.eup %6727  ;;  %6266 = vmatprep.mubr.bf16.mxu1 %v5259_v10  ;;  %v5260_v0 = vpack.c.bf16 %v5230_v29, %v5229_v9  ;;  %v2070_v47 = vadd.f32 1.0, %v6726_v43  ;;  %6747 = vpow2.f32 %v5980_v2  ;;  %v10373_v15 = vmul.f32 %v8618_v59, %v3561_v8  ;;  %v11646_v43 = vld [vmem:[#allocation168_spill] sm:$0xff] }
 0x368   : > { %v6730_v26 = vpop.eup %6729  ;;  %6749 = vrcp.f32 %v2072_v49  ;;  %v2073_v42 = vadd.f32 1.0, %v6728_v5  ;;  %v10376_v52 = vmul.f32 %v10274_v46, %v5141_v63  ;;  %v4231_v50 = vmul.f32 1.442695, %v4189_v18  ;;  %v11647_v49 = vld [vmem:[#allocation187_spill] sm:$0xff]  ;;  %v11650_v5 = vld [vmem:[#allocation72_spill] sm:$0xff] }
 0x369   : > { %v6732_v32 = vpop.eup %6731  ;;  %6267 = vmatmul.mubr.bf16.vlgmr.msra.gmra.mrb[32].mxu1 %v5260_v0  ;;  %6751 = vrcp.f32 %v2070_v47  ;;  %v2071_v41 = vadd.f32 1.0, %v6730_v26  ;;  %v10380_v9 = vmul.f32 %v8638_v30, %v10358_v21  ;;  %v5047_v8 = vmul.f32 %v11644_v36, %v8612_v58  ;;  %v11651_v47 = vld [vmem:[#allocation115_spill] sm:$0xff]  ;;  %v11655_v36 = vld [vmem:[#allocation57_spill] sm:$0xff] }
 0x36a   : > { %v6734_v2 = vpop.eup %6733  ;;  %6753 = vrcp.f32 %v2073_v42  ;;  %v5231_v19 = vmul.f32 %v6732_v32, %v10262_v12  ;;  %v5048_v46 = vmul.f32 %v11645_v27, %v8612_v58  ;;  %v10390_v18 = vmul.f32 %v10303_v13, %v11646_v43  ;;  %v11649_v12 = vld [vmem:[#allocation65_spill] sm:$0xff]  ;;  %v11653_v13 = vld [vmem:[#allocation148_spill] sm:$0xff]  ;;  %v11656_v27 = vld [vmem:[#allocation62_spill] sm:$0xff] }
 0x36b   : > { %11643 = vst [vmem:[#allocation103_spill] sm:$0xff] %v10380_v9  ;;  %v6736_v10 = vpop.eup %6735  ;;  %6755 = vrcp.f32 %v2071_v41  ;;  %v5232_v29 = vmul.f32 %v6734_v2, %v10277_v16  ;;  %v10394_v51 = vmul.f32 %v10317_v35, %v11647_v49  ;;  %v5079_v63 = vadd.f32 %v5047_v8, %v11649_v12  ;;  %v11657_v49 = vld [vmem:[#allocation82_spill] sm:$0xff] }
 0x36c   : > { %v10396_v6 = vpop.eup %6737  ;;  %6757 = vpow2.f32 %v5983_v4  ;;  %v10400_v0 = vadd.f32 %v5048_v46, %v11650_v5  ;;  %v3087_v26 = vadd.f32 %v11652_v14, %v11651_v47  ;;  %v5986_v32 = vmul.f32 -1.442695, %v11653_v13  ;;  %v11654_v4 = vld [vmem:[#allocation122_spill] sm:$0xff]  ;;  %v11658_v5 = vld [vmem:[#allocation71_spill] sm:$0xff] }
 0x36d   : > { %11648 = vst [vmem:[#allocation185_spill] sm:$0xff] %v10396_v6  ;;  %v6740_v16 = vpop.eup %6739  ;;  %v5261_v42 = vpack.c.bf16 %v5232_v29, %v5231_v19  ;;  %6759 = vpow2.f32 %v5981_v55  ;;  %v3533_v35 = vmul.f32 %v8609_v25, %v10337_v28  ;;  %v5984_v2 = vmul.f32 -1.442695, %v11654_v4  ;;  %v11661_v4 = vld [vmem:[#allocation128_spill] sm:$0xff]  ;;  %v11691_v6 = vld [vmem:[#allocation130_spill] sm:$0xff] }
 0x36e   : > { %v6742_v41 = vpop.eup %6741  ;;  %6761 = vrcp.f32 %v10348_v23  ;;  %v5987_v8 = vmul.f32 -1.442695, %v11655_v36  ;;  %v4978_v46 = vmul.f32 %v9762_v33, %v11656_v27  ;;  %v4009_v28 = vmul.f32 %v8618_v59, %v10265_v45  ;;  %v11662_v36 = vld [vmem:[#allocation63_spill] sm:$0xff] }
 0x36f   : > { %v6744_v43 = vpop.eup %6743  ;;  %6270 = vmatprep.mubr.bf16.mxu1 %v5261_v42  ;;  %v5233_v19 = vmul.f32 %v6742_v41, %v10313_v53  ;;  %6763 = vrcp.f32 %v10343_v34  ;;  %v10414_v55 = vadd.f32 %v3533_v35, %v3087_v26  ;;  %v5985_v12 = vmul.f32 -1.442695, %v11657_v49  ;;  %v11659_v34 = vld [vmem:[#allocation135_spill] sm:$0xff] }
 0x370   : > { %v6746_v29 = vpop.eup %6745  ;;  %v5234_v23 = vmul.f32 %v6744_v43, %v10319_v17  ;;  %6765 = vpow2.f32 %v4231_v50  ;;  %v5010_v47 = vadd.f32 %v4978_v46, %v11658_v5  ;;  %v5049_v42 = vmul.f32 %v11659_v34, %v8612_v58  ;;  %v11664_v43 = vld [vmem:[#allocation174_spill] sm:$0xff]  ;;  %v11667_v5 = vld [vmem:[#allocation195_spill] sm:$0xff] }
 0x371   : > { %v6748_v33 = vpop.eup %6747  ;;  %v2076_v14 = vadd.f32 1.0, %v6746_v29  ;;  %6767 = vrcp.f32 %v5077_v1  ;;  %v10422_v53 = vadd.f32 %v4009_v28, %v10414_v55  ;;  %v3537_v17 = vmul.f32 %v8609_v25, %v3087_v26  ;;  %v11666_v26 = vld [vmem:[#allocation191_spill] sm:$0xff] }
 0x372   : > { %v10426_v13 = vpop.eup %6749  ;;  %v5262_v45 = vpack.c.bf16 %v5234_v23, %v5233_v19  ;;  %v2074_v35 = vadd.f32 1.0, %v6748_v33  ;;  %6769 = vpow2.f32 %v5986_v32  ;;  %v4193_v41 = vmul.f32 -15.0, %v11519_v11  ;;  %v11665_v32 = vld [vmem:[#allocation178_spill] sm:$0xff]  ;;  %v11668_v33 = vld [vmem:[#allocation143_spill] sm:$0xff] }
 0x373   : > { %11660 = vst [vmem:[#allocation73_spill] sm:$0xff] %v10426_v13  ;;  %v10429_v50 = vpop.eup %6751  ;;  %6771 = vrcp.f32 %v2076_v14  ;;  %v5081_v1 = vadd.f32 %v5049_v42, %v11661_v4  ;;  %v5145_v27 = vadd.f32 %v11662_v36, %v5010_v47  ;;  %v5051_v19 = vmul.f32 %v11664_v43, %v8612_v58  ;;  %v11669_v14 = vld [vmem:[#allocation197_spill] sm:$0xff]  ;;  %v11672_v36 = vld [vmem:[#allocation68_spill] sm:$0xff]  ;;  %v11673_v43 = vld [vmem:[#allocation183_spill] sm:$0xff] }
 0x374   : > { %v10434_v46 = vpop.eup %6753  ;;  %6271 = vmatmul.mubr.bf16.gmra.mrb[36].mxu1 %v5262_v45  ;;  %6773 = vrcp.f32 %v2074_v35  ;;  %v5052_v28 = vmul.f32 %v11665_v32, %v8612_v58  ;;  %v10441_v29 = vmul.f32 %v6736_v10, %v11666_v26  ;;  %v10449_v47 = vmul.f32 %v6740_v16, %v11667_v5  ;;  %v11670_v45 = vld [vmem:[#allocation69_spill] sm:$0xff] }
 0x375   : > { %11663 = vst [vmem:[#allocation101_spill] sm:$0xff] %v10434_v46  ;;  %v10443_v23 = vpop.eup %6755  ;;  %6775 = vpow2.f32 %v5984_v2  ;;  %v10446_v49 = vmul.f32 %v10297_v24, %v5145_v27  ;;  %v10453_v34 = vadd.f32 %v11669_v14, %v11668_v33  ;;  %v5083_v35 = vadd.f32 %v5051_v19, %v11670_v45  ;;  %v11671_v4 = vld [vmem:[#allocation89_spill] sm:$0xff]  ;;  %v11676_v19 = vld [vmem:[#allocation156_spill] sm:$0xff] }
 0x376   : > { %v6758_v42 = vpop.eup %6757  ;;  %6777 = vpow2.f32 %v5987_v8  ;;  %v5084_v10 = vadd.f32 %v5052_v28, %v11671_v4  ;;  %v10459_v32 = vadd.f32 %v11673_v43, %v11672_v36  ;;  %v4239_v27 = vmul.f32 1.442695, %v4193_v41  ;;  %v11675_v8 = vld [vmem:[#allocation162_spill] sm:$0xff]  ;;  %v11678_v41 = vld [vmem:[#allocation105_spill] sm:$0xff] }
 0x377   : > { %v6760_v2 = vpop.eup %6759  ;;  %v2077_v24 = vadd.f32 1.0, %v6758_v42  ;;  %6779 = vpow2.f32 %v5985_v12  ;;  %v10462_v16 = vadd.f32 %v3537_v17, %v10453_v34  ;;  %v4484_v28 = vmul.f32 %v8638_v30, %v11676_v19  ;;  %v11677_v17 = vld [vmem:[#allocation198_spill] sm:$0xff] }
 0x378   : > { %v6762_v26 = vpop.eup %6761  ;;  %v2075_v5 = vadd.f32 1.0, %v6760_v2  ;;  %6781 = vrcp.f32 %v5079_v63  ;;  %v4044_v33 = vadd.f32 %v11675_v8, %v10459_v32  ;;  %v4485_v12 = vmul.f32 %v8638_v30, %v10197_v48 }
 0x379   : > { %11674 = vst [vmem:[#allocation169_spill] sm:$0xff] %v10462_v16  ;;  %v6764_v14 = vpop.eup %6763  ;;  %v5235_v45 = vmul.f32 %v6762_v26, %v10330_v38  ;;  %v4045_v42 = vadd.f32 %v10373_v15, %v10462_v16  ;;  %v10475_v4 = vadd.f32 %v11678_v41, %v11677_v17  ;;  %6783 = vrcp.f32 %v2077_v24  ;;  %v10496_v41 = vld [vmem:[%s7920_s29] sm:$0xff] }
 0x37a   : > { %v6766_v63 = vpop.eup %6765  ;;  %v5236_v43 = vmul.f32 %v6764_v14, %v10333_v61  ;;  %v10478_v2 = vadd.f32 %v4484_v28, %v4044_v33  ;;  %v4628_v8 = vmul.f32 -18.0, %v11519_v11  ;;  %6785 = vrcp.f32 %v10400_v0  ;;  %v11680_v61 = vld [vmem:[#allocation112_spill] sm:$0xff] }
 0x37b   : > { %v6768_v38 = vpop.eup %6767  ;;  %v4350_v15 = vrot.slane %v6766_v63, %v11488_v20  ;;  %v10483_v48 = vadd.f32 %v4485_v12, %v4045_v42  ;;  %v4629_v26 = vmul.f32 -19.0, %v11519_v11  ;;  %v5046_v14 = vmul.f32 %v11680_v61, %v8612_v58  ;;  %v10500_v42 = vld [vmem:[%s7918_s30] sm:$0xff] }
 0x37c   : > { %v10486_v19 = vpop.eup %6769  ;;  %v5263_v24 = vpack.c.bf16 %v5236_v43, %v5235_v45  ;;  %v10491_v33 = vmul.f32 %v6768_v38, %v10376_v52  ;;  %6787 = vpow2.f32 %v4239_v27  ;;  %v4017_v52 = vmul.f32 %v8618_v59, %v10414_v55  ;;  %v11682_v27 = vld [vmem:[#allocation81_spill] sm:$0xff]  ;;  %v11683_v61 = vld [vmem:[#allocation99_spill] sm:$0xff]  ;;  %v11686_v55 = vld [vmem:[#allocation80_spill] sm:$0xff] }
 0x37d   : > { %11679 = vst [vmem:[#allocation171_spill] sm:$0xff] %v10486_v19  ;;  %v10493_v28 = vpop.eup %6771  ;;  %6789 = vrcp.f32 %v2075_v5  ;;  %v4477_v17 = vmul.f32 0.0, %v4350_v15  ;;  %v4911_v0 = vmul.f32 %v10496_v41, %v4350_v15  ;;  %v4975_v12 = vmul.f32 %v10500_v42, %v4350_v15  ;;  %v11684_v15 = vld [vmem:[#allocation87_spill] sm:$0xff] }
 0x37e   : > { %11681 = vst [vmem:[#allocation173_spill] sm:$0xff] %v10493_v28  ;;  %v10503_v45 = vpop.eup %6773  ;;  %6274 = vmatprep.mubr.bf16.mxu1 %v5263_v24  ;;  %v10509_v63 = vmul.f32 %v11682_v27, %v8612_v58  ;;  %6791 = vrcp.f32 %v5081_v1  ;;  %v4677_v5 = vmul.f32 1.442695, %v4628_v8  ;;  %v4679_v39 = vmul.f32 1.442695, %v4629_v26  ;;  %v11687_v27 = vld [vmem:[#allocation132_spill] sm:$0xff] }
 0x37f   : > { %v6776_v43 = vpop.eup %6775  ;;  %v4509_v38 = vadd.f32 %v4477_v17, %v10358_v21  ;;  %v4557_v28 = vadd.f32 %v4477_v17, %v11683_v61  ;;  %v5055_v46 = vmul.f32 %v11684_v15, %v8612_v58  ;;  %6793 = vrcp.f32 %v5083_v35  ;;  %v11688_v26 = vld [vmem:[#allocation166_spill] sm:$0xff] }
 0x380   : > { %v10515_v13 = vpop.eup %6777  ;;  %v2078_v24 = vadd.f32 1.0, %v6776_v43  ;;  %v5056_v19 = vmul.f32 %v11686_v55, %v8612_v58  ;;  %v10521_v1 = vmul.f32 %v10429_v50, %v11687_v27  ;;  %6795 = vrcp.f32 %v5084_v10  ;;  %v11689_v43 = vld [vmem:[#allocation175_spill] sm:$0xff]  ;;  %v11692_v27 = vld [vmem:[#allocation153_spill] sm:$0xff] }
 0x381   : > { %11685 = vst [vmem:[#allocation177_spill] sm:$0xff] %v10515_v13  ;;  %v6780_v8 = vpop.eup %6779  ;;  %v4943_v9 = vadd.f32 %v4911_v0, %v4509_v38  ;;  %v5007_v21 = vadd.f32 %v4975_v12, %v4557_v28  ;;  %v10525_v17 = vmul.f32 %v11688_v26, %v8612_v58  ;;  %v10529_v35 = vmul.f32 %v11689_v43, %v8612_v58  ;;  %v11690_v13 = vld [vmem:[#allocation199_spill] sm:$0xff]  ;;  %v11693_v0 = vld [vmem:[#allocation144_spill] sm:$0xff] }
 0x382   : > { %v6782_v61 = vpop.eup %6781  ;;  %v2079_v15 = vadd.f32 1.0, %v6780_v8  ;;  %v5087_v55 = vadd.f32 %v5055_v46, %v11690_v13  ;;  %v5088_v31 = vadd.f32 %v5056_v19, %v11691_v6  ;;  %6797 = vrcp.f32 %v2078_v24  ;;  %v11694_v38 = vld [vmem:[#allocation84_spill] sm:$0xff]  ;;  %v11695_v8 = vld [vmem:[#allocation127_spill] sm:$0xff] }
 0x383   : > { %v5078_v50 = vadd.f32 %v5046_v14, %v4943_v9  ;;  %v5142_v16 = vadd.f32 %v11692_v27, %v5007_v21  ;;  %v10535_v10 = vmul.f32 %v6782_v61, %v10390_v18  ;;  %v10537_v28 = vpop.eup %6783  ;;  %v10541_v12 = vmul.f32 %v10443_v23, %v11693_v0  ;;  %v11696_v13 = vld [vmem:[#allocation203_spill] sm:$0xff]  ;;  %v11697_v6 = vld [vmem:[#allocation200_spill] sm:$0xff] }
 0x384   : > { %6799 = vrcp.f32 %v2079_v15  ;;  %v10545_v26 = vadd.f32 %v11695_v8, %v11694_v38  ;;  %v10549_v9 = vadd.f32 %v11697_v6, %v11696_v13  ;;  %v6786_v46 = vpop.eup %6785  ;;  %v3540_v18 = vmul.f32 %v8609_v25, %v11672_v36  ;;  %v11700_v8 = vld [vmem:[#allocation67_spill] sm:$0xff] }
 0x385   : > { %v5174_v19 = vmul.f32 %v10289_v60, %v5142_v16  ;;  %6801 = vrcp.f32 %v5078_v50  ;;  %v3541_v14 = vmul.f32 %v8609_v25, %v10453_v34  ;;  %v10557_v24 = vmul.f32 %v6786_v46, %v10394_v51 }
 0x386   : > { %v6788_v23 = vpop.eup %6787  ;;  %6803 = vpow2.f32 %v4677_v5  ;;  %v4488_v21 = vmul.f32 %v8638_v30, %v10255_v22  ;;  %v4489_v61 = vmul.f32 %v8638_v30, %v10281_v56  ;;  %v10565_v36 = vadd.f32 %v3540_v18, %v10545_v26  ;;  %v11698_v5 = vld [vmem:[#allocation201_spill] sm:$0xff]  ;;  %v11699_v22 = vld [vmem:[#allocation150_spill] sm:$0xff] }
 0x387   : > { %v6790_v15 = vpop.eup %6789  ;;  %v4366_v60 = vrot.slane %v6788_v23, %v11488_v20  ;;  %6805 = vpow2.f32 %v4679_v39  ;;  %v10568_v34 = vadd.f32 %v3541_v14, %v10549_v9  ;;  %v5265_v51 = vpack.c.bf16 %v10557_v24, %v10535_v10  ;;  %v11701_v18 = vld [vmem:[#allocation126_spill] sm:$0xff] }
 0x388   : > { %v6792_v16 = vpop.eup %6791  ;;  %6807 = vrcp.f32 %v5087_v55  ;;  %v10574_v43 = vadd.f32 %v11699_v22, %v11698_v5  ;;  %v4632_v56 = vmul.f32 -22.0, %v11519_v11  ;;  %v4048_v10 = vadd.f32 %v11700_v8, %v10565_v36  ;;  %v11702_v8 = vld [vmem:[#allocation111_spill] sm:$0xff] }
 0x389   : > { %v4481_v50 = vmul.f32 0.0, %v4366_v60  ;;  %v4915_v39 = vmul.f32 %v10496_v41, %v4366_v60  ;;  %v4979_v27 = vmul.f32 %v10500_v42, %v4366_v60  ;;  %v10580_v0 = vmul.f32 %v6792_v16, %v10446_v49  ;;  %v6794_v38 = vpop.eup %6793 }
 0x38a   : > { %6809 = vrcp.f32 %v5088_v31  ;;  %v4049_v55 = vadd.f32 %v4017_v52, %v10568_v34  ;;  %v4633_v13 = vmul.f32 -23.0, %v11519_v11  ;;  %v6796_v6 = vpop.eup %6795  ;;  %v10589_v23 = vmul.f32 %v6794_v38, %v10441_v29  ;;  %v11704_v38 = vld [vmem:[#allocation170_spill] sm:$0xff] }
 0x38b   : > { %v4513_v46 = vadd.f32 %v4481_v50, %v10422_v53  ;;  %v4561_v14 = vadd.f32 %v4481_v50, %v11701_v18  ;;  %v4685_v24 = vmul.f32 1.442695, %v4632_v56  ;;  %v10592_v49 = vmul.f32 %v6796_v6, %v10449_v47 }
 0x38c   : > { %v10594_v31 = vadd.f32 %v4488_v21, %v4048_v10  ;;  %v10596_v60 = vadd.f32 %v4489_v61, %v4049_v55  ;;  %v4687_v16 = vmul.f32 1.442695, %v4633_v13  ;;  %v10598_v52 = vpop.eup %6797  ;;  %v10602_v50 = vmul.f32 %v11702_v8, %v8612_v58  ;;  %v11703_v21 = vld [vmem:[#allocation194_spill] sm:$0xff] }
 0x38d   : > { %v4947_v5 = vadd.f32 %v4915_v39, %v4513_v46  ;;  %v5011_v22 = vadd.f32 %v4979_v27, %v4561_v14  ;;  %6811 = vpow2.f32 %v4685_v24  ;;  %v5267_v47 = vpack.c.bf16 %v10592_v49, %v10589_v23  ;;  %v11728_v49 = vld [vmem:[#allocation44_spill] sm:$0xff] }
 0x38e   : > { %v10604_v29 = vpop.eup %6799  ;;  %6813 = vpow2.f32 %v4687_v16  ;;  %v10610_v61 = vmul.f32 %v11703_v21, %v8612_v58  ;;  %v5059_v56 = vmul.f32 %v9769_v54, %v8612_v58  ;;  %v5060_v55 = vmul.f32 %v9804_v37, %v8612_v58  ;;  %v11705_v54 = vld [vmem:[#allocation202_spill] sm:$0xff] }
 0x38f   : > { %v6802_v39 = vpop.eup %6801  ;;  %v5082_v27 = vadd.f32 %v10509_v63, %v4947_v5  ;;  %v5146_v10 = vadd.f32 %v11704_v38, %v5011_v22  ;;  %v10620_v13 = vmul.f32 %v10503_v45, %v10052_v7  ;;  %v10624_v14 = vmul.f32 %v6790_v15, %v10110_v44  ;;  %v11706_v44 = vld [vmem:[#allocation151_spill] sm:$0xff] }
 0x390   : > { %v6804_v6 = vpop.eup %6803  ;;  %v5238_v46 = vmul.f32 %v6802_v39, %v5174_v19  ;;  %v5091_v18 = vadd.f32 %v5059_v56, %v10098_v57  ;;  %v10628_v24 = vadd.f32 %v11705_v54, %v10045_v62  ;;  %v5092_v7 = vadd.f32 %v5060_v55, %v10167_v40  ;;  %v11707_v15 = vld [vmem:[#allocation107_spill] sm:$0xff]  ;;  %v11710_v54 = vld [vmem:[#allocation169_spill] sm:$0xff] }
 0x391   : > { %v6806_v63 = vpop.eup %6805  ;;  %v5178_v16 = vmul.f32 %v10310_v3, %v5146_v10  ;;  %6815 = vrcp.f32 %v5082_v27  ;;  %v4812_v37 = vrot.slane %v6804_v6, %v11488_v20  ;;  %v10637_v5 = vadd.f32 %v11707_v15, %v11706_v44  ;;  %v11708_v27 = vld [vmem:[#allocation139_spill] sm:$0xff]  ;;  %v11713_v15 = vld [vmem:[#allocation185_spill] sm:$0xff] }
 0x392   : > { %v6808_v45 = vpop.eup %6807  ;;  %v5264_v19 = vpack.c.bf16 %v5238_v46, %v10491_v33  ;;  %v4816_v57 = vrot.slane %v6806_v63, %v11488_v20  ;;  %6817 = vrcp.f32 %v5091_v18  ;;  %v3544_v21 = vmul.f32 %v8609_v25, %v10545_v26 }
 0x393   : > { %v4918_v62 = vmul.f32 %v10496_v41, %v4812_v37  ;;  %v4982_v22 = vmul.f32 %v10500_v42, %v4812_v37  ;;  %v10642_v3 = vmul.f32 %v6808_v45, %v10521_v1  ;;  %6819 = vrcp.f32 %v5092_v7  ;;  %v11711_v37 = vld [vmem:[#allocation192_spill] sm:$0xff] }
 0x394   : > { %v6810_v8 = vpop.eup %6809  ;;  %6275 = vmatmul.mubr.bf16.gmra.mrb[40].mxu1 %v5264_v19  ;;  %v4919_v40 = vmul.f32 %v10496_v41, %v4816_v57  ;;  %v4983_v33 = vmul.f32 %v10500_v42, %v4816_v57  ;;  %v3545_v56 = vmul.f32 %v8609_v25, %v10549_v9  ;;  %v4020_v10 = vmul.f32 %v8618_v59, %v10459_v32  ;;  %v11712_v19 = vld [vmem:[#allocation100_spill] sm:$0xff] }
 0x395   : > { %6278 = vmatprep.mubr.bf16.mxu1 %v5265_v51  ;;  %v4950_v39 = vadd.f32 %v4918_v62, %v10478_v2  ;;  %v5014_v38 = vadd.f32 %v4982_v22, %v11708_v27  ;;  %v10653_v1 = vmul.f32 %v6810_v8, %v10541_v12  ;;  %v3576_v26 = vadd.f32 %v3544_v21, %v10628_v24  ;;  %v11709_v2 = vld [vmem:[#allocation76_spill] sm:$0xff]  ;;  %v11714_v21 = vld [vmem:[#allocation165_spill] sm:$0xff] }
 0x396   : > { %v4951_v55 = vadd.f32 %v4919_v40, %v10483_v48  ;;  %v5015_v6 = vadd.f32 %v4983_v33, %v10475_v4  ;;  %v3577_v46 = vadd.f32 %v3545_v56, %v10637_v5  ;;  %v4021_v63 = vmul.f32 %v8618_v59, %v11710_v54 }
 0x397   : > { %v6812_v9 = vpop.eup %6811  ;;  %v5085_v51 = vadd.f32 %v10525_v17, %v4950_v39  ;;  %v5149_v18 = vadd.f32 %v11709_v2, %v5014_v38  ;;  %v5269_v12 = vpack.c.bf16 %v10653_v1, %v10642_v3  ;;  %v4052_v45 = vadd.f32 %v4020_v10, %v3576_v26  ;;  %v11715_v39 = vld [vmem:[#allocation103_spill] sm:$0xff] }
 0x398   : > { %v6814_v32 = vpop.eup %6813  ;;  %v5086_v48 = vadd.f32 %v10529_v35, %v4951_v55  ;;  %v5150_v4 = vadd.f32 %v11711_v37, %v5015_v6  ;;  %v4828_v7 = vrot.slane %v6812_v9, %v11488_v20  ;;  %v4053_v44 = vadd.f32 %v4021_v63, %v3577_v46  ;;  %v11716_v6 = vld [vmem:[#allocation133_spill] sm:$0xff] }
 0x399   : > { %v5181_v57 = vmul.f32 %v11712_v19, %v5149_v18  ;;  %6821 = vrcp.f32 %v5085_v51  ;;  %v4832_v17 = vrot.slane %v6814_v32, %v11488_v20  ;;  %v10678_v56 = vadd.f32 %v11714_v21, %v4052_v45  ;;  %v11717_v46 = vld [vmem:[#allocation157_spill] sm:$0xff]  ;;  %v11720_v45 = vld [vmem:[#allocation108_spill] sm:$0xff]  ;;  %v11726_v21 = vld [vmem:[#allocation179_spill] sm:$0xff] }
 0x39a   : > { %v5182_v62 = vmul.f32 %v11713_v15, %v5150_v4  ;;  %6823 = vrcp.f32 %v5086_v48  ;;  %v4922_v22 = vmul.f32 %v10496_v41, %v4828_v7  ;;  %v4986_v8 = vmul.f32 %v10500_v42, %v4828_v7  ;;  %v11718_v9 = vld [vmem:[#allocation61_spill] sm:$0xff] }
 0x39b   : > { %v6816_v40 = vpop.eup %6815  ;;  %v4923_v35 = vmul.f32 %v10496_v41, %v4832_v17  ;;  %v4987_v33 = vmul.f32 %v10500_v42, %v4832_v17  ;;  %v10681_v27 = vadd.f32 %v11715_v39, %v4053_v44  ;;  %v10687_v51 = vadd.f32 %v11718_v9, %v11717_v46  ;;  %v11719_v48 = vld [vmem:[#allocation97_spill] sm:$0xff]  ;;  %v11730_v9 = vld [vmem:[#allocation98_spill] sm:$0xff] }
 0x39c   : > { %v6818_v38 = vpop.eup %6817  ;;  %v5242_v10 = vmul.f32 %v6816_v40, %v5178_v16  ;;  %v4954_v55 = vadd.f32 %v4922_v22, %v10594_v31  ;;  %v5018_v26 = vadd.f32 %v4986_v8, %v11716_v6  ;;  %v4636_v32 = vmul.f32 -26.0, %v11519_v11  ;;  %v11722_v44 = vld [vmem:[#allocation73_spill] sm:$0xff]  ;;  %v11724_v8 = vld [vmem:[#allocation204_spill] sm:$0xff] }
 0x39d   : > { %v6820_v2 = vpop.eup %6819  ;;  %v4955_v18 = vadd.f32 %v4923_v35, %v10596_v60  ;;  %v5019_v54 = vadd.f32 %v4987_v33, %v10574_v43  ;;  %v10692_v63 = vmul.f32 %v6818_v38, %v10620_v13  ;;  %v4637_v43 = vmul.f32 -27.0, %v11519_v11  ;;  %v11721_v13 = vld [vmem:[#allocation171_spill] sm:$0xff]  ;;  %v11725_v35 = vld [vmem:[#allocation206_spill] sm:$0xff] }
 0x39e   : > { %v5266_v16 = vpack.c.bf16 %v5242_v10, %v10580_v0  ;;  %v5089_v31 = vadd.f32 %v10602_v50, %v4954_v55  ;;  %v5153_v37 = vadd.f32 %v11719_v48, %v5018_v26  ;;  %v10699_v4 = vmul.f32 %v6820_v2, %v10624_v14  ;;  %v11727_v38 = vld [vmem:[#allocation167_spill] sm:$0xff]  ;;  %v11731_v2 = vld [vmem:[#allocation177_spill] sm:$0xff] }
 0x39f   : > { %v5090_v7 = vadd.f32 %v10610_v61, %v4955_v18  ;;  %v5154_v60 = vadd.f32 %v11720_v45, %v5019_v54  ;;  %v4693_v19 = vmul.f32 1.442695, %v4636_v32  ;;  %v2080_v17 = vadd.f32 1.0, %v11721_v13  ;;  %v11723_v61 = vld [vmem:[#allocation101_spill] sm:$0xff]  ;;  %v11729_v26 = vld [vmem:[#allocation59_spill] sm:$0xff]  ;;  %v11732_v32 = vld [vmem:[#allocation142_spill] sm:$0xff] }
 0x3a0   : > { %6279 = vmatmul.mubr.bf16.gmra.mrb[44].mxu1 %v5266_v16  ;;  %v5185_v15 = vmul.f32 %v11722_v44, %v5153_v37  ;;  %6825 = vrcp.f32 %v5089_v31  ;;  %v5271_v0 = vpack.c.bf16 %v10699_v4, %v10692_v63  ;;  %v4497_v50 = vmul.f32 %v8638_v30, %v10422_v53  ;;  %v11734_v37 = vld [vmem:[#allocation188_spill] sm:$0xff] }
 0x3a1   : > { %6282 = vmatprep.mubr.bf16.mxu1 %v5267_v47  ;;  %v5186_v14 = vmul.f32 %v11723_v61, %v5154_v60  ;;  %6827 = vrcp.f32 %v5090_v7  ;;  %v4695_v22 = vmul.f32 1.442695, %v4637_v43  ;;  %v5063_v40 = vmul.f32 %v11724_v8, %v8612_v58  ;;  %v11735_v60 = vld [vmem:[#allocation42_spill] sm:$0xff] }
 0x3a2   : > { %6829 = vpow2.f32 %v4693_v19  ;;  %v5064_v33 = vmul.f32 %v11725_v35, %v8612_v58  ;;  %v10720_v39 = vmul.f32 %v10598_v52, %v11726_v21  ;;  %v10724_v23 = vmul.f32 %v10604_v29, %v11727_v38 }
 0x3a3   : > { %v6822_v53 = vpop.eup %6821  ;;  %6831 = vpow2.f32 %v4695_v22  ;;  %v2591_v47 = vmul.f32 %v11724_v8, %v11728_v49  ;;  %v2592_v10 = vmul.f32 %v11725_v35, %v11728_v49  ;;  %v5095_v46 = vadd.f32 %v5063_v40, %v11729_v26  ;;  %v11737_v22 = vld [vmem:[#allocation152_spill] sm:$0xff]  ;;  %v11738_v8 = vld [vmem:[#allocation146_spill] sm:$0xff] }
 0x3a4   : > { %v6824_v55 = vpop.eup %6823  ;;  %6833 = vrcp.f32 %v2080_v17  ;;  %v5245_v6 = vmul.f32 %v6822_v53, %v5181_v57  ;;  %v5096_v52 = vadd.f32 %v5064_v33, %v11730_v9  ;;  %v10733_v18 = vadd.f32 1.0, %v11731_v2  ;;  %v11733_v57 = vld [vmem:[#allocation154_spill] sm:$0xff]  ;;  %v11740_v2 = vld [vmem:[#allocation205_spill] sm:$0xff] }
 0x3a5   : > { %v5246_v54 = vmul.f32 %v6824_v55, %v5182_v62  ;;  %v2623_v29 = vadd.f32 %v11725_v35, %v2591_v47  ;;  %v2624_v16 = vadd.f32 %v11732_v32, %v2592_v10  ;;  %6835 = vrcp.f32 %v5095_v46  ;;  %v11736_v62 = vld [vmem:[#allocation66_spill] sm:$0xff]  ;;  %v11739_v35 = vld [vmem:[#allocation120_spill] sm:$0xff] }
 0x3a6   : > { %v3548_v31 = vmul.f32 %v8609_v25, %v10628_v24  ;;  %v3549_v48 = vmul.f32 %v8609_v25, %v10637_v5  ;;  %v10743_v7 = vadd.f32 %v11734_v37, %v11733_v57  ;;  %6837 = vrcp.f32 %v5096_v52 }
 0x3a7   : > { %v5268_v45 = vpack.c.bf16 %v5246_v54, %v5245_v6  ;;  %v3102_v43 = vadd.f32 %v11735_v60, %v2623_v29  ;;  %v3103_v19 = vadd.f32 %v11736_v62, %v2624_v16  ;;  %v4024_v13 = vmul.f32 %v8618_v59, %v10565_v36  ;;  %v11741_v54 = vld [vmem:[#allocation184_spill] sm:$0xff] }
 0x3a8   : > { %v4025_v17 = vmul.f32 %v8618_v59, %v10568_v34  ;;  %v4640_v24 = vmul.f32 -30.0, %v11519_v11  ;;  %v4641_v5 = vmul.f32 -31.0, %v11519_v11  ;;  %v4114_v40 = vadd.f32 %v11738_v8, %v11737_v22 }
 0x3a9   : > { %6283 = vmatmul.mubr.bf16.gmra.mrb[48].mxu1 %v5268_v45  ;;  %v3580_v44 = vadd.f32 %v3548_v31, %v3102_v43  ;;  %v3581_v61 = vadd.f32 %v3549_v48, %v3103_v19  ;;  %v4546_v33 = vmul.f32 %v8638_v30, %v11739_v35  ;;  %v4642_v53 = vmul.f32 -32.0, %v11519_v11  ;;  %v11742_v48 = vld [vmem:[#allocation45_spill] sm:$0xff]  ;;  %v11743_v45 = vld [vmem:[#allocation104_spill] sm:$0xff]  ;;  %v11744_v43 = vld [vmem:[#allocation78_spill] sm:$0xff] }
 0x3aa   : > { %v6826_v21 = vpop.eup %6825  ;;  %6286 = vmatprep.mubr.bf16.mxu1 %v5269_v12  ;;  %v4701_v36 = vmul.f32 1.442695, %v4640_v24  ;;  %v4703_v34 = vmul.f32 1.442695, %v4641_v5  ;;  %v2593_v38 = vmul.f32 %v11732_v32, %v11728_v49  ;;  %v3072_v57 = vmul.f32 %v11742_v48, %v2623_v29  ;;  %v11745_v24 = vld [vmem:[#allocation58_spill] sm:$0xff] }
 0x3ab   : > { %v6828_v47 = vpop.eup %6827  ;;  %v5249_v10 = vmul.f32 %v6826_v21, %v5185_v15  ;;  %v4056_v55 = vadd.f32 %v4024_v13, %v3580_v44  ;;  %v4057_v6 = vadd.f32 %v4025_v17, %v3581_v61  ;;  %v10763_v26 = vadd.f32 %v4546_v33, %v4114_v40  ;;  %v11746_v61 = vld [vmem:[#allocation160_spill] sm:$0xff]  ;;  %v11747_v40 = vld [vmem:[#allocation43_spill] sm:$0xff]  ;;  %v11753_v48 = vld [vmem:[#allocation158_spill] sm:$0xff] }
 0x3ac   : > { %v6830_v46 = vpop.eup %6829  ;;  %v5250_v9 = vmul.f32 %v6828_v47, %v5186_v14  ;;  %6839 = vpow2.f32 %v4701_v36  ;;  %v4705_v52 = vmul.f32 1.442695, %v4642_v53  ;;  %v2625_v3 = vadd.f32 %v11740_v2, %v2593_v38  ;;  %v11750_v47 = vld [vmem:[#allocation161_spill] sm:$0xff] }
 0x3ad   : > { %v6832_v1 = vpop.eup %6831  ;;  %v4844_v12 = vrot.slane %v6830_v46, %v11488_v20  ;;  %v4528_v11 = vadd.f32 %v11741_v54, %v4056_v55  ;;  %v4529_v16 = vadd.f32 %v4497_v50, %v4057_v6  ;;  %6841 = vpow2.f32 %v4703_v34  ;;  %v11748_v34 = vld [vmem:[#allocation149_spill] sm:$0xff] }
 0x3ae   : > { %v10768_v49 = vpop.eup %6833  ;;  %v5270_v15 = vpack.c.bf16 %v5250_v9, %v5249_v10  ;;  %v4848_v31 = vrot.slane %v6832_v1, %v11488_v20  ;;  %6843 = vpow2.f32 %v4705_v52  ;;  %v5061_v60 = vmul.f32 %v11743_v45, %v8612_v58  ;;  %v11752_v1 = vld [vmem:[#allocation163_spill] sm:$0xff]  ;;  %v11754_v45 = vld [vmem:[#allocation86_spill] sm:$0xff] }
 0x3af   : > { %v4926_v14 = vmul.f32 %v10496_v41, %v4844_v12  ;;  %v4990_v37 = vmul.f32 %v10500_v42, %v4844_v12  ;;  %v5062_v62 = vmul.f32 %v11744_v43, %v8612_v58  ;;  %v6836_v50 = vpop.eup %6835  ;;  %v3104_v17 = vadd.f32 %v3072_v57, %v2625_v3 }
 0x3b0   : > { %v4927_v19 = vmul.f32 %v10496_v41, %v4848_v31  ;;  %v4991_v13 = vmul.f32 %v10500_v42, %v4848_v31  ;;  %v3550_v5 = vmul.f32 %v8609_v25, %v11745_v24  ;;  %v6838_v29 = vpop.eup %6837  ;;  %v5255_v8 = vmul.f32 %v6836_v50, %v10720_v39  ;;  %v11749_v39 = vld [vmem:[#allocation190_spill] sm:$0xff] }
 0x3b1   : > { %6287 = vmatmul.mubr.bf16.gmra.mrb[52].mxu1 %v5270_v15  ;;  %v4958_v44 = vadd.f32 %v4926_v14, %v10678_v56  ;;  %v5022_v22 = vadd.f32 %v4990_v37, %v11746_v61  ;;  %v4026_v35 = vmul.f32 %v8618_v59, %v11747_v40  ;;  %v5256_v25 = vmul.f32 %v6838_v29, %v10724_v23 }
 0x3b2   : > { %6290 = vmatprep.mubr.bf16.mxu1 %v5271_v0  ;;  %v4959_v33 = vadd.f32 %v4927_v19, %v10681_v27  ;;  %v5023_v21 = vadd.f32 %v4991_v13, %v10687_v51  ;;  %v3582_v36 = vadd.f32 %v3550_v5, %v3104_v17  ;;  %6845 = vrcp.f32 %v10733_v18  ;;  %v11751_v0 = vld [vmem:[#allocation173_spill] sm:$0xff] }
 0x3b3   : > { %v5093_v56 = vadd.f32 %v5061_v60, %v4958_v44  ;;  %v5157_v53 = vadd.f32 %v11748_v34, %v5022_v22  ;;  %v4498_v38 = vmul.f32 %v8638_v30, %v11749_v39  ;;  %v5273_v63 = vpack.c.bf16 %v5256_v25, %v5255_v8 }
 0x3b4   : > { %v5094_v59 = vadd.f32 %v5062_v62, %v4959_v33  ;;  %v5158_v10 = vadd.f32 %v11750_v47, %v5023_v21  ;;  %v4058_v4 = vadd.f32 %v4026_v35, %v3582_v36  ;;  %v5129_v12 = vmul.f32 %v8612_v58, %v11752_v1 }
 0x3b5   : > { %v5189_v27 = vmul.f32 %v11751_v0, %v5157_v53  ;;  %6847 = vrcp.f32 %v5093_v56  ;;  %v5065_v15 = vmul.f32 %v11732_v32, %v8612_v58  ;;  %v5066_v62 = vmul.f32 %v11740_v2, %v8612_v58 }
 0x3b6   : > { %v6840_v51 = vpop.eup %6839  ;;  %v5190_v23 = vmul.f32 %v10537_v28, %v5158_v10  ;;  %6849 = vrcp.f32 %v5094_v59  ;;  %v4530_v55 = vadd.f32 %v4498_v38, %v4058_v4 }
 0x3b7   : > { %v6842_v18 = vpop.eup %6841  ;;  %v4860_v6 = vrot.slane %v6840_v51, %v11488_v20 }
 0x3b8   : > { %v6844_v46 = vpop.eup %6843  ;;  %v4864_v9 = vrot.slane %v6842_v18, %v11488_v20 }
 0x3b9   : > { %v4930_v30 = vmul.f32 %v10496_v41, %v4860_v6  ;;  %v4994_v52 = vmul.f32 %v10500_v42, %v4860_v6  ;;  %v4868_v3 = vrot.slane %v6844_v46, %v11488_v20  ;;  %v5130_v20 = vmul.f32 %v8612_v58, %v11754_v45 }
 0x3ba   : > { %v4931_v54 = vmul.f32 %v10496_v41, %v4864_v9  ;;  %v4995_v28 = vmul.f32 %v10500_v42, %v4864_v9 }
 0x3bb   : > { %v4962_v31 = vadd.f32 %v4930_v30, %v4528_v11  ;;  %v5026_v57 = vadd.f32 %v4994_v52, %v11753_v48  ;;  %v4996_v14 = vmul.f32 %v10500_v42, %v4868_v3  ;;  %v4932_v37 = vmul.f32 %v10496_v41, %v4868_v3 }
 0x3bc   : > { %v4963_v60 = vadd.f32 %v4931_v54, %v4529_v16  ;;  %v5027_v43 = vadd.f32 %v4995_v28, %v10743_v7  ;;  %v6846_v50 = vpop.eup %6845 }
 0x3bd   : > { %v5097_v32 = vadd.f32 %v5065_v15, %v4962_v31  ;;  %v5161_v11 = vadd.f32 %v5129_v12, %v5026_v57  ;;  %v5028_v19 = vadd.f32 %v4996_v14, %v10763_v26  ;;  %v4964_v13 = vadd.f32 %v4932_v37, %v4530_v55 }
 0x3be   : > { %v5098_v42 = vadd.f32 %v5066_v62, %v4963_v60  ;;  %v5162_v17 = vadd.f32 %v5130_v20, %v5027_v43 }
 0x3bf   : > { %v6848_v24 = vpop.eup %6847  ;;  %v5193_v41 = vmul.f32 %v10768_v49, %v5161_v11  ;;  %6851 = vrcp.f32 %v5097_v32  ;;  %5533 = vst [vmem:[%s7918_s30] sm:$0xff] %v5028_v19  ;;  %5532 = vst [vmem:[%s7920_s29] sm:$0xff] %v4964_v13 }
 0x3c0   : > { %v6850_v16 = vpop.eup %6849  ;;  %v5253_v7 = vmul.f32 %v6848_v24, %v5189_v27  ;;  %v5194_v5 = vmul.f32 %v6846_v50, %v5162_v17  ;;  %6853 = vrcp.f32 %v5098_v42 }
 0x3c1   : > { %v5254_v58 = vmul.f32 %v6850_v16, %v5190_v23 }
 0x3c3   : > { %v5272_v2 = vpack.c.bf16 %v5254_v58, %v5253_v7 }
 0x3c5   : > { %6291 = vmatmul.mubr.bf16.gmra.mrb[56].mxu1 %v5272_v2 }
 0x3c6   : > { %6294 = vmatprep.mubr.bf16.mxu1 %v5273_v63 }
 0x3c9   : > { %v6852_v26 = vpop.eup %6851 }
 0x3ca   : > { %v6854_v29 = vpop.eup %6853  ;;  %v5257_v44 = vmul.f32 %v6852_v26, %v5193_v41 }
 0x3cb   : > { %v5258_v61 = vmul.f32 %v6854_v29, %v5194_v5 }
 0x3cd   : > { %v5274_v49 = vpack.c.bf16 %v5258_v61, %v5257_v44 }
 0x3cf   : > { %6295 = vmatmul.mubr.bf16.gmra.mrb[60].mxu1 %v5274_v49 }
 0x3d0   : > { %7128 = shalt.err (!%p7125_p1)
}
 0x3d1   : > { %s7129_s17 = scalar_lea.hbm %s10830_s27, 128  ;;  %s7133_s22 = scalar_lea.hbm %s11756_s18, 256 }
 0x3d2   : > { %p7130_p13 = scmp.ne.s32.totalorder %s10830_s27, %s7129_s17  ;;  %p7134_p7 = scmp.lt.u32.totalorder %s10830_s27, %s11756_s18 }
 0x3d3   : > { %p7135_p0 = scmp.lt.u32.totalorder %s7133_s22, %s7129_s17  ;;  %p7137_p5 = scmp.lt.u32.totalorder %s7129_s17, %s10830_s27 }
 0x3d4   : > { %p7131_p4 = pnand %p7130_p13, %p11758_p3 }
 0x3d5   : > { %p7136_p2 = por %p7135_p0, %p7134_p7 }
 0x3d6   : > { %p7132_p8 = pneg %p7131_p4 }
 0x3d7   : > { %p7138_p9 = por %p7137_p5, %p7136_p2 }
 0x3d9   : > { %p7139_p12 = pnand %p7138_p9, %p7132_p8 }
 0x3db   : > { %7142 = shalt.err (!%p7139_p12)
}
 0x3dc   : > { %6331 = dma.vmem_to_hbm [thread:$0]  (%p11758_p3), %s5582_s10, 128, %s10830_s27, %s10835_s8  }
 0x3dd   : > { %s11759_s16 = sld [smem:[#allocation222_spill]]  ;;  %s5594_s1 = sshll.u32 %s7918_s30, 4  ;;  %s5595_s1 = int_to_ptr.vmem [resolvable:$true] %s5594_s1 }
 0x3de   : > { %s11760_s12 = sld [smem:[#allocation223_spill]]  ;;  %s7143_s2 = scalar_lea.vmem %s5595_s1, 128 }
 0x3df   : > { %p7144_p10 = scmp.ne.s32.totalorder %s5595_s1, %s7143_s2  ;;  %s7366_s9 = smov [#allocation20]  }
 0x3e0   : > { %s7147_s18 = sshll.u32 %s7366_s9, 4  ;;  %s7148_s18 = int_to_ptr.vmem [resolvable:$false] %s7147_s18 }
 0x3e1   : > { %p7145_p11 = pnand %p7144_p10, %p11758_p3  ;;  %s7149_s27 = scalar_lea.vmem %s7148_s18, 256 }
 0x3e2   : > { %p7150_p1 = scmp.lt.s32.totalorder %s5595_s1, %s7148_s18  ;;  %p7151_p13 = scmp.lt.s32.totalorder %s7149_s27, %s7143_s2 }
 0x3e3   : > { %s10859_s20 = scalar_lea.hbm %s11759_s16, %s10824_s28  ;;  %p7146_p6 = pneg %p7145_p11 }
 0x3e4   : > { %s10866_s22 = scalar_lea.hbm %s11760_s12, %s10824_s28  ;;  %p7152_p4 = por %p7151_p13, %p7150_p1 }
 0x3e6   : > { %p7153_p8 = pnand %p7152_p4, %p7146_p6 }
 0x3e8   : > { %7156 = shalt.err (!%p7153_p8)
}
 0x3e9   : > { %s7157_s30 = scalar_lea.hbm %s10859_s20, 128  ;;  %s7161_s11 = scalar_lea.hbm %s11759_s16, 256 }
 0x3ea   : > { %p7158_p7 = scmp.ne.s32.totalorder %s10859_s20, %s7157_s30  ;;  %p7162_p5 = scmp.lt.u32.totalorder %s10859_s20, %s11759_s16 }
 0x3eb   : > { %p7163_p9 = scmp.lt.u32.totalorder %s7161_s11, %s7157_s30  ;;  %p7165_p10 = scmp.lt.u32.totalorder %s7157_s30, %s10859_s20 }
 0x3ec   : > { %p7159_p0 = pnand %p7158_p7, %p11758_p3 }
 0x3ed   : > { %p7164_p12 = por %p7163_p9, %p7162_p5 }
 0x3ee   : > { %p7160_p2 = pneg %p7159_p0 }
 0x3ef   : > { %p7166_p11 = por %p7165_p10, %p7164_p12 }
 0x3f1   : > { %p7167_p6 = pnand %p7166_p11, %p7160_p2 }
 0x3f3   : > { %7170 = shalt.err (!%p7167_p6)
}
 0x3f4   : > { %s11761_s17 = sld [smem:[#allocation33_spill]]  ;;  %s5607_s15 = sshll.u32 %s7920_s29, 4  ;;  %s5608_s15 = int_to_ptr.vmem [resolvable:$true] %s5607_s15 }
 0x3f5   : > { %6332 = dma.vmem_to_hbm [thread:$0]  (%p11758_p3), %s5595_s1, 128, %s10859_s20, %s10835_s8  }
 0x3f6   : > { %s7171_s27 = scalar_lea.vmem %s5608_s15, 128  ;;  %s7367_s30 = smov [#allocation21]  }
 0x3f7   : > { %p7172_p1 = scmp.ne.s32.totalorder %s5608_s15, %s7171_s27  ;;  %s7175_s28 = sshll.u32 %s7367_s30, 4  ;;  %s7176_s28 = int_to_ptr.vmem [resolvable:$false] %s7175_s28 }
 0x3f8   : > { %s7177_s10 = scalar_lea.vmem %s7176_s28, 256  ;;  %p7178_p8 = scmp.lt.s32.totalorder %s5608_s15, %s7176_s28 }
 0x3f9   : > { %p7173_p13 = pnand %p7172_p1, %p11758_p3  ;;  %p7179_p7 = scmp.lt.s32.totalorder %s7177_s10, %s7171_s27 }
 0x3fa   : > { %s11762_s2 = sand.u32 1, %s11761_s17  }
 0x3fb   : > { %s5550_s9 = scalar_lea.sflag [#allocation22], %s11762_s2  ;;  %p7174_p4 = pneg %p7173_p13 }
 0x3fc   : > { %p7180_p0 = por %p7179_p7, %p7178_p8 }
 0x3fe   : > { %p7181_p2 = pnand %p7180_p0, %p7174_p4 }
 0x400   : > { %7184 = shalt.err (!%p7181_p2)
}
 0x401   : > { %s7185_s29 = scalar_lea.hbm %s10866_s22, 128  ;;  %s7189_s1 = scalar_lea.hbm %s11760_s12, 256 }
 0x402   : > { %p7186_p5 = scmp.ne.s32.totalorder %s10866_s22, %s7185_s29  ;;  %p7190_p10 = scmp.lt.u32.totalorder %s10866_s22, %s11760_s12 }
 0x403   : > { %p7191_p11 = scmp.lt.u32.totalorder %s7189_s1, %s7185_s29  ;;  %p7193_p1 = scmp.lt.u32.totalorder %s7185_s29, %s10866_s22 }
 0x404   : > { %p7187_p9 = pnand %p7186_p5, %p11758_p3 }
 0x405   : > { %p7192_p6 = por %p7191_p11, %p7190_p10 }
 0x406   : > { %p7188_p12 = pneg %p7187_p9 }
 0x407   : > { %p7194_p13 = por %p7193_p1, %p7192_p6 }
 0x409   : > { %p7195_p4 = pnand %p7194_p13, %p7188_p12 }
 0x40b   : > { %7198 = shalt.err (!%p7195_p4)
}
 0x40c   : > { %6333 = dma.vmem_to_hbm [thread:$0]  (%p11758_p3), %s5608_s15, 128, %s10866_s22, %s5550_s9  }
 0x40d   : > { %s11763_s4 = sld [smem:[#allocation34_spill]]  ;;  %s5565_s17 = sshll.u32 %s7914_s13, 4  ;;  %s10937_s17 = int_to_ptr.vmem [resolvable:$true] %s5565_s17 }
 0x40e   : > { %s11764_s27 = sld [smem:[#allocation220_spill]]  ;;  %s7199_s28 = scalar_lea.vmem %s10937_s17, 4096 }
 0x40f   : > { %p7200_p3 = scmp.ne.s32.totalorder %s10937_s17, %s7199_s28  ;;  %p11766_p8 = scmp.ne.s32.totalorder %s11212_s7, 0 }
 0x410   : > { %s7368_s29 = smov [#allocation17]  }
 0x411   : > { %p7201_p7 = pnand %p7200_p3, %p11766_p8  ;;  %s7203_s8 = sshll.u32 %s7368_s29, 4  ;;  %s7204_s8 = int_to_ptr.vmem [resolvable:$false] %s7203_s8 }
 0x412   : > { %s7205_s20 = scalar_lea.vmem %s7204_s8, 8192  ;;  %p7206_p2 = scmp.lt.s32.totalorder %s10937_s17, %s7204_s8 }
 0x413   : > { %s6009_s22 = sshll.u32 %s11763_s4, 6  ;;  %p7202_p0 = pneg %p7201_p7 }
 0x414   : > { %s5562_s18 = sadd.s32 %s11755_s5, %s6009_s22  ;;  %s11765_s10 = smov %s11764_s27 }
 0x415   : > { %s6002_s15 = sshll.u32 %s5562_s18, 7  ;;  %s5535_s5 = scalar_lea.sflag [#allocation4], %s7870_s3 }
 0x416   : > { %s10943_s30 = scalar_lea.hbm %s11764_s27, %s6002_s15  ;;  %p7207_p5 = scmp.lt.s32.totalorder %s7205_s20, %s7199_s28 }
 0x418   : > { %p7208_p9 = por %p7207_p5, %p7206_p2 }
 0x41a   : > { %p7209_p12 = pnand %p7208_p9, %p7202_p0 }
 0x43c   : > { %v6268_v22 = vpop.f32.mrb[32].mxu1 }
 0x43d   : > { %5502 = vst [vmem:[%s7914_s13 + $0x10] sm:$0xff] %v6268_v22  ;;  %v5373_v8 = vpop.f32.mrb[33].mxu1 }
 0x43e   : > { %5500 = vst [vmem:[%s7914_s13] sm:$0xff] %v5373_v8  ;;  %v6269_v40 = vpop.f32.mrb[34].mxu1 }
 0x43f   : > { %5503 = vst [vmem:[%s7914_s13 + $0x18] sm:$0xff] %v6269_v40  ;;  %v5376_v35 = vpop.f32.mrb[35].mxu1 }
 0x440   : > { %5501 = vst [vmem:[%s7914_s13 + $0x8] sm:$0xff] %v5376_v35 }
 0x447   : > { %v6272_v33 = vpop.f32.mrb[36].mxu1 }
 0x448   : > { %5506 = vst [vmem:[%s7914_s13 + $0x30] sm:$0xff] %v6272_v33  ;;  %v5389_v21 = vpop.f32.mrb[37].mxu1 }
 0x449   : > { %5504 = vst [vmem:[%s7914_s13 + $0x20] sm:$0xff] %v5389_v21  ;;  %v6273_v25 = vpop.f32.mrb[38].mxu1 }
 0x44a   : > { %5507 = vst [vmem:[%s7914_s13 + $0x38] sm:$0xff] %v6273_v25  ;;  %v5392_v36 = vpop.f32.mrb[39].mxu1 }
 0x44b   : > { %5505 = vst [vmem:[%s7914_s13 + $0x28] sm:$0xff] %v5392_v36 }
 0x467   : > { %v6276_v56 = vpop.f32.mrb[40].mxu1 }
 0x468   : > { %5510 = vst [vmem:[%s7914_s13 + $0x50] sm:$0xff] %v6276_v56  ;;  %v5405_v34 = vpop.f32.mrb[41].mxu1 }
 0x469   : > { %5508 = vst [vmem:[%s7914_s13 + $0x40] sm:$0xff] %v5405_v34  ;;  %v6277_v53 = vpop.f32.mrb[42].mxu1 }
 0x46a   : > { %5511 = vst [vmem:[%s7914_s13 + $0x58] sm:$0xff] %v6277_v53  ;;  %v5408_v39 = vpop.f32.mrb[43].mxu1 }
 0x46b   : > { %5509 = vst [vmem:[%s7914_s13 + $0x48] sm:$0xff] %v5408_v39 }
 0x473   : > { %v6280_v38 = vpop.f32.mrb[44].mxu1 }
 0x474   : > { %5514 = vst [vmem:[%s7914_s13 + $0x70] sm:$0xff] %v6280_v38  ;;  %v5421_v59 = vpop.f32.mrb[45].mxu1 }
 0x475   : > { %5512 = vst [vmem:[%s7914_s13 + $0x60] sm:$0xff] %v5421_v59  ;;  %v6281_v47 = vpop.f32.mrb[46].mxu1 }
 0x476   : > { %5515 = vst [vmem:[%s7914_s13 + $0x78] sm:$0xff] %v6281_v47  ;;  %v5424_v10 = vpop.f32.mrb[47].mxu1 }
 0x477   : > { %5513 = vst [vmem:[%s7914_s13 + $0x68] sm:$0xff] %v5424_v10 }
 0x47c   : > { %v6284_v63 = vpop.f32.mrb[48].mxu1 }
 0x47d   : > { %5518 = vst [vmem:[%s7914_s13 + $0x90] sm:$0xff] %v6284_v63  ;;  %v5437_v4 = vpop.f32.mrb[49].mxu1 }
 0x47e   : > { %5516 = vst [vmem:[%s7914_s13 + $0x80] sm:$0xff] %v5437_v4  ;;  %v6285_v0 = vpop.f32.mrb[50].mxu1 }
 0x47f   : > { %5519 = vst [vmem:[%s7914_s13 + $0x98] sm:$0xff] %v6285_v0  ;;  %v5440_v27 = vpop.f32.mrb[51].mxu1 }
 0x480   : > { %5517 = vst [vmem:[%s7914_s13 + $0x88] sm:$0xff] %v5440_v27 }
 0x484   : > { %v6288_v51 = vpop.f32.mrb[52].mxu1 }
 0x485   : > { %5522 = vst [vmem:[%s7914_s13 + $0xb0] sm:$0xff] %v6288_v51  ;;  %v5453_v23 = vpop.f32.mrb[53].mxu1 }
 0x486   : > { %5520 = vst [vmem:[%s7914_s13 + $0xa0] sm:$0xff] %v5453_v23  ;;  %v6289_v55 = vpop.f32.mrb[54].mxu1 }
 0x487   : > { %5523 = vst [vmem:[%s7914_s13 + $0xb8] sm:$0xff] %v6289_v55  ;;  %v5456_v18 = vpop.f32.mrb[55].mxu1 }
 0x488   : > { %5521 = vst [vmem:[%s7914_s13 + $0xa8] sm:$0xff] %v5456_v18 }
 0x498   : > { %v6292_v6 = vpop.f32.mrb[56].mxu1 }
 0x499   : > { %5526 = vst [vmem:[%s7914_s13 + $0xd0] sm:$0xff] %v6292_v6  ;;  %v5469_v46 = vpop.f32.mrb[57].mxu1 }
 0x49a   : > { %5524 = vst [vmem:[%s7914_s13 + $0xc0] sm:$0xff] %v5469_v46  ;;  %v6293_v9 = vpop.f32.mrb[58].mxu1 }
 0x49b   : > { %5527 = vst [vmem:[%s7914_s13 + $0xd8] sm:$0xff] %v6293_v9  ;;  %v5472_v30 = vpop.f32.mrb[59].mxu1 }
 0x49c   : > { %5525 = vst [vmem:[%s7914_s13 + $0xc8] sm:$0xff] %v5472_v30 }
 0x4a2   : > { %v6296_v52 = vpop.f32.mrb[60].mxu1 }
 0x4a3   : > { %5530 = vst [vmem:[%s7914_s13 + $0xf0] sm:$0xff] %v6296_v52  ;;  %v5485_v3 = vpop.f32.mrb[61].mxu1 }
 0x4a4   : > { %5528 = vst [vmem:[%s7914_s13 + $0xe0] sm:$0xff] %v5485_v3  ;;  %v6297_v1 = vpop.f32.mrb[62].mxu1 }
 0x4a5   : > { %5531 = vst [vmem:[%s7914_s13 + $0xf8] sm:$0xff] %v6297_v1  ;;  %v5488_v12 = vpop.f32.mrb[63].mxu1 }
 0x4a6   : > { %5529 = vst [vmem:[%s7914_s13 + $0xe8] sm:$0xff] %v5488_v12 }
 0x4a7   : > { %7212 = shalt.err (!%p7209_p12)
}
 0x4a8   : > { %s7213_s13 = scalar_lea.hbm %s10943_s30, 4096  ;;  %s7217_s14 = scalar_lea.hbm %s11765_s10, 16384 }
 0x4a9   : > { %p7214_p10 = scmp.ne.s32.totalorder %s10943_s30, %s7213_s13  ;;  %p7218_p1 = scmp.lt.u32.totalorder %s10943_s30, %s11765_s10 }
 0x4aa   : > { %p7219_p13 = scmp.lt.u32.totalorder %s7217_s14, %s7213_s13  ;;  %p7221_p3 = scmp.lt.u32.totalorder %s7213_s13, %s10943_s30 }
 0x4ab   : > { %p7215_p11 = pnand %p7214_p10, %p11766_p8 }
 0x4ac   : > { %p7220_p4 = por %p7219_p13, %p7218_p1 }
 0x4ad   : > { %p7216_p6 = pneg %p7215_p11 }
 0x4ae   : > { %p7222_p7 = por %p7221_p3, %p7220_p4 }
 0x4b0   : > { %p7223_p0 = pnand %p7222_p7, %p7216_p6 }
 0x4b2   : > { %7226 = shalt.err (!%p7223_p0)
}
 0x4b3   : > { %s7369_s18 = smov 128   ;;  %s7370_s15 = smov 256  }
 0x4b4   : > { %s7371_s2 = smov 8  }
 0x4b5   : > { %6330 = dma.vmem_to_hbm [thread:$0]  (%p11766_p8), %s10937_s17, 4096, %s10943_s30, %s5535_s5, %s7369_s18, %s7370_s15, %s7371_s2  }
 0x4b6 PF: > { %p6395_p2 = scmp.ge.s32.totalorder %s7349_s0, 2  ;;  %s5619_s9 = sand.u32 1, %s7321_s24  }
 0x4b7   : > { %p11767_p5 = scmp.ne.s32.totalorder %s11214_s6, 0  ;;  %s5620_s27 = scalar_lea.sflag [#allocation4], %s5619_s9 }
 0x4b9   : > { %p6368_p9 = pnand %p6395_p2, %p11767_p5 }
 0x4bb   : > { %7296 = dma.done.wait (!%p6368_p9), %s5620_s27, 4096  }
 0x4bc   : > { %7298 = vsyncadd (!%p6368_p9), %s5620_s27, 4294963200  ;;  %s11768_s28 = sadd.s32 4294967294, %s7349_s0   ;;  %p11769_p12 = scmp.ne.s32.totalorder %s11216_s21, 0 }
 0x4bd   : > { %s5628_s29 = sand.u32 1, %s11768_s28  }
 0x4be   : > { %p6371_p10 = pnand %p6395_p2, %p11769_p12  ;;  %s5629_s7 = scalar_lea.sflag [#allocation19], %s5628_s29 }
 0x4c0   : > { %7300 = dma.done.wait (!%p6371_p10), %s5629_s7, 256  }
 0x4c1   : > { %7302 = vsyncadd (!%p6371_p10), %s5629_s7, 4294967040  ;;  %s11770_s3 = sld [smem:[#allocation32_spill]] }
 0x4c7   : > { %s5646_s17 = sand.u32 1, %s11770_s3  }
 0x4c8   : > { %s5647_s30 = scalar_lea.sflag [#allocation22], %s5646_s17 }
 0x4c9   : > { %7304 = dma.done.wait (!%p6371_p10), %s5647_s30, 128  }
 0x4ca   : > { %7306 = vsyncadd (!%p6371_p10), %s5647_s30, 4294967168  ;;  %s45_s0 = sadd.s32 1, %s7349_s0   ;;  %s11771_s21 = sld [smem:[#allocation33_spill]] }
 0x4cb   : > { %p42_p8 = scmp.ge.s32.totalorder %s45_s0, 6   ;;  %s11772_s6 = sld [smem:[#allocation41_spill]] }
 0x4cc   : > { %s11773_s27 = sld [smem:[#allocation36_spill]]  ;;  %s11774_s28 = sld [smem:[#allocation37_spill]] }
 0x4cd   : > { %s11775_s29 = sld [smem:[#allocation39_spill]]  ;;  %s11776_s30 = sld [smem:[#allocation40_spill]] }
 0x4ce   : > { %s11777_s22 = smov %s7317_s23  ;;  %s11778_s23 = smov %s7785_s19 }
 0x4cf   : > { %s11779_s24 = smov %s7325_s25  ;;  %s11780_s25 = smov %s7329_s26 }
 0x4d0   :  { %44 = sbr.rel (!%p42_p8) target bundleno = 36 (0x24), region = 217 }
 0x4d1   : > { %s11781_s26 = smov %s11772_s6 }
 0x4d7   :  { %5652 = vsyncpa [#allocation3], 1 }
 0x4d8   :  { %5654 = vsyncpa [#allocation3 + $0x1], 1 }
 0x4d9   :  { %5655 = vsyncpa [#allocation6], 1 }
 0x4da   :  { %5657 = vsyncpa [#allocation6 + $0x1], 1 }
 0x4db   :  { %5658 = vsyncpa [#allocation9], 1 }
 0x4dc   :  { %5659 = vsyncpa [#allocation12], 1 }
 0x4dd   :  { %5660 = vsyncpa [#allocation15], 1 }
 0x4de   :  { %5661 = vsyncpa [#allocation4], 1 }
 0x4df   :  { %5663 = vsyncpa [#allocation4 + $0x1], 1 }
 0x4e0   :  { %5664 = vsyncpa [#allocation19], 1 }
 0x4e1   :  { %5666 = vsyncpa [#allocation19 + $0x1], 1 }
 0x4e2   :  { %5667 = vsyncpa [#allocation22], 1 }
 0x4e3   :  { %5669 = vsyncpa [#allocation22 + $0x1], 1 }

</bundles_post_ra>
